<compile_context>
chip_gen: v7x
topology: tpu7x:2x2x1
jax: 0.10.0
libtpu: 0.0.40
codegen_flags: <defaults>
</compile_context>

<pallas_src>
import numpy as np
import jax
import jax.numpy as jnp
from jax import lax
from jax.experimental import pallas as pl
from jax.experimental.pallas import tpu as pltpu


# ----------------------------------------------------------------------------
# Pallas kernel: fused max_norm renorm + CrossNet (2 layers, closed form) +
# Deep MLP + sigmoid combine.  One grid step processes BM batch rows.
# ----------------------------------------------------------------------------
def dcn_kernel(x_ref, m_ref, mt_ref, nall_ref, red_ref, onesd_ref,
               w1_ref, b1_ref, w2_ref, b2_ref, w3_ref, scal_ref, out_ref):
    f32 = jnp.float32
    bf16 = jnp.bfloat16
    BM, TD = x_ref.shape
    T = m_ref.shape[1]
    Dp = onesd_ref.shape[1]
    nt = (((1,), (1,)), ((), ()))          # contract minor dims (NT matmul)

    x0 = x_ref[...]                        # [BM, TD] raw flat embeddings (bf16)

    # ---- fused nn.Embedding(max_norm=1) per-(b,t) renormalisation ----------
    ssq = jnp.dot(x0 * x0, m_ref[...], preferred_element_type=f32)      # [BM, T]
    scale = jnp.where(ssq > 1.0, lax.rsqrt(ssq), 1.0)                   # [BM, T] f32
    scale_f = jnp.dot(scale.astype(bf16), mt_ref[...],
                      preferred_element_type=f32)                       # [BM, TD]
    x = x0 * scale_f.astype(bf16)                                       # renormed, bf16

    # ---- CrossNet (layer_num = 2), closed-form reduction --------------------
    # NALL = [N | N*k0 | N*k1]  (k0/k1 folded host-side), zero-padded to Dp cols
    w = jnp.dot(x, nall_ref[...], preferred_element_type=f32)           # [BM, 3*Dp]
    xd  = w[:, 0 * Dp:1 * Dp]     # sum_t e[b,t,d]
    w0  = w[:, 1 * Dp:2 * Dp]     # sum_t e[b,t,d]*k0[t]
    w1e = w[:, 2 * Dp:3 * Dp]     # sum_t e[b,t,d]*k1[t]

    pa = (xd * (w0 + w1e)).astype(bf16)    # rowsum -> sum_t dot0 + sum_t edw
    pb = (w0 * w1e).astype(bf16)           # rowsum -> dk0 = sum_t dot0[t]*k1[t]

    # lane-major [*, BM] reductions (land directly in the output layout)
    rx = lax.dot_general(red_ref[...], x, nt, preferred_element_type=f32)   # [2, BM]
    sS = rx[0:1, :]                        # sum_{t,d} e
    kc = rx[1:2, :]                        # K1 * sum_t c0[t] * S[b,t]
    onesd = onesd_ref[...]
    sde = lax.dot_general(onesd, pa, nt, preferred_element_type=f32)        # [1, BM]
    dk0 = lax.dot_general(onesd, pb, nt, preferred_element_type=f32)        # [1, BM]

    s = scal_ref[...]
    cc = s[0:1, 0:1]                       # TD*sum_s(c0+c1) / (10*10*128)
    b3 = s[0:1, 1:2]

    inv = 1.0 / (10.0 * 10.0 * 128.0)      # hard-coded divisor: faithful to torch
    fm = (float(TD) * (sde + dk0 * sS + kc) + float(T) * sS) * inv + cc     # [1, BM]

    # ---- Deep branch: bf16 MXU matmuls, f32 accumulation --------------------
    h1 = jnp.maximum(
        jnp.dot(x, w1_ref[...], preferred_element_type=f32) + b1_ref[...], 0.0)
    h2 = jnp.maximum(
        jnp.dot(h1.astype(bf16), w2_ref[...],
                preferred_element_type=f32) + b2_ref[...], 0.0)
    z3 = lax.dot_general(w3_ref[...], h2.astype(bf16), nt,
                         preferred_element_type=f32) + b3                   # [1, BM]
    deep = jax.nn.sigmoid(z3)

    # ---- combine: sigmoid(fm_out + deep_out), lane-dense store --------------
    out_row = jax.nn.sigmoid(fm + deep)                                     # [1, BM]
    out_ref[...] = out_row.reshape(1, 1, BM)


# ----------------------------------------------------------------------------
# Wrapper: index gather glue + operator construction + pallas_call.
# block_b is a sweepable tunable (keep <= ~1024 and G >= 2 on v7x).
# ----------------------------------------------------------------------------
def dcn_forward(u, i, user_table, item_table, emb_table,
                ck, cb, w1, b1, w2, b2, w3, b3, *, block_b=512):
    assert block_b % 128 == 0, "batch tile must be a multiple of 128 lanes"
    f32, bf16 = jnp.float32, jnp.bfloat16

    # TODO(synk): pandas .loc lookup + nn.Embedding row gather stay in XLA glue.
    idx = jnp.concatenate([user_table[u], item_table[i]], axis=1)        # [B, T]
    e = emb_table[idx]                                                   # [B, T, D]
    B, T, D = e.shape
    TD = T * D
    x = e.reshape(B, TD).astype(bf16)      # bf16 halves the dominant HBM stream

    G = max(1, -(-B // block_b))
    Bp = G * block_b
    if Bp != B:
        x = jnp.pad(x, ((0, Bp - B), (0, 0)))

    # ---- hoisted (grid-invariant) CrossNet parameter math -------------------
    k0 = ck[:, 0].astype(f32)
    k1 = ck[:, 1].astype(f32)
    c0 = cb[:, 0].astype(f32)
    c1 = cb[:, 1].astype(f32)
    K1 = jnp.sum(k1)
    bias_sum = jnp.sum(c0 + c1)

    tt = np.arange(TD) // D
    dd = np.arange(TD) % D
    Dp = ((D + 127) // 128) * 128          # pad per-d blocks to lane-tile width
    N_np = (dd[:, None] == np.arange(D)[None, :]).astype(np.float32)     # [TD, D]
    M_np = (tt[:, None] == np.arange(T)[None, :]).astype(np.float32)     # [TD, T]
    N = jnp.asarray(N_np)
    M = jnp.asarray(M_np, dtype=bf16)
    MT = jnp.asarray(M_np.T, dtype=bf16)

    tt_j = jnp.asarray(tt)
    k0f = k0[tt_j]
    k1f = k1[tt_j]
    c0f = c0[tt_j]

    def padc(a):
        return jnp.pad(a, ((0, 0), (0, Dp - a.shape[1])))

    # one fused per-d operator: [N | N*k0 | N*k1], each block zero-padded to Dp
    NALL = jnp.concatenate(
        [padc(N), padc(N * k0f[:, None]), padc(N * k1f[:, None])],
        axis=1).astype(bf16)                                             # [TD, 3*Dp]
    # lane-major reduction rows: ones (sum over all (t,d)) and K1*c0 expanded
    RED = jnp.stack([jnp.ones((TD,), f32), K1 * c0f], axis=0).astype(bf16)  # [2, TD]
    onesd = jnp.ones((1, Dp), bf16)

    inv = 1.0 / (10.0 * 10.0 * 128.0)
    scal = jnp.zeros((1, 128), f32)
    scal = scal.at[0, 0].set(float(TD) * bias_sum * inv)                 # bias term
    scal = scal.at[0, 1].set(jnp.reshape(b3.astype(f32), ()))            # last-layer bias

    # deep-branch weights: bf16 for the MXU, biases f32
    w1b = w1.astype(bf16)
    w2b = w2.astype(bf16)
    b1r = b1.reshape(1, -1).astype(f32)
    b2r = b2.reshape(1, -1).astype(f32)
    w3r = w3.reshape(1, -1).astype(bf16)                                 # [1, H2]
    H1 = w1.shape[1]
    H2 = w2.shape[1]

    def const_spec(shape):
        nd = len(shape)
        return pl.BlockSpec(shape, lambda i, _nd=nd: (0,) * _nd)         # resident once

    out = pl.pallas_call(
        dcn_kernel,
        out_shape=jax.ShapeDtypeStruct((G, 1, block_b), f32),
        grid=(G,),
        in_specs=[
            pl.BlockSpec((block_b, TD), lambda i: (i, 0)),               # x (streamed)
            const_spec((TD, T)),            # M  (per-t sum-of-squares operator)
            const_spec((T, TD)),            # M^T (scale expansion)
            const_spec((TD, 3 * Dp)),       # NALL = [N | N*k0 | N*k1]
            const_spec((2, TD)),            # RED = [ones ; K1*c0 expanded]
            const_spec((1, Dp)),            # ones over d
            const_spec((TD, H1)),           # w1 (bf16)
            const_spec((1, H1)),            # b1
            const_spec((H1, H2)),           # w2 (bf16)
            const_spec((1, H2)),            # b2
            const_spec((1, H2)),            # w3 row (bf16)
            const_spec((1, 128)),           # [cc, b3, 0...]
        ],
        out_specs=pl.BlockSpec((1, 1, block_b), lambda i: (i, 0, 0)),
        compiler_params=pltpu.CompilerParams(
            dimension_semantics=("parallel",),
            vmem_limit_bytes=48 * 1024 * 1024),
    )(x, M, MT, NALL, RED, onesd, w1b, b1r, w2b, b2r, w3r, scal)

    return out.reshape(-1)[:B]                                           # [B]


# ----------------------------------------------------------------------------
# Pure-JAX reference reproducing the torch ops / broadcasting literally.
# ----------------------------------------------------------------------------
def reference_forward(e, ck, cb, w1, b1, w2, b2, w3, b3):
    B, T, D = e.shape
    x0 = e[:, :, None, :]                               # [B, T, 1, D]
    xl = x0
    for layer in range(2):                              # CrossNet layer_num = 2
        k = ck[:, layer:layer + 1]                      # [T, 1]
        c = cb[:, layer:layer + 1]                      # [T, 1]
        xl_w = jnp.tensordot(xl, k, axes=([1], [0]))
        dot_ = jnp.matmul(x0, xl_w)
        xl = dot_ + c + xl                              # -> [B, T, T, D]
    fm = jnp.sum(xl.reshape(B, -1), axis=1) / (10 * 10 * 128)

    x = e.reshape(B, -1)
    h1 = jax.nn.relu(x @ w1 + b1)
    h2 = jax.nn.relu(h1 @ w2 + b2)
    deep = jax.nn.sigmoid(h2 @ w3 + b3)[:, 0]
    return jax.nn.sigmoid(fm + deep)


if __name__ == "__main__":
    # Small, deterministic synthetic configuration.
    B = 2
    n_features = 64          # embedding vocabulary
    dim = 32                 # embedding dim (torch default 128, shrunk)
    n_user_feats, n_item_feats = 3, 5
    T = n_user_feats + n_item_feats        # total_neigbours = 8
    TD = T * dim                           # 256
    n_users, n_items = 10, 12
    L = 2                                  # CrossNet layer_num (default)

    ks = jax.random.split(jax.random.PRNGKey(0), 12)

    emb_table = jax.random.normal(ks[0], (n_features, dim), jnp.float32)
    user_table = jax.random.randint(ks[1], (n_users, n_user_feats), 0, n_features)
    item_table = jax.random.randint(ks[2], (n_items, n_item_feats), 0, n_features)

    # CrossNet params: kernels xavier_normal((T,1)); biases are zeros in torch,
    # but use small NONZERO values here to exercise the closed-form bias terms.
    xav_std = (2.0 / (T + 1)) ** 0.5
    ck = xav_std * jax.random.normal(ks[3], (T, L), jnp.float32)
    cb = 0.05 * jax.random.normal(ks[10], (T, L), jnp.float32)

    # Deep MLP params (stored [in, out]); deterministic synthetic init.
    w1 = jax.random.normal(ks[4], (TD, TD // 2), jnp.float32) / (TD ** 0.5)
    b1 = jax.random.normal(ks[5], (1, TD // 2), jnp.float32) * 0.01
    w2 = jax.random.normal(ks[6], (TD // 2, TD // 4), jnp.float32) / ((TD // 2) ** 0.5)
    b2 = jax.random.normal(ks[7], (1, TD // 4), jnp.float32) * 0.01
    w3 = jax.random.normal(ks[8], (TD // 4, 1), jnp.float32) / ((TD // 4) ** 0.5)
    b3 = jax.random.normal(ks[9], (1, 1), jnp.float32) * 0.01

    u = jnp.array([1, 7], dtype=jnp.int32)
    i = jnp.array([3, 5], dtype=jnp.int32)

    out = dcn_forward(u, i, user_table, item_table, emb_table,
                      ck, cb, w1, b1, w2, b2, w3, b3)
    out = jax.block_until_ready(out)

    # correctness check against the literal torch-semantics f32 reference
    idx = jnp.concatenate([user_table[u], item_table[i]], axis=1)
    e = emb_table[idx].astype(jnp.float32)
    norm = jnp.linalg.norm(e, axis=-1, keepdims=True)
    e = e * jnp.where(norm > 1.0, 1.0 / (norm + 1e-7), 1.0)
    ref = reference_forward(e, ck, cb, w1, b1, w2, b2, w3, b3)

    # tolerance loosened vs. pure-f32 because all matmuls run in bf16
    # (with f32 accumulation).
    np.testing.assert_allclose(np.asarray(out), np.asarray(ref), rtol=2e-2, atol=2e-2)
    print("KERNEL_OK")
</pallas_src>

<mosaic_0001>
module attributes {stable_mosaic.version = 11 : i64} {
  func.func @dcn_kernel(%arg0: i32, %arg1: memref<512x256xbf16, #tpu.memory_space<vmem>>, %arg2: memref<256x8xbf16, #tpu.memory_space<vmem>>, %arg3: memref<8x256xbf16, #tpu.memory_space<vmem>>, %arg4: memref<256x384xbf16, #tpu.memory_space<vmem>>, %arg5: memref<2x256xbf16, #tpu.memory_space<vmem>>, %arg6: memref<1x128xbf16, #tpu.memory_space<vmem>>, %arg7: memref<256x128xbf16, #tpu.memory_space<vmem>>, %arg8: memref<1x128xf32, #tpu.memory_space<vmem>>, %arg9: memref<128x64xbf16, #tpu.memory_space<vmem>>, %arg10: memref<1x64xf32, #tpu.memory_space<vmem>>, %arg11: memref<1x64xbf16, #tpu.memory_space<vmem>>, %arg12: memref<1x128xf32, #tpu.memory_space<vmem>>, %arg13: memref<1x1x512xf32, #tpu.memory_space<vmem>>) attributes {dimension_semantics = [#tpu.dimension_semantics<parallel>], iteration_bounds = array<i64: 1>, scalar_prefetch = 0 : i64, scratch_operands = 0 : i64, tpu.core_type = #tpu.core_type<tc>, window_params = [{transform_indices = @transform_0, window_bounds = array<i64: 512, 256>}, {pipeline_mode = #tpu.pipeline_mode<synchronous>, transform_indices = @transform_1, window_bounds = array<i64: 256, 8>}, {pipeline_mode = #tpu.pipeline_mode<synchronous>, transform_indices = @transform_2, window_bounds = array<i64: 8, 256>}, {pipeline_mode = #tpu.pipeline_mode<synchronous>, transform_indices = @transform_3, window_bounds = array<i64: 256, 384>}, {pipeline_mode = #tpu.pipeline_mode<synchronous>, transform_indices = @transform_4, window_bounds = array<i64: 2, 256>}, {pipeline_mode = #tpu.pipeline_mode<synchronous>, transform_indices = @transform_5, window_bounds = array<i64: 1, 128>}, {pipeline_mode = #tpu.pipeline_mode<synchronous>, transform_indices = @transform_6, window_bounds = array<i64: 256, 128>}, {pipeline_mode = #tpu.pipeline_mode<synchronous>, transform_indices = @transform_7, window_bounds = array<i64: 1, 128>}, {pipeline_mode = #tpu.pipeline_mode<synchronous>, transform_indices = @transform_8, window_bounds = array<i64: 128, 64>}, {pipeline_mode = #tpu.pipeline_mode<synchronous>, transform_indices = @transform_9, window_bounds = array<i64: 1, 64>}, {pipeline_mode = #tpu.pipeline_mode<synchronous>, transform_indices = @transform_10, window_bounds = array<i64: 1, 64>}, {pipeline_mode = #tpu.pipeline_mode<synchronous>, transform_indices = @transform_11, window_bounds = array<i64: 1, 128>}, {transform_indices = @transform_12, window_bounds = array<i64: 1, 1, 512>}]} {
    %c0 = arith.constant 0 : index
    %c0_0 = arith.constant 0 : index
    %0 = vector.load %arg1[%c0, %c0_0] : memref<512x256xbf16, #tpu.memory_space<vmem>>, vector<512x256xbf16>
    %1 = arith.mulf %0, %0 : vector<512x256xbf16>
    %c0_1 = arith.constant 0 : index
    %c0_2 = arith.constant 0 : index
    %2 = vector.load %arg2[%c0_1, %c0_2] : memref<256x8xbf16, #tpu.memory_space<vmem>>, vector<256x8xbf16>
    %cst = arith.constant dense<0.000000e+00> : vector<512x8xf32>
    %3 = tpu.matmul %1, %2, %cst {dimension_numbers = #tpu.dot_dimension_numbers<[1], [0], [0], [1], [0, 0, 1, 1], [], []>} : vector<512x256xbf16>, vector<256x8xbf16>, vector<512x8xf32> -> vector<512x8xf32>
    %cst_3 = arith.constant 1.000000e+00 : f32
    %4 = vector.broadcast %cst_3 : f32 to vector<512x8xf32>
    %5 = arith.cmpf ogt, %3, %4 : vector<512x8xf32>
    %6 = math.rsqrt %3 : vector<512x8xf32>
    %cst_4 = arith.constant 1.000000e+00 : f32
    %7 = vector.broadcast %cst_4 : f32 to vector<512x8xf32>
    %8 = arith.select %5, %6, %7 : vector<512x8xi1>, vector<512x8xf32>
    %9 = arith.truncf %8 : vector<512x8xf32> to vector<512x8xbf16>
    %c0_5 = arith.constant 0 : index
    %c0_6 = arith.constant 0 : index
    %10 = vector.load %arg3[%c0_5, %c0_6] : memref<8x256xbf16, #tpu.memory_space<vmem>>, vector<8x256xbf16>
    %cst_7 = arith.constant dense<0.000000e+00> : vector<512x256xf32>
    %11 = tpu.matmul %9, %10, %cst_7 {dimension_numbers = #tpu.dot_dimension_numbers<[1], [0], [0], [1], [0, 0, 1, 1], [], []>} : vector<512x8xbf16>, vector<8x256xbf16>, vector<512x256xf32> -> vector<512x256xf32>
    %12 = arith.truncf %11 : vector<512x256xf32> to vector<512x256xbf16>
    %13 = arith.mulf %0, %12 : vector<512x256xbf16>
    %c0_8 = arith.constant 0 : index
    %c0_9 = arith.constant 0 : index
    %14 = vector.load %arg4[%c0_8, %c0_9] : memref<256x384xbf16, #tpu.memory_space<vmem>>, vector<256x384xbf16>
    %cst_10 = arith.constant dense<0.000000e+00> : vector<512x384xf32>
    %15 = tpu.matmul %13, %14, %cst_10 {dimension_numbers = #tpu.dot_dimension_numbers<[1], [0], [0], [1], [0, 0, 1, 1], [], []>} : vector<512x256xbf16>, vector<256x384xbf16>, vector<512x384xf32> -> vector<512x384xf32>
    %16 = vector.extract_strided_slice %15 {offsets = [0, 0], sizes = [512, 128], strides = [1, 1]} : vector<512x384xf32> to vector<512x128xf32>
    %17 = vector.extract_strided_slice %15 {offsets = [0, 128], sizes = [512, 128], strides = [1, 1]} : vector<512x384xf32> to vector<512x128xf32>
    %18 = vector.extract_strided_slice %15 {offsets = [0, 256], sizes = [512, 128], strides = [1, 1]} : vector<512x384xf32> to vector<512x128xf32>
    %19 = arith.addf %17, %18 : vector<512x128xf32>
    %20 = arith.mulf %16, %19 : vector<512x128xf32>
    %21 = arith.truncf %20 : vector<512x128xf32> to vector<512x128xbf16>
    %22 = arith.mulf %17, %18 : vector<512x128xf32>
    %23 = arith.truncf %22 : vector<512x128xf32> to vector<512x128xbf16>
    %c0_11 = arith.constant 0 : index
    %c0_12 = arith.constant 0 : index
    %24 = vector.load %arg5[%c0_11, %c0_12] : memref<2x256xbf16, #tpu.memory_space<vmem>>, vector<2x256xbf16>
    %cst_13 = arith.constant dense<0.000000e+00> : vector<2x512xf32>
    %25 = tpu.matmul %24, %13, %cst_13 {dimension_numbers = #tpu.dot_dimension_numbers<[1], [1], [0], [0], [0, 0, 1, 0], [], []>} : vector<2x256xbf16>, vector<512x256xbf16>, vector<2x512xf32> -> vector<2x512xf32>
    %26 = vector.extract_strided_slice %25 {offsets = [0, 0], sizes = [1, 512], strides = [1, 1]} : vector<2x512xf32> to vector<1x512xf32>
    %27 = vector.extract_strided_slice %25 {offsets = [1, 0], sizes = [1, 512], strides = [1, 1]} : vector<2x512xf32> to vector<1x512xf32>
    %c0_14 = arith.constant 0 : index
    %c0_15 = arith.constant 0 : index
    %28 = vector.load %arg6[%c0_14, %c0_15] : memref<1x128xbf16, #tpu.memory_space<vmem>>, vector<1x128xbf16>
    %cst_16 = arith.constant dense<0.000000e+00> : vector<1x512xf32>
    %29 = tpu.matmul %28, %21, %cst_16 {dimension_numbers = #tpu.dot_dimension_numbers<[1], [1], [0], [0], [0, 0, 1, 0], [], []>} : vector<1x128xbf16>, vector<512x128xbf16>, vector<1x512xf32> -> vector<1x512xf32>
    %cst_17 = arith.constant dense<0.000000e+00> : vector<1x512xf32>
    %30 = tpu.matmul %28, %23, %cst_17 {dimension_numbers = #tpu.dot_dimension_numbers<[1], [1], [0], [0], [0, 0, 1, 0], [], []>} : vector<1x128xbf16>, vector<512x128xbf16>, vector<1x512xf32> -> vector<1x512xf32>
    %c0_18 = arith.constant 0 : index
    %c0_19 = arith.constant 0 : index
    %31 = vector.load %arg12[%c0_18, %c0_19] : memref<1x128xf32, #tpu.memory_space<vmem>>, vector<1x128xf32>
    %32 = vector.extract_strided_slice %31 {offsets = [0, 0], sizes = [1, 1], strides = [1, 1]} : vector<1x128xf32> to vector<1x1xf32>
    %33 = vector.extract_strided_slice %31 {offsets = [0, 1], sizes = [1, 1], strides = [1, 1]} : vector<1x128xf32> to vector<1x1xf32>
    %34 = arith.mulf %30, %26 : vector<1x512xf32>
    %35 = arith.addf %29, %34 : vector<1x512xf32>
    %36 = arith.addf %35, %27 : vector<1x512xf32>
    %cst_20 = arith.constant 2.560000e+02 : f32
    %37 = vector.broadcast %cst_20 : f32 to vector<1x512xf32>
    %38 = arith.mulf %37, %36 : vector<1x512xf32>
    %cst_21 = arith.constant 8.000000e+00 : f32
    %39 = vector.broadcast %cst_21 : f32 to vector<1x512xf32>
    %40 = arith.mulf %39, %26 : vector<1x512xf32>
    %41 = arith.addf %38, %40 : vector<1x512xf32>
    %cst_22 = arith.constant 7.812500e-05 : f32
    %42 = vector.broadcast %cst_22 : f32 to vector<1x512xf32>
    %43 = arith.mulf %41, %42 : vector<1x512xf32>
    %44 = vector.broadcast %32 : vector<1x1xf32> to vector<1x512xf32>
    %45 = arith.addf %43, %44 : vector<1x512xf32>
    %c0_23 = arith.constant 0 : index
    %c0_24 = arith.constant 0 : index
    %46 = vector.load %arg7[%c0_23, %c0_24] : memref<256x128xbf16, #tpu.memory_space<vmem>>, vector<256x128xbf16>
    %cst_25 = arith.constant dense<0.000000e+00> : vector<512x128xf32>
    %47 = tpu.matmul %13, %46, %cst_25 {dimension_numbers = #tpu.dot_dimension_numbers<[1], [0], [0], [1], [0, 0, 1, 1], [], []>} : vector<512x256xbf16>, vector<256x128xbf16>, vector<512x128xf32> -> vector<512x128xf32>
    %c0_26 = arith.constant 0 : index
    %c0_27 = arith.constant 0 : index
    %48 = vector.load %arg8[%c0_26, %c0_27] : memref<1x128xf32, #tpu.memory_space<vmem>>, vector<1x128xf32>
    %49 = vector.broadcast %48 : vector<1x128xf32> to vector<512x128xf32>
    %50 = arith.addf %47, %49 : vector<512x128xf32>
    %cst_28 = arith.constant 0.000000e+00 : f32
    %51 = vector.broadcast %cst_28 : f32 to vector<512x128xf32>
    %52 = arith.maximumf %50, %51 : vector<512x128xf32>
    %53 = arith.truncf %52 : vector<512x128xf32> to vector<512x128xbf16>
    %c0_29 = arith.constant 0 : index
    %c0_30 = arith.constant 0 : index
    %54 = vector.load %arg9[%c0_29, %c0_30] : memref<128x64xbf16, #tpu.memory_space<vmem>>, vector<128x64xbf16>
    %cst_31 = arith.constant dense<0.000000e+00> : vector<512x64xf32>
    %55 = tpu.matmul %53, %54, %cst_31 {dimension_numbers = #tpu.dot_dimension_numbers<[1], [0], [0], [1], [0, 0, 1, 1], [], []>} : vector<512x128xbf16>, vector<128x64xbf16>, vector<512x64xf32> -> vector<512x64xf32>
    %c0_32 = arith.constant 0 : index
    %c0_33 = arith.constant 0 : index
    %56 = vector.load %arg10[%c0_32, %c0_33] : memref<1x64xf32, #tpu.memory_space<vmem>>, vector<1x64xf32>
    %57 = vector.broadcast %56 : vector<1x64xf32> to vector<512x64xf32>
    %58 = arith.addf %55, %57 : vector<512x64xf32>
    %cst_34 = arith.constant 0.000000e+00 : f32
    %59 = vector.broadcast %cst_34 : f32 to vector<512x64xf32>
    %60 = arith.maximumf %58, %59 : vector<512x64xf32>
    %c0_35 = arith.constant 0 : index
    %c0_36 = arith.constant 0 : index
    %61 = vector.load %arg11[%c0_35, %c0_36] : memref<1x64xbf16, #tpu.memory_space<vmem>>, vector<1x64xbf16>
    %62 = arith.truncf %60 : vector<512x64xf32> to vector<512x64xbf16>
    %cst_37 = arith.constant dense<0.000000e+00> : vector<1x512xf32>
    %63 = tpu.matmul %61, %62, %cst_37 {dimension_numbers = #tpu.dot_dimension_numbers<[1], [1], [0], [0], [0, 0, 1, 0], [], []>} : vector<1x64xbf16>, vector<512x64xbf16>, vector<1x512xf32> -> vector<1x512xf32>
    %64 = vector.broadcast %33 : vector<1x1xf32> to vector<1x512xf32>
    %65 = arith.addf %63, %64 : vector<1x512xf32>
    %66 = arith.negf %65 : vector<1x512xf32>
    %67 = math.exp %66 : vector<1x512xf32>
    %cst_38 = arith.constant 1.000000e+00 : f32
    %68 = vector.broadcast %cst_38 : f32 to vector<1x512xf32>
    %69 = arith.addf %68, %67 : vector<1x512xf32>
    %70 = arith.divf %68, %69 : vector<1x512xf32>
    %71 = arith.addf %45, %70 : vector<1x512xf32>
    %72 = arith.negf %71 : vector<1x512xf32>
    %73 = math.exp %72 : vector<1x512xf32>
    %cst_39 = arith.constant 1.000000e+00 : f32
    %74 = vector.broadcast %cst_39 : f32 to vector<1x512xf32>
    %75 = arith.addf %74, %73 : vector<1x512xf32>
    %76 = arith.divf %74, %75 : vector<1x512xf32>
    %77 = vector.shape_cast %76 : vector<1x512xf32> to vector<1x1x512xf32>
    %c0_40 = arith.constant 0 : index
    %c0_41 = arith.constant 0 : index
    %c0_42 = arith.constant 0 : index
    %78 = vector.load %arg13[%c0_40, %c0_41, %c0_42] : memref<1x1x512xf32, #tpu.memory_space<vmem>>, vector<1x1x512xf32>
    tpu.vector_store %arg13[%c0_40, %c0_41, %c0_42], %77 {strides = array<i32>} : memref<1x1x512xf32, #tpu.memory_space<vmem>>, vector<1x1x512xf32>,
    return
  }
  func.func @transform_0(%arg0: i32) -> (i32, i32) {
    %c0_i32 = arith.constant 0 : i32
    %c0_i32_0 = arith.constant 0 : i32
    return %arg0, %c0_i32 : i32, i32
  }
  func.func @transform_1(%arg0: i32) -> (i32, i32) {
    %c0_i32 = arith.constant 0 : i32
    %c0_i32_0 = arith.constant 0 : i32
    %c0_i32_1 = arith.constant 0 : i32
    return %c0_i32, %c0_i32_0 : i32, i32
  }
  func.func @transform_2(%arg0: i32) -> (i32, i32) {
    %c0_i32 = arith.constant 0 : i32
    %c0_i32_0 = arith.constant 0 : i32
    %c0_i32_1 = arith.constant 0 : i32
    return %c0_i32, %c0_i32_0 : i32, i32
  }
  func.func @transform_3(%arg0: i32) -> (i32, i32) {
    %c0_i32 = arith.constant 0 : i32
    %c0_i32_0 = arith.constant 0 : i32
    %c0_i32_1 = arith.constant 0 : i32
    return %c0_i32, %c0_i32_0 : i32, i32
  }
  func.func @transform_4(%arg0: i32) -> (i32, i32) {
    %c0_i32 = arith.constant 0 : i32
    %c0_i32_0 = arith.constant 0 : i32
    %c0_i32_1 = arith.constant 0 : i32
    return %c0_i32, %c0_i32_0 : i32, i32
  }
  func.func @transform_5(%arg0: i32) -> (i32, i32) {
    %c0_i32 = arith.constant 0 : i32
    %c0_i32_0 = arith.constant 0 : i32
    %c0_i32_1 = arith.constant 0 : i32
    return %c0_i32, %c0_i32_0 : i32, i32
  }
  func.func @transform_6(%arg0: i32) -> (i32, i32) {
    %c0_i32 = arith.constant 0 : i32
    %c0_i32_0 = arith.constant 0 : i32
    %c0_i32_1 = arith.constant 0 : i32
    return %c0_i32, %c0_i32_0 : i32, i32
  }
  func.func @transform_7(%arg0: i32) -> (i32, i32) {
    %c0_i32 = arith.constant 0 : i32
    %c0_i32_0 = arith.constant 0 : i32
    %c0_i32_1 = arith.constant 0 : i32
    return %c0_i32, %c0_i32_0 : i32, i32
  }
  func.func @transform_8(%arg0: i32) -> (i32, i32) {
    %c0_i32 = arith.constant 0 : i32
    %c0_i32_0 = arith.constant 0 : i32
    %c0_i32_1 = arith.constant 0 : i32
    return %c0_i32, %c0_i32_0 : i32, i32
  }
  func.func @transform_9(%arg0: i32) -> (i32, i32) {
    %c0_i32 = arith.constant 0 : i32
    %c0_i32_0 = arith.constant 0 : i32
    %c0_i32_1 = arith.constant 0 : i32
    return %c0_i32, %c0_i32_0 : i32, i32
  }
  func.func @transform_10(%arg0: i32) -> (i32, i32) {
    %c0_i32 = arith.constant 0 : i32
    %c0_i32_0 = arith.constant 0 : i32
    %c0_i32_1 = arith.constant 0 : i32
    return %c0_i32, %c0_i32_0 : i32, i32
  }
  func.func @transform_11(%arg0: i32) -> (i32, i32) {
    %c0_i32 = arith.constant 0 : i32
    %c0_i32_0 = arith.constant 0 : i32
    %c0_i32_1 = arith.constant 0 : i32
    return %c0_i32, %c0_i32_0 : i32, i32
  }
  func.func @transform_12(%arg0: i32) -> (i32, i32, i32) {
    %c0_i32 = arith.constant 0 : i32
    %c0_i32_0 = arith.constant 0 : i32
    %c0_i32_1 = arith.constant 0 : i32
    return %arg0, %c0_i32, %c0_i32_0 : i32, i32, i32
  }
}

</mosaic_0001>

<bundles_post_ra>
// kernel: tpu_custom_call.1
= control target key start
LH: loop header
LB: loop body
LE: loop exit
PB: predicated region body
PF: predicated region fallthrough
CT: control target
= control target key end

     0   :  { %17 = vsyncpa [#allocation3], 0  ;;  %s7963_s0 = inlined_call_operand.hbm [shape: bf16[512,256], index: 0, kind: input, shape index: {}]   ;;  %s7964_s1 = inlined_call_operand.vmem [shape: bf16[256,8], index: 1, kind: input, shape index: {}]   ;;  %s7965_s2 = inlined_call_operand.vmem [shape: bf16[8,256], index: 2, kind: input, shape index: {}]   ;;  %s7966_s3 = inlined_call_operand.hbm [shape: bf16[256,384], index: 3, kind: input, shape index: {}]   ;;  %s7967_s4 = inlined_call_operand.vmem [shape: bf16[2,256], index: 4, kind: input, shape index: {}]   ;;  %s7968_s5 = inlined_call_operand.vmem [shape: bf16[1,128], index: 5, kind: input, shape index: {}]   ;;  %s7969_s6 = inlined_call_operand.vmem [shape: bf16[256,128], index: 6, kind: input, shape index: {}]   ;;  %s7970_s7 = inlined_call_operand.vmem [shape: f32[1,128], index: 7, kind: input, shape index: {}]   ;;  %s7971_s8 = inlined_call_operand.vmem [shape: bf16[128,64], index: 8, kind: input, shape index: {}]   ;;  %s7972_s9 = inlined_call_operand.vmem [shape: f32[1,64], index: 9, kind: input, shape index: {}]   ;;  %s7973_s10 = inlined_call_operand.vmem [shape: bf16[1,64], index: 10, kind: input, shape index: {}]   ;;  %s7974_s11 = inlined_call_operand.vmem [shape: f32[1,128], index: 11, kind: input, shape index: {}]   ;;  %s7975_s12 = inlined_call_operand.hbm [shape: f32[1,1,512], index: 12, kind: output, shape index: {}]  }
   0x1   :  { %18 = vsyncpa [#allocation6], 0 }
   0x2   :  { %19 = vsyncpa [#allocation4], 0  ;;  %s6253_s21 = smov [#allocation2]   ;;  %s6181_s25 = scalar_lea.hbm %s7963_s0, 8192 }
   0x3   :  { %s25_s22 = sshll.u32 %s6253_s21, 4  ;;  %p6182_p0 = scmp.ne.s32.totalorder %s7963_s0, %s6181_s25  ;;  %s26_s22 = int_to_ptr.vmem [resolvable:$true] %s25_s22 }
   0x4   :  { %p6185_p1 = scmp.lt.u32.totalorder %s6181_s25, %s7963_s0 }
   0x6   :  { %p6187_p2 = pnand %p6185_p1, %p6182_p0 }
   0x8   :  { %6190 = shalt.err (!%p6187_p2)
}
   0x9   :  { %s6191_s30 = scalar_lea.vmem %s26_s22, 8192  ;;  %p6196_p4 = scmp.lt.s32.totalorder %s26_s22, %s26_s22 }
   0xa   :  { %p6192_p3 = scmp.ne.s32.totalorder %s26_s22, %s6191_s30  ;;  %p6197_p5 = scmp.lt.s32.totalorder %s6191_s30, %s6191_s30 }
   0xc   :  { %p6198_p6 = por %p6197_p5, %p6196_p4 }
   0xe   :  { %p6199_p7 = pnand %p6198_p6, %p6192_p3 }
  0x10   :  { %6202 = shalt.err (!%p6199_p7)
}
  0x11   :  { %s6254_s13 = smov 128   ;;  %s6255_s14 = smov 8  }
  0x12   :  { %31 = dma.hbm_to_vmem [thread:$0]  %s7963_s0, 8192, %s26_s22, [#allocation3], %s6254_s13, %s6254_s13, %s6255_s14  }
  0x13   :  { %s6256_s17 = smov [#allocation5]   ;;  %s6203_s21 = scalar_lea.hbm %s7966_s3, 6144 }
  0x14   :  { %s41_s18 = sshll.u32 %s6256_s17, 4  ;;  %p6204_p8 = scmp.ne.s32.totalorder %s7966_s3, %s6203_s21  ;;  %s42_s18 = int_to_ptr.vmem [resolvable:$true] %s41_s18 }
  0x15   :  { %p6207_p9 = scmp.lt.u32.totalorder %s6203_s21, %s7966_s3 }
  0x17   :  { %p6209_p10 = pnand %p6207_p9, %p6204_p8 }
  0x19   :  { %6212 = shalt.err (!%p6209_p10)
}
  0x1a   :  { %s6213_s27 = scalar_lea.vmem %s42_s18, 6144  ;;  %p6218_p12 = scmp.lt.s32.totalorder %s42_s18, %s42_s18 }
  0x1b   :  { %p6214_p11 = scmp.ne.s32.totalorder %s42_s18, %s6213_s27  ;;  %p6219_p13 = scmp.lt.s32.totalorder %s6213_s27, %s6213_s27 }
  0x1d   :  { %p6220_p0 = por %p6219_p13, %p6218_p12 }
  0x1f   :  { %p6221_p1 = pnand %p6220_p0, %p6214_p11 }
  0x21   :  { %6224 = shalt.err (!%p6221_p1)
}
  0x22   :  { %s6257_s0 = smov 192   ;;  %s6258_s22 = smov 12  }
  0x23   :  { %47 = dma.hbm_to_vmem [thread:$0]  %s7966_s3, 6144, %s42_s18, [#allocation6], %s6257_s0, %s6257_s0, %s6258_s22  }
  0x24   :  { %6247 = dma.done.wait [#allocation3], 8192  }
  0x25   :  { %6248 = vsyncadd [#allocation3], 4294959104 }
  0x26   :  { %6249 = dma.done.wait [#allocation6], 6144  }
  0x27   :  { %6250 = vsyncadd [#allocation6], 4294961152  ;;  %v7976_v0 = vmov 0   ;;  %v5850_v1 = vld [vmem:[%s7964_s1] sm:$0xff]   ;;  %v5851_v2 = vld [vmem:[%s7964_s1 + $0x8] sm:$0xff]   ;;  %vm1263_vm0 = vcmask 1043456  }
  0x28   :  { %647 = vmatprep.subr.bf16.mxu0 %v7976_v0  ;;  %1302 = vmatprep.mubr.bf16.mxu1 %v7976_v0  ;;  %v5852_v3 = vld [vmem:[%s7964_s1 + $0x10] sm:$0xff]   ;;  %v5853_v4 = vld [vmem:[%s7964_s1 + $0x18] sm:$0xff]   ;;  %v5854_v5 = vld [vmem:[%s7964_s1 + $0x20] sm:$0xff]   ;;  %vm1166_vm3 = vcmask 64512  }
  0x29   :  { %648 = vmatpush1.bf16.msra.mxu0 %v5850_v1  ;;  %v71_v6 = vld [vmem:[#allocation2] sm:$0xff]  ;;  %v72_v7 = vld [vmem:[#allocation2 + $0x8] sm:$0xff]  ;;  %v5856_v12 = vld [vmem:[%s7964_s1 + $0x30] sm:$0xff]  }
  0x2a   :  { %649 = vmatprep.subr.bf16.mxu0 %v7976_v0  ;;  %v135_v8 = vmul.bf16 %v71_v6, %v71_v6  ;;  %v136_v9 = vmul.bf16 %v72_v7, %v72_v7  ;;  %v5855_v10 = vld [vmem:[%s7964_s1 + $0x28] sm:$0xff]   ;;  %v5857_v13 = vld [vmem:[%s7964_s1 + $0x38] sm:$0xff]   ;;  %v5858_v14 = vld [vmem:[%s7964_s1 + $0x40] sm:$0xff]  }
  0x2b   :  { %v5859_v15 = vld [vmem:[%s7964_s1 + $0x48] sm:$0xff]   ;;  %v5860_v16 = vld [vmem:[%s7964_s1 + $0x50] sm:$0xff]   ;;  %v5861_v17 = vld [vmem:[%s7964_s1 + $0x58] sm:$0xff]  }
  0x2c   :  { %v5202_v11 = vcombine.high %v135_v8, %v136_v9  ;;  %v5862_v18 = vld [vmem:[%s7964_s1 + $0x60] sm:$0xff]   ;;  %v5863_v19 = vld [vmem:[%s7964_s1 + $0x68] sm:$0xff]   ;;  %v5864_v20 = vld [vmem:[%s7964_s1 + $0x70] sm:$0xff]   ;;  %v5201_v26 = vcombine.low %v135_v8, %v136_v9 }
  0x2d   :  { %650 = vmatpush1.bf16.msra.mxu0 %v5851_v2  ;;  %v73_v21 = vld [vmem:[#allocation2 + $0x10] sm:$0xff]  ;;  %v74_v22 = vld [vmem:[#allocation2 + $0x18] sm:$0xff]  ;;  %v75_v27 = vld [vmem:[#allocation2 + $0x20] sm:$0xff] }
  0x2e   :  { %651 = vmatprep.subr.bf16.mxu0 %v7976_v0  ;;  %679 = vmatprep.mubr.bf16.mxu0 %v5202_v11  ;;  %v5865_v23 = vld [vmem:[%s7964_s1 + $0x78] sm:$0xff]   ;;  %v137_v24 = vmul.bf16 %v73_v21, %v73_v21  ;;  %v138_v25 = vmul.bf16 %v74_v22, %v74_v22  ;;  %v76_v28 = vld [vmem:[#allocation2 + $0x28] sm:$0xff]  ;;  %v139_v30 = vmul.bf16 %v75_v27, %v75_v27  ;;  %v77_v34 = vld [vmem:[#allocation2 + $0x30] sm:$0xff] }
  0x2f   :  { %v140_v31 = vmul.bf16 %v76_v28, %v76_v28  ;;  %v78_v35 = vld [vmem:[#allocation2 + $0x38] sm:$0xff]  ;;  %v141_v36 = vmul.bf16 %v77_v34, %v77_v34  ;;  %v79_v40 = vld [vmem:[#allocation2 + $0x40] sm:$0xff]  ;;  %v80_v41 = vld [vmem:[#allocation2 + $0x48] sm:$0xff] }
  0x30   :  { %v5204_v29 = vcombine.high %v137_v24, %v138_v25  ;;  %v5203_v32 = vcombine.low %v137_v24, %v138_v25  ;;  %v142_v37 = vmul.bf16 %v78_v35, %v78_v35  ;;  %v143_v42 = vmul.bf16 %v79_v40, %v79_v40  ;;  %v81_v46 = vld [vmem:[#allocation2 + $0x50] sm:$0xff]  ;;  %v82_v47 = vld [vmem:[#allocation2 + $0x58] sm:$0xff]  ;;  %v83_v52 = vld [vmem:[#allocation2 + $0x60] sm:$0xff] }
  0x31   :  { %652 = vmatpush1.bf16.msra.mxu0 %v5852_v3  ;;  %v5206_v33 = vcombine.high %v139_v30, %v140_v31  ;;  %v5205_v38 = vcombine.low %v139_v30, %v140_v31  ;;  %v144_v43 = vmul.bf16 %v80_v41, %v80_v41  ;;  %v145_v48 = vmul.bf16 %v81_v46, %v81_v46  ;;  %v84_v53 = vld [vmem:[#allocation2 + $0x68] sm:$0xff]  ;;  %v85_v58 = vld [vmem:[#allocation2 + $0x70] sm:$0xff]  ;;  %v86_v59 = vld [vmem:[#allocation2 + $0x78] sm:$0xff] }
  0x32   :  { %653 = vmatprep.subr.bf16.mxu0 %v7976_v0  ;;  %v5208_v39 = vcombine.high %v141_v36, %v142_v37  ;;  %v5207_v44 = vcombine.low %v141_v36, %v142_v37  ;;  %v146_v49 = vmul.bf16 %v82_v47, %v82_v47  ;;  %v147_v54 = vmul.bf16 %v83_v52, %v83_v52  ;;  %v87_v1 = vld [vmem:[#allocation2 + $0x80] sm:$0xff]  ;;  %v88_v2 = vld [vmem:[#allocation2 + $0x88] sm:$0xff]  ;;  %v89_v7 = vld [vmem:[#allocation2 + $0x90] sm:$0xff] }
  0x33   :  { %v5210_v45 = vcombine.high %v143_v42, %v144_v43  ;;  %v5209_v50 = vcombine.low %v143_v42, %v144_v43  ;;  %v148_v55 = vmul.bf16 %v84_v53, %v84_v53  ;;  %v149_v60 = vmul.bf16 %v85_v58, %v85_v58  ;;  %v90_v8 = vld [vmem:[#allocation2 + $0x98] sm:$0xff]  ;;  %v95_v25 = vld [vmem:[#allocation2 + $0xc0] sm:$0xff]  ;;  %v97_v31 = vld [vmem:[#allocation2 + $0xd0] sm:$0xff] }
  0x34   :  { %v5212_v51 = vcombine.high %v145_v48, %v146_v49  ;;  %v5211_v56 = vcombine.low %v145_v48, %v146_v49  ;;  %v150_v61 = vmul.bf16 %v86_v59, %v86_v59  ;;  %v151_v3 = vmul.bf16 %v87_v1, %v87_v1  ;;  %v1160_v37 = vld [vmem:[%s7965_s2] sm:$0xff]  ;;  %v101_v47 = vld [vmem:[#allocation2 + $0xf0] sm:$0xff]  ;;  %v102_v48 = vld [vmem:[#allocation2 + $0xf8] sm:$0xff] }
  0x35   :  { %654 = vmatpush1.bf16.msra.mxu0 %v5853_v4  ;;  %v5214_v57 = vcombine.high %v147_v54, %v148_v55  ;;  %v5213_v62 = vcombine.low %v147_v54, %v148_v55  ;;  %v152_v4 = vmul.bf16 %v88_v2, %v88_v2  ;;  %v153_v9 = vmul.bf16 %v89_v7, %v89_v7  ;;  %v103_v53 = vld [vmem:[#allocation2 + $0x100] sm:$0xff]  ;;  %v104_v54 = vld [vmem:[#allocation2 + $0x108] sm:$0xff] }
  0x36   :  { %655 = vmatprep.subr.bf16.mxu0 %v7976_v0  ;;  %v5216_v63 = vcombine.high %v149_v60, %v150_v61  ;;  %v159_v27 = vmul.bf16 %v95_v25, %v95_v25  ;;  %v5282_v40 = vcombine.high %v1160_v37, %v1160_v37  ;;  %v5281_v41 = vcombine.low %v1160_v37, %v1160_v37  ;;  %v5870_v55 = vld [vmem:[#allocation5 + $0x4] ss:$12 sps:$4 sm:$0xff]   ;;  %v5871_v58 = vld [vmem:[#allocation5 + $0x8] ss:$12 sps:$4 sm:$0xff]   ;;  %v114_v25 = vld [vmem:[#allocation2 + $0x158] sm:$0xff] }
  0x37   :  { %v5218_v6 = vcombine.high %v151_v3, %v152_v4  ;;  %v5217_v11 = vcombine.low %v151_v3, %v152_v4  ;;  %v165_v49 = vmul.bf16 %v101_v47, %v101_v47  ;;  %v107_v4 = vld [vmem:[#allocation2 + $0x120] sm:$0xff]  ;;  %v117_v37 = vld [vmem:[#allocation2 + $0x170] sm:$0xff] }
  0x38   :  { %5283 = vmatprep.subr.msk.bf16.mxu1 %vm1263_vm0, %v5282_v40  ;;  %v1265_v42 = vsel %vm1263_vm0, %v5281_v41, 0  ;;  %v5887_v47 = vld [vmem:[#allocation5 + $0x68] ss:$12 sps:$4 sm:$0xff]  }
  0x39   :  { %656 = vmatpush1.bf16.msra.mxu0 %v5854_v5  ;;  %v5215_v5 = vcombine.low %v149_v60, %v150_v61  ;;  %1271 = vmatpush1.bf16.msra.mxu1 %v1265_v42  ;;  %v105_v61 = vld [vmem:[#allocation2 + $0x110] sm:$0xff] }
  0x3a   :  { %657 = vmatprep.subr.bf16.mxu0 %v7976_v0  ;;  %2711 = vmatprep.subr.bf16.mxu1 %v5870_v55 }
  0x3d   :  { %658 = vmatpush1.bf16.msra.mxu0 %v5855_v10  ;;  %v154_v10 = vmul.bf16 %v90_v8, %v90_v8  ;;  %v5875_v8 = vld [vmem:[#allocation5 + $0x20] ss:$12 sps:$4 sm:$0xff]  }
  0x3e   :  { %659 = vmatprep.subr.bf16.mxu0 %v7976_v0 }
  0x41   :  { %660 = vmatpush1.bf16.msra.mxu0 %v5856_v12  ;;  %v5220_v12 = vcombine.high %v153_v9, %v154_v10 }
  0x42   :  { %661 = vmatprep.subr.bf16.mxu0 %v7976_v0 }
  0x45   :  { %662 = vmatpush1.bf16.msra.mxu0 %v5857_v13  ;;  %v91_v13 = vld [vmem:[#allocation2 + $0xa0] sm:$0xff] }
  0x46   :  { %663 = vmatprep.subr.bf16.mxu0 %v7976_v0 }
  0x49   :  { %664 = vmatpush1.bf16.msra.mxu0 %v5858_v14  ;;  %v92_v14 = vld [vmem:[#allocation2 + $0xa8] sm:$0xff] }
  0x4a   :  { %665 = vmatprep.subr.bf16.mxu0 %v7976_v0 }
  0x4d   :  { %666 = vmatpush1.bf16.msra.mxu0 %v5859_v15  ;;  %v155_v15 = vmul.bf16 %v91_v13, %v91_v13 }
  0x4e   :  { %667 = vmatprep.subr.bf16.mxu0 %v7976_v0 }
  0x51   :  { %668 = vmatpush1.bf16.msra.mxu0 %v5860_v16  ;;  %v156_v16 = vmul.bf16 %v92_v14, %v92_v14 }
  0x52   :  { %669 = vmatprep.subr.bf16.mxu0 %v7976_v0 }
  0x55   :  { %670 = vmatpush1.bf16.msra.mxu0 %v5861_v17  ;;  %v5219_v17 = vcombine.low %v153_v9, %v154_v10 }
  0x56   :  { %671 = vmatprep.subr.bf16.mxu0 %v7976_v0 }
  0x59   :  { %672 = vmatpush1.bf16.msra.mxu0 %v5862_v18  ;;  %v5222_v18 = vcombine.high %v155_v15, %v156_v16 }
  0x5a   :  { %673 = vmatprep.subr.bf16.mxu0 %v7976_v0 }
  0x5d   :  { %674 = vmatpush1.bf16.msra.mxu0 %v5863_v19  ;;  %v93_v19 = vld [vmem:[#allocation2 + $0xb0] sm:$0xff] }
  0x5e   :  { %675 = vmatprep.subr.bf16.mxu0 %v7976_v0  ;;  %v157_v21 = vmul.bf16 %v93_v19, %v93_v19 }
  0x61   :  { %676 = vmatpush1.bf16.msra.mxu0 %v5864_v20  ;;  %v94_v20 = vld [vmem:[#allocation2 + $0xb8] sm:$0xff] }
  0x62   :  { %677 = vmatprep.subr.bf16.mxu0 %v7976_v0  ;;  %v158_v22 = vmul.bf16 %v94_v20, %v94_v20 }
  0x64   :  { %v5224_v24 = vcombine.high %v157_v21, %v158_v22 }
  0x65   :  { %678 = vmatpush1.bf16.msra.mxu0 %v5865_v23  ;;  %v5221_v23 = vcombine.low %v155_v15, %v156_v16 }
  0x66   :  { %3064 = vmatprep.subr.bf16.mxu0 %v7976_v0 }
  0x68   :  { %680 = vmatmul.mubr.bf16.vlgmr.msra.gmra.mrb[0].mxu0 %v5201_v26  ;;  %v96_v26 = vld [vmem:[#allocation2 + $0xc8] sm:$0xff] }
  0x69   :  { %687 = vmatprep.mubr.bf16.mxu0 %v5204_v29  ;;  %v160_v28 = vmul.bf16 %v96_v26, %v96_v26  ;;  %v5223_v29 = vcombine.low %v157_v21, %v158_v22  ;;  %3065 = vmatpush1.bf16.msra.mxu0 %v5871_v58  ;;  %v5879_v21 = vld [vmem:[#allocation5 + $0x38] ss:$12 sps:$4 sm:$0xff]  }
  0x6a   :  { %3066 = vmatprep.subr.bf16.mxu0 %v7976_v0 }
  0x6b   :  { %v5226_v30 = vcombine.high %v159_v27, %v160_v28  ;;  %v5225_v35 = vcombine.low %v159_v27, %v160_v28  ;;  %v178_v27 = vmul.bf16 %v114_v25, %v114_v25 }
  0x6d   :  { %3067 = vmatpush1.bf16.msra.mxu0 %v5875_v8 }
  0x6e   :  { %3068 = vmatprep.subr.bf16.mxu0 %v7976_v0 }
  0x70   :  { %688 = vmatmul.mubr.bf16.gmra.mrb[4].mxu0 %v5203_v32  ;;  %v98_v32 = vld [vmem:[#allocation2 + $0xd8] sm:$0xff] }
  0x71   :  { %695 = vmatprep.mubr.bf16.mxu0 %v5206_v33  ;;  %v161_v33 = vmul.bf16 %v97_v31, %v97_v31  ;;  %v162_v34 = vmul.bf16 %v98_v32, %v98_v32  ;;  %3069 = vmatpush1.bf16.msra.mxu0 %v5879_v21  ;;  %v116_v31 = vld [vmem:[#allocation2 + $0x168] sm:$0xff] }
  0x72   :  { %3070 = vmatprep.subr.bf16.mxu0 %v7976_v0 }
  0x73   :  { %v5228_v36 = vcombine.high %v161_v33, %v162_v34 }
  0x78   :  { %696 = vmatmul.mubr.bf16.gmra.mrb[8].mxu0 %v5205_v38  ;;  %v99_v38 = vld [vmem:[#allocation2 + $0xe0] sm:$0xff] }
  0x79   :  { %703 = vmatprep.mubr.bf16.mxu0 %v5208_v39  ;;  %v100_v39 = vld [vmem:[#allocation2 + $0xe8] sm:$0xff]  ;;  %v163_v43 = vmul.bf16 %v99_v38, %v99_v38  ;;  %v118_v38 = vld [vmem:[#allocation2 + $0x178] sm:$0xff] }
  0x7a   :  { %v182_v40 = vmul.bf16 %v118_v38, %v118_v38  ;;  %v5874_v38 = vld [vmem:[#allocation5 + $0x1c] ss:$12 sps:$4 sm:$0xff]  }
  0x80   :  { %704 = vmatmul.mubr.bf16.gmra.mrb[12].mxu0 %v5207_v44  ;;  %v164_v44 = vmul.bf16 %v100_v39, %v100_v39  ;;  %v181_v39 = vmul.bf16 %v117_v37, %v117_v37 }
  0x81   :  { %711 = vmatprep.mubr.bf16.mxu0 %v5210_v45  ;;  %v5227_v45 = vcombine.low %v161_v33, %v162_v34  ;;  %v180_v33 = vmul.bf16 %v116_v31, %v116_v31  ;;  %v5883_v34 = vld [vmem:[#allocation5 + $0x50] ss:$12 sps:$4 sm:$0xff]  }
  0x82   :  { %v5230_v46 = vcombine.high %v163_v43, %v164_v44  ;;  %3071 = vmatpush1.bf16.msra.mxu0 %v5883_v34  ;;  %v5248_v42 = vcombine.high %v181_v39, %v182_v40 }
  0x83   :  { %3072 = vmatprep.subr.bf16.mxu0 %v7976_v0 }
  0x86   :  { %3073 = vmatpush1.bf16.msra.mxu0 %v5887_v47  ;;  %v133_v47 = vld [vmem:[#allocation2 + $0x1f0] sm:$0xff] }
  0x87   :  { %3074 = vmatprep.subr.bf16.mxu0 %v7976_v0 }
  0x88   :  { %712 = vmatmul.mubr.bf16.gmra.mrb[16].mxu0 %v5209_v50  ;;  %v166_v50 = vmul.bf16 %v102_v48, %v102_v48  ;;  %v5247_v48 = vcombine.low %v181_v39, %v182_v40 }
  0x89   :  { %719 = vmatprep.mubr.bf16.mxu0 %v5212_v51  ;;  %v5229_v51 = vcombine.low %v163_v43, %v164_v44  ;;  %v119_v43 = vld [vmem:[#allocation2 + $0x180] sm:$0xff]  ;;  %v120_v44 = vld [vmem:[#allocation2 + $0x188] sm:$0xff] }
  0x8a   :  { %v5232_v52 = vcombine.high %v165_v49, %v166_v50  ;;  %v5231_v59 = vcombine.low %v165_v49, %v166_v50  ;;  %v121_v50 = vld [vmem:[#allocation2 + $0x190] sm:$0xff] }
  0x90   :  { %720 = vmatmul.mubr.bf16.gmra.mrb[20].mxu0 %v5211_v56  ;;  %v167_v56 = vmul.bf16 %v103_v53, %v103_v53 }
  0x91   :  { %727 = vmatprep.mubr.bf16.mxu0 %v5214_v57  ;;  %v168_v57 = vmul.bf16 %v104_v54, %v104_v54 }
  0x93   :  { %v5234_v60 = vcombine.high %v167_v56, %v168_v57  ;;  %v5233_v2 = vcombine.low %v167_v56, %v168_v57  ;;  %v123_v56 = vld [vmem:[#allocation2 + $0x1a0] sm:$0xff]  ;;  %v124_v57 = vld [vmem:[#allocation2 + $0x1a8] sm:$0xff] }
  0x94   :  { %v187_v58 = vmul.bf16 %v123_v56, %v123_v56 }
  0x98   :  { %728 = vmatmul.mubr.bf16.gmra.mrb[24].mxu0 %v5213_v62  ;;  %v106_v62 = vld [vmem:[#allocation2 + $0x118] sm:$0xff] }
  0x99   :  { %735 = vmatprep.mubr.bf16.mxu0 %v5216_v63  ;;  %v169_v63 = vmul.bf16 %v105_v61, %v105_v61  ;;  %v170_v1 = vmul.bf16 %v106_v62, %v106_v62 }
  0x9b   :  { %v5236_v3 = vcombine.high %v169_v63, %v170_v1  ;;  %v5235_v9 = vcombine.low %v169_v63, %v170_v1  ;;  %v125_v63 = vld [vmem:[#allocation2 + $0x1b0] sm:$0xff]  ;;  %v126_v1 = vld [vmem:[#allocation2 + $0x1b8] sm:$0xff] }
  0xa0   :  { %736 = vmatmul.mubr.bf16.gmra.mrb[28].mxu0 %v5215_v5  ;;  %v108_v5 = vld [vmem:[#allocation2 + $0x128] sm:$0xff] }
  0xa1   :  { %743 = vmatprep.mubr.bf16.mxu0 %v5218_v6  ;;  %v171_v6 = vmul.bf16 %v107_v4, %v107_v4  ;;  %v172_v7 = vmul.bf16 %v108_v5, %v108_v5 }
  0xa3   :  { %v5238_v10 = vcombine.high %v171_v6, %v172_v7  ;;  %v5237_v15 = vcombine.low %v171_v6, %v172_v7  ;;  %v127_v6 = vld [vmem:[#allocation2 + $0x1c0] sm:$0xff]  ;;  %v128_v7 = vld [vmem:[#allocation2 + $0x1c8] sm:$0xff] }
  0xa4   :  { %v191_v8 = vmul.bf16 %v127_v6, %v127_v6 }
  0xa8   :  { %744 = vmatmul.mubr.bf16.gmra.mrb[32].mxu0 %v5217_v11  ;;  %v109_v11 = vld [vmem:[#allocation2 + $0x130] sm:$0xff] }
  0xa9   :  { %751 = vmatprep.mubr.bf16.mxu0 %v5220_v12  ;;  %v110_v12 = vld [vmem:[#allocation2 + $0x138] sm:$0xff]  ;;  %v173_v13 = vmul.bf16 %v109_v11, %v109_v11 }
  0xaa   :  { %v174_v14 = vmul.bf16 %v110_v12, %v110_v12 }
  0xac   :  { %v5240_v16 = vcombine.high %v173_v13, %v174_v14  ;;  %v5239_v22 = vcombine.low %v173_v13, %v174_v14 }
  0xb0   :  { %752 = vmatmul.mubr.bf16.gmra.mrb[36].mxu0 %v5219_v17  ;;  %v111_v17 = vld [vmem:[#allocation2 + $0x140] sm:$0xff] }
  0xb1   :  { %759 = vmatprep.mubr.bf16.mxu0 %v5222_v18  ;;  %v112_v18 = vld [vmem:[#allocation2 + $0x148] sm:$0xff]  ;;  %v175_v19 = vmul.bf16 %v111_v17, %v111_v17  ;;  %v129_v17 = vld [vmem:[#allocation2 + $0x1d0] sm:$0xff] }
  0xb2   :  { %v176_v20 = vmul.bf16 %v112_v18, %v112_v18  ;;  %v130_v18 = vld [vmem:[#allocation2 + $0x1d8] sm:$0xff] }
  0xb4   :  { %v5241_v28 = vcombine.low %v175_v19, %v176_v20 }
  0xb8   :  { %760 = vmatmul.mubr.bf16.gmra.mrb[40].mxu0 %v5221_v23  ;;  %v5242_v23 = vcombine.high %v175_v19, %v176_v20  ;;  %v193_v19 = vmul.bf16 %v129_v17, %v129_v17  ;;  %v194_v20 = vmul.bf16 %v130_v18, %v130_v18  ;;  %v5894_v18 = vld [vmem:[#allocation5 + $0x94] ss:$12 sps:$4 sm:$0xff]  }
  0xb9   :  { %767 = vmatprep.mubr.bf16.mxu0 %v5224_v24  ;;  %v113_v24 = vld [vmem:[#allocation2 + $0x150] sm:$0xff] }
  0xba   :  { %v177_v26 = vmul.bf16 %v113_v24, %v113_v24  ;;  %v5260_v25 = vcombine.high %v193_v19, %v194_v20 }
  0xc0   :  { %768 = vmatmul.mubr.bf16.gmra.mrb[44].mxu0 %v5223_v29  ;;  %v5244_v29 = vcombine.high %v177_v26, %v178_v27 }
  0xc1   :  { %775 = vmatprep.mubr.bf16.mxu0 %v5226_v30  ;;  %v115_v30 = vld [vmem:[#allocation2 + $0x160] sm:$0xff] }
  0xc2   :  { %v179_v32 = vmul.bf16 %v115_v30, %v115_v30 }
  0xc4   :  { %v5245_v41 = vcombine.low %v179_v32, %v180_v33 }
  0xc8   :  { %776 = vmatmul.mubr.bf16.gmra.mrb[48].mxu0 %v5225_v35  ;;  %v5243_v35 = vcombine.low %v177_v26, %v178_v27 }
  0xc9   :  { %783 = vmatprep.mubr.bf16.mxu0 %v5228_v36  ;;  %v5246_v36 = vcombine.high %v179_v32, %v180_v33  ;;  %v5868_v33 = vld [vmem:[#allocation5] ss:$12 sps:$4 sm:$0xff]  }
  0xd0   :  { %784 = vmatmul.mubr.bf16.gmra.mrb[52].mxu0 %v5227_v45  ;;  %v183_v45 = vmul.bf16 %v119_v43, %v119_v43 }
  0xd1   :  { %791 = vmatprep.mubr.bf16.mxu0 %v5230_v46  ;;  %v184_v46 = vmul.bf16 %v120_v44, %v120_v44  ;;  %v5872_v44 = vld [vmem:[#allocation5 + $0x18] ss:$12 sps:$4 sm:$0xff]  }
  0xd3   :  { %v5250_v49 = vcombine.high %v183_v45, %v184_v46  ;;  %v5249_v54 = vcombine.low %v183_v45, %v184_v46 }
  0xd8   :  { %792 = vmatmul.mubr.bf16.gmra.mrb[56].mxu0 %v5229_v51  ;;  %v122_v51 = vld [vmem:[#allocation2 + $0x198] sm:$0xff] }
  0xd9   :  { %799 = vmatprep.mubr.bf16.mxu0 %v5232_v52  ;;  %v185_v52 = vmul.bf16 %v121_v50, %v121_v50  ;;  %v186_v53 = vmul.bf16 %v122_v51, %v122_v51 }
  0xdb   :  { %v5252_v55 = vcombine.high %v185_v52, %v186_v53  ;;  %v5251_v61 = vcombine.low %v185_v52, %v186_v53  ;;  %v197_v53 = vmul.bf16 %v133_v47, %v133_v47 }
  0xe0   :  { %800 = vmatmul.mubr.bf16.gmra.mrb[60].mxu0 %v5231_v59  ;;  %v188_v59 = vmul.bf16 %v124_v57, %v124_v57  ;;  %v5882_v57 = vld [vmem:[#allocation5 + $0x4c] ss:$12 sps:$4 sm:$0xff]  }
  0xe1   :  { %807 = vmatprep.mubr.bf16.mxu0 %v5234_v60  ;;  %v5891_v60 = vld [vmem:[#allocation5 + $0x80] ss:$12 sps:$4 sm:$0xff]  }
  0xe2   :  { %3075 = vmatpush1.bf16.msra.mxu0 %v5891_v60  ;;  %v5254_v62 = vcombine.high %v187_v58, %v188_v59  ;;  %v5253_v4 = vcombine.low %v187_v58, %v188_v59 }
  0xe3   :  { %3076 = vmatprep.subr.bf16.mxu0 %v7976_v0 }
  0xe8   :  { %808 = vmatmul.mubr.bf16.gmra.mrb[64].mxu0 %v5233_v2  ;;  %v189_v2 = vmul.bf16 %v125_v63, %v125_v63  ;;  %v5880_v63 = vld [vmem:[#allocation5 + $0x48] ss:$12 sps:$4 sm:$0xff]  }
  0xe9   :  { %815 = vmatprep.mubr.bf16.mxu0 %v5236_v3  ;;  %v190_v3 = vmul.bf16 %v126_v1, %v126_v1 }
  0xeb   :  { %v5256_v5 = vcombine.high %v189_v2, %v190_v3  ;;  %v5255_v13 = vcombine.low %v189_v2, %v190_v3  ;;  %v5886_v3 = vld [vmem:[#allocation5 + $0x64] ss:$12 sps:$4 sm:$0xff]  }
  0xf0   :  { %816 = vmatmul.mubr.bf16.gmra.mrb[68].mxu0 %v5235_v9  ;;  %v192_v9 = vmul.bf16 %v128_v7, %v128_v7  ;;  %v5884_v7 = vld [vmem:[#allocation5 + $0x60] ss:$12 sps:$4 sm:$0xff]  }
  0xf1   :  { %823 = vmatprep.mubr.bf16.mxu0 %v5238_v10  ;;  %v5895_v10 = vld [vmem:[#allocation5 + $0x98] ss:$12 sps:$4 sm:$0xff]  }
  0xf2   :  { %3077 = vmatpush1.bf16.msra.mxu0 %v5895_v10  ;;  %v5890_v10 = vld [vmem:[#allocation5 + $0x7c] ss:$12 sps:$4 sm:$0xff]  }
  0xf3   :  { %3078 = vmatprep.subr.bf16.mxu0 %v7976_v0 }
  0xf8   :  { %824 = vmatmul.mubr.bf16.gmra.mrb[72].mxu0 %v5237_v15  ;;  %v5258_v15 = vcombine.high %v191_v8, %v192_v9 }
  0xf9   :  { %831 = vmatprep.mubr.bf16.mxu0 %v5240_v16 }
 0x100   :  { %832 = vmatmul.mubr.bf16.gmra.mrb[76].mxu0 %v5239_v22 }
 0x101   :  { %839 = vmatprep.mubr.bf16.mxu0 %v5242_v23  ;;  %v5257_v23 = vcombine.low %v191_v8, %v192_v9  ;;  %v5903_v8 = vld [vmem:[#allocation5 + $0xc8] ss:$12 sps:$4 sm:$0xff]  }
 0x108   :  { %840 = vmatmul.mubr.bf16.gmra.mrb[80].mxu0 %v5241_v28  ;;  %v131_v28 = vld [vmem:[#allocation2 + $0x1e0] sm:$0xff] }
 0x109   :  { %847 = vmatprep.mubr.bf16.mxu0 %v5244_v29  ;;  %v132_v29 = vld [vmem:[#allocation2 + $0x1e8] sm:$0xff]  ;;  %v195_v34 = vmul.bf16 %v131_v28, %v131_v28 }
 0x10a   :  { %v5896_v28 = vld [vmem:[#allocation5 + $0xa8] ss:$12 sps:$4 sm:$0xff]  }
 0x110   :  { %848 = vmatmul.mubr.bf16.gmra.mrb[84].mxu0 %v5243_v35  ;;  %v196_v35 = vmul.bf16 %v132_v29, %v132_v29 }
 0x111   :  { %855 = vmatprep.mubr.bf16.mxu0 %v5246_v36  ;;  %v5899_v36 = vld [vmem:[#allocation5 + $0xb0] ss:$12 sps:$4 sm:$0xff]  }
 0x112   :  { %3079 = vmatpush1.bf16.msra.mxu0 %v5899_v36  ;;  %v5262_v43 = vcombine.high %v195_v34, %v196_v35  ;;  %v5261_v60 = vcombine.low %v195_v34, %v196_v35  ;;  %v5900_v35 = vld [vmem:[#allocation5 + $0xc0] ss:$12 sps:$4 sm:$0xff]  }
 0x113   :  { %3080 = vmatprep.subr.bf16.mxu0 %v7976_v0  ;;  %v5907_v36 = vld [vmem:[#allocation5 + $0xe0] ss:$12 sps:$4 sm:$0xff]  }
 0x116   :  { %3081 = vmatpush1.bf16.msra.mxu0 %v5903_v8 }
 0x117   :  { %3082 = vmatprep.subr.bf16.mxu0 %v7976_v0 }
 0x118   :  { %856 = vmatmul.mubr.bf16.gmra.mrb[88].mxu0 %v5245_v41  ;;  %v5259_v41 = vcombine.low %v193_v19, %v194_v20 }
 0x119   :  { %863 = vmatprep.mubr.bf16.mxu0 %v5248_v42 }
 0x11a   :  { %3083 = vmatpush1.bf16.msra.mxu0 %v5907_v36 }
 0x11b   :  { %3084 = vmatprep.subr.bf16.mxu0 %v7976_v0 }
 0x120   :  { %864 = vmatmul.mubr.bf16.gmra.mrb[92].mxu0 %v5247_v48  ;;  %v134_v48 = vld [vmem:[#allocation2 + $0x1f8] sm:$0xff] }
 0x121   :  { %871 = vmatprep.mubr.bf16.mxu0 %v5250_v49  ;;  %v5878_v49 = vld [vmem:[#allocation5 + $0x34] ss:$12 sps:$4 sm:$0xff]  }
 0x128   :  { %872 = vmatmul.mubr.bf16.gmra.mrb[96].mxu0 %v5249_v54  ;;  %v198_v54 = vmul.bf16 %v134_v48, %v134_v48 }
 0x129   :  { %879 = vmatprep.mubr.bf16.mxu0 %v5252_v55  ;;  %v5876_v55 = vld [vmem:[#allocation5 + $0x30] ss:$12 sps:$4 sm:$0xff]  }
 0x130   :  { %880 = vmatmul.mubr.bf16.gmra.mrb[100].mxu0 %v5251_v61 }
 0x131   :  { %887 = vmatprep.mubr.bf16.mxu0 %v5254_v62  ;;  %v5264_v62 = vcombine.high %v197_v53, %v198_v54 }
 0x138   :  { %888 = vmatmul.mubr.bf16.gmra.mrb[104].mxu0 %v5253_v4 }
 0x139   :  { %895 = vmatprep.mubr.bf16.mxu0 %v5256_v5 }
 0x13b   :  { %v681_v11 = vpop.f32.mrb[0].mxu0 }
 0x13c   :  { %5956 = vrsqrt.f32 %v681_v11  ;;  %v683_v12 = vpop.f32.mrb[1].mxu0  ;;  %vm936_vm1 = vcmp.gt.f32.partialorder %v681_v11, 1.0 }
 0x13d   :  { %v684_v14 = vpop.f32.mrb[2].mxu0 }
 0x13e   :  { %5958 = vrsqrt.f32 %v684_v14  ;;  %v686_v16 = vpop.f32.mrb[3].mxu0  ;;  %vm937_vm2 = vcmp.gt.f32.partialorder %v684_v14, 1.0 }
 0x140   :  { %896 = vmatmul.mubr.bf16.gmra.mrb[108].mxu0 %v5255_v13  ;;  %v5263_v13 = vcombine.low %v197_v53, %v198_v54  ;;  %v5908_v54 = vld [vmem:[#allocation5 + $0xf0] ss:$12 sps:$4 sm:$0xff]  }
 0x141   :  { %903 = vmatprep.mubr.bf16.mxu0 %v5258_v15  ;;  %v5888_v15 = vld [vmem:[#allocation5 + $0x78] ss:$12 sps:$4 sm:$0xff]  }
 0x143   :  { %v689_v21 = vpop.f32.mrb[4].mxu0 }
 0x144   :  { %5960 = vrsqrt.f32 %v689_v21  ;;  %v691_v22 = vpop.f32.mrb[5].mxu0  ;;  %vm938_vm4 = vcmp.gt.f32.partialorder %v689_v21, 1.0 }
 0x145   :  { %v692_v24 = vpop.f32.mrb[6].mxu0  ;;  %v5892_v22 = vld [vmem:[#allocation5 + $0x90] ss:$12 sps:$4 sm:$0xff]  }
 0x146   :  { %v5957_v26 = vpop.eup %5956  ;;  %5962 = vrsqrt.f32 %v692_v24  ;;  %v694_v27 = vpop.f32.mrb[7].mxu0  ;;  %vm939_vm5 = vcmp.gt.f32.partialorder %v692_v24, 1.0  ;;  %v5898_v24 = vld [vmem:[#allocation5 + $0xac] ss:$12 sps:$4 sm:$0xff]  }
 0x147   :  { %v1064_v31 = vsel %vm936_vm1, %v5957_v26, 1.0 }
 0x148   :  { %v5959_v30 = vpop.eup %5958  ;;  %904 = vmatmul.mubr.bf16.gmra.mrb[112].mxu0 %v5257_v23 }
 0x149   :  { %v1065_v32 = vsel %vm937_vm2, %v5959_v30, 1.0  ;;  %911 = vmatprep.mubr.bf16.mxu0 %v5260_v25 }
 0x14a   :  { %v1128_v37 = vpack.c.bf16 %v1065_v32, %v1064_v31  ;;  %v5902_v31 = vld [vmem:[#allocation5 + $0xc4] ss:$12 sps:$4 sm:$0xff]  }
 0x14b   :  { %v697_v39 = vpop.f32.mrb[8].mxu0 }
 0x14c   :  { %5964 = vrsqrt.f32 %v697_v39  ;;  %v699_v40 = vpop.f32.mrb[9].mxu0  ;;  %5284 = vmatmul.mubr.msk.bf16.vlgmr.msra.gmra.mrb[0].mxu1 %vm1166_vm3, %v1128_v37  ;;  %vm940_vm6 = vcmp.gt.f32.partialorder %v697_v39, 1.0 }
 0x14d   :  { %2712 = vmatpush1.bf16.msra.mxu1 %v5868_v33  ;;  %v700_v42 = vpop.f32.mrb[10].mxu0  ;;  %1312 = vmatprep.mubr.bf16.mxu1 %v7976_v0 }
 0x14e   :  { %v5961_v45 = vpop.eup %5960  ;;  %5966 = vrsqrt.f32 %v700_v42  ;;  %v702_v46 = vpop.f32.mrb[11].mxu0  ;;  %2713 = vmatprep.subr.bf16.mxu1 %v5874_v38  ;;  %vm941_vm7 = vcmp.gt.f32.partialorder %v700_v42, 1.0  ;;  %v5906_v38 = vld [vmem:[#allocation5 + $0xdc] ss:$12 sps:$4 sm:$0xff]   ;;  %v5904_v42 = vld [vmem:[#allocation5 + $0xd8] ss:$12 sps:$4 sm:$0xff]  }
 0x14f   :  { %v1066_v51 = vsel %vm938_vm4, %v5961_v45, 1.0 }
 0x150   :  { %v5963_v50 = vpop.eup %5962  ;;  %912 = vmatmul.mubr.bf16.gmra.mrb[116].mxu0 %v5259_v41 }
 0x151   :  { %v1067_v52 = vsel %vm939_vm5, %v5963_v50, 1.0  ;;  %919 = vmatprep.mubr.bf16.mxu0 %v5262_v43  ;;  %2714 = vmatpush1.bf16.msra.mxu1 %v5872_v44 }
 0x152   :  { %v1129_v56 = vpack.c.bf16 %v1067_v52, %v1066_v51  ;;  %2715 = vmatprep.subr.bf16.mxu1 %v5878_v49 }
 0x153   :  { %v705_v58 = vpop.f32.mrb[12].mxu0 }
 0x154   :  { %5968 = vrsqrt.f32 %v705_v58  ;;  %v707_v59 = vpop.f32.mrb[13].mxu0  ;;  %5285 = vmatmul.mubr.msk.bf16.gmra.mrb[4].mxu1 %vm1166_vm3, %v1129_v56  ;;  %vm942_vm8 = vcmp.gt.f32.partialorder %v705_v58, 1.0 }
 0x155   :  { %v708_v61 = vpop.f32.mrb[14].mxu0  ;;  %1322 = vmatprep.mubr.bf16.mxu1 %v7976_v0  ;;  %2716 = vmatpush1.bf16.msra.mxu1 %v5876_v55  ;;  %v5910_v55 = vld [vmem:[#allocation5 + $0xf4] ss:$12 sps:$4 sm:$0xff]  }
 0x156   :  { %v5965_v1 = vpop.eup %5964  ;;  %5970 = vrsqrt.f32 %v708_v61  ;;  %v710_v2 = vpop.f32.mrb[15].mxu0  ;;  %2717 = vmatprep.subr.bf16.mxu1 %v5882_v57  ;;  %vm943_vm9 = vcmp.gt.f32.partialorder %v708_v61, 1.0 }
 0x157   :  { %v1068_v5 = vsel %vm940_vm6, %v5965_v1, 1.0 }
 0x158   :  { %v5967_v4 = vpop.eup %5966  ;;  %920 = vmatmul.mubr.bf16.gmra.mrb[120].mxu0 %v5261_v60  ;;  %v5911_v60 = vld [vmem:[#allocation5 + $0xf8] ss:$12 sps:$4 sm:$0xff]  }
 0x159   :  { %v1069_v6 = vsel %vm941_vm7, %v5967_v4, 1.0  ;;  %927 = vmatprep.mubr.bf16.mxu0 %v5264_v62  ;;  %2718 = vmatpush1.bf16.msra.mxu1 %v5880_v63 }
 0x15a   :  { %v1130_v9 = vpack.c.bf16 %v1069_v6, %v1068_v5  ;;  %2719 = vmatprep.subr.bf16.mxu1 %v5886_v3  ;;  %3085 = vmatpush1.bf16.msra.mxu0 %v5911_v60 }
 0x15b   :  { %v713_v11 = vpop.f32.mrb[16].mxu0  ;;  %3086 = vmatprep.subr.bf16.mxu0 %v7976_v0 }
 0x15c   :  { %5972 = vrsqrt.f32 %v713_v11  ;;  %v715_v12 = vpop.f32.mrb[17].mxu0  ;;  %5286 = vmatmul.mubr.msk.bf16.gmra.mrb[8].mxu1 %vm1166_vm3, %v1130_v9  ;;  %vm944_vm10 = vcmp.gt.f32.partialorder %v713_v11, 1.0 }
 0x15d   :  { %v716_v14 = vpop.f32.mrb[18].mxu0  ;;  %1332 = vmatprep.mubr.bf16.mxu1 %v7976_v0  ;;  %2720 = vmatpush1.bf16.msra.mxu1 %v5884_v7  ;;  %v5912_v12 = vld [vmem:[#allocation5 + $0x108] ss:$12 sps:$4 sm:$0xff]  }
 0x15e   :  { %v5969_v16 = vpop.eup %5968  ;;  %5974 = vrsqrt.f32 %v716_v14  ;;  %v718_v17 = vpop.f32.mrb[19].mxu0  ;;  %2721 = vmatprep.subr.bf16.mxu1 %v5890_v10  ;;  %vm945_vm11 = vcmp.gt.f32.partialorder %v716_v14, 1.0 }
 0x15f   :  { %v1070_v20 = vsel %vm942_vm8, %v5969_v16, 1.0 }
 0x160   :  { %v5971_v19 = vpop.eup %5970  ;;  %928 = vmatmul.mubr.bf16.gmra.mrb[124].mxu0 %v5263_v13  ;;  %v5914_v13 = vld [vmem:[#allocation5 + $0x10c] ss:$12 sps:$4 sm:$0xff]  }
 0x161   :  { %v1071_v21 = vsel %vm943_vm9, %v5971_v19, 1.0  ;;  %2722 = vmatpush1.bf16.msra.mxu1 %v5888_v15 }
 0x162   :  { %v1131_v23 = vpack.c.bf16 %v1071_v21, %v1070_v20  ;;  %2723 = vmatprep.subr.bf16.mxu1 %v5894_v18  ;;  %v5915_v18 = vld [vmem:[#allocation5 + $0x110] ss:$12 sps:$4 sm:$0xff]  }
 0x163   :  { %v721_v25 = vpop.f32.mrb[20].mxu0  ;;  %3087 = vmatpush1.bf16.msra.mxu0 %v5915_v18 }
 0x164   :  { %5976 = vrsqrt.f32 %v721_v25  ;;  %v723_v26 = vpop.f32.mrb[21].mxu0  ;;  %5287 = vmatmul.mubr.msk.bf16.gmra.mrb[12].mxu1 %vm1166_vm3, %v1131_v23  ;;  %vm946_vm12 = vcmp.gt.f32.partialorder %v721_v25, 1.0  ;;  %3088 = vmatprep.subr.bf16.mxu0 %v7976_v0 }
 0x165   :  { %v724_v27 = vpop.f32.mrb[22].mxu0  ;;  %1342 = vmatprep.mubr.bf16.mxu1 %v7976_v0  ;;  %2724 = vmatpush1.bf16.msra.mxu1 %v5892_v22 }
 0x166   :  { %v5973_v29 = vpop.eup %5972  ;;  %5978 = vrsqrt.f32 %v724_v27  ;;  %v726_v30 = vpop.f32.mrb[23].mxu0  ;;  %2725 = vmatprep.subr.bf16.mxu1 %v5898_v24  ;;  %vm947_vm13 = vcmp.gt.f32.partialorder %v724_v27, 1.0 }
 0x167   :  { %v1072_v33 = vsel %vm944_vm10, %v5973_v29, 1.0 }
 0x168   :  { %v5975_v32 = vpop.eup %5974 }
 0x169   :  { %v1073_v34 = vsel %vm945_vm11, %v5975_v32, 1.0  ;;  %2726 = vmatpush1.bf16.msra.mxu1 %v5896_v28 }
 0x16a   :  { %v1132_v37 = vpack.c.bf16 %v1073_v34, %v1072_v33  ;;  %2727 = vmatprep.subr.bf16.mxu1 %v5902_v31  ;;  %v5916_v33 = vld [vmem:[#allocation5 + $0x120] ss:$12 sps:$4 sm:$0xff]   ;;  %v5918_v34 = vld [vmem:[#allocation5 + $0x124] ss:$12 sps:$4 sm:$0xff]  }
 0x16b   :  { %v729_v39 = vpop.f32.mrb[24].mxu0 }
 0x16c   :  { %5980 = vrsqrt.f32 %v729_v39  ;;  %v731_v40 = vpop.f32.mrb[25].mxu0  ;;  %5288 = vmatmul.mubr.msk.bf16.gmra.mrb[16].mxu1 %vm1166_vm3, %v1132_v37  ;;  %vm948_vm14 = vcmp.gt.f32.partialorder %v729_v39, 1.0 }
 0x16d   :  { %v732_v41 = vpop.f32.mrb[26].mxu0  ;;  %1352 = vmatprep.mubr.bf16.mxu1 %v7976_v0  ;;  %2728 = vmatpush1.bf16.msra.mxu1 %v5900_v35 }
 0x16e   :  { %v5977_v43 = vpop.eup %5976  ;;  %5982 = vrsqrt.f32 %v732_v41  ;;  %v734_v44 = vpop.f32.mrb[27].mxu0  ;;  %2729 = vmatprep.subr.bf16.mxu1 %v5906_v38  ;;  %vm949_vm15 = vcmp.gt.f32.partialorder %v732_v41, 1.0  ;;  %v5919_v38 = vld [vmem:[#allocation5 + $0x128] ss:$12 sps:$4 sm:$0xff]  }
 0x16f   :  { %v1074_v46 = vsel %vm946_vm12, %v5977_v43, 1.0  ;;  %3089 = vmatpush1.bf16.msra.mxu0 %v5919_v38  ;;  %v5922_v43 = vld [vmem:[#allocation5 + $0x13c] ss:$12 sps:$4 sm:$0xff]   ;;  %v5923_v44 = vld [vmem:[#allocation5 + $0x140] ss:$12 sps:$4 sm:$0xff]  }
 0x170   :  { %v5979_v45 = vpop.eup %5978  ;;  %3090 = vmatprep.subr.bf16.mxu0 %v7976_v0 }
 0x171   :  { %v1075_v47 = vsel %vm947_vm13, %v5979_v45, 1.0  ;;  %2730 = vmatpush1.bf16.msra.mxu1 %v5904_v42 }
 0x172   :  { %v1133_v48 = vpack.c.bf16 %v1075_v47, %v1074_v46  ;;  %2731 = vmatprep.subr.bf16.mxu1 %v5910_v55  ;;  %v5920_v47 = vld [vmem:[#allocation5 + $0x138] ss:$12 sps:$4 sm:$0xff]  }
 0x173   :  { %v737_v49 = vpop.f32.mrb[28].mxu0  ;;  %3091 = vmatpush1.bf16.msra.mxu0 %v5923_v44 }
 0x174   :  { %5984 = vrsqrt.f32 %v737_v49  ;;  %v739_v50 = vpop.f32.mrb[29].mxu0  ;;  %5289 = vmatmul.mubr.msk.bf16.gmra.mrb[20].mxu1 %vm1166_vm3, %v1133_v48  ;;  %vm950_vm0 = vcmp.gt.f32.partialorder %v737_v49, 1.0  ;;  %3092 = vmatprep.subr.bf16.mxu0 %v7976_v0 }
 0x175   :  { %v740_v51 = vpop.f32.mrb[30].mxu0  ;;  %1362 = vmatprep.mubr.bf16.mxu1 %v7976_v0  ;;  %2732 = vmatpush1.bf16.msra.mxu1 %v5908_v54  ;;  %v5924_v54 = vld [vmem:[#allocation5 + $0x150] ss:$12 sps:$4 sm:$0xff]  }
 0x176   :  { %v5981_v52 = vpop.eup %5980  ;;  %5986 = vrsqrt.f32 %v740_v51  ;;  %v742_v53 = vpop.f32.mrb[31].mxu0  ;;  %vm951_vm1 = vcmp.gt.f32.partialorder %v740_v51, 1.0  ;;  %2733 = vmatprep.subr.bf16.mxu1 %v5914_v13  ;;  %v5926_v51 = vld [vmem:[#allocation5 + $0x154] ss:$12 sps:$4 sm:$0xff]  }
 0x177   :  { %v1076_v57 = vsel %vm948_vm14, %v5981_v52, 1.0  ;;  %v5927_v52 = vld [vmem:[#allocation5 + $0x158] ss:$12 sps:$4 sm:$0xff]  }
 0x178   :  { %v5983_v56 = vpop.eup %5982  ;;  %3093 = vmatpush1.bf16.msra.mxu0 %v5927_v52 }
 0x179   :  { %v1077_v58 = vsel %vm949_vm15, %v5983_v56, 1.0  ;;  %2734 = vmatpush1.bf16.msra.mxu1 %v5912_v12  ;;  %3094 = vmatprep.subr.bf16.mxu0 %v7976_v0 }
 0x17a   :  { %v1134_v59 = vpack.c.bf16 %v1077_v58, %v1076_v57  ;;  %2735 = vmatprep.subr.bf16.mxu1 %v5918_v34  ;;  %v5930_v58 = vld [vmem:[#allocation5 + $0x16c] ss:$12 sps:$4 sm:$0xff]  }
 0x17b   :  { %v745_v61 = vpop.f32.mrb[32].mxu0 }
 0x17c   :  { %5988 = vrsqrt.f32 %v745_v61  ;;  %v747_v62 = vpop.f32.mrb[33].mxu0  ;;  %5290 = vmatmul.mubr.msk.bf16.gmra.mrb[24].mxu1 %vm1166_vm3, %v1134_v59  ;;  %vm952_vm2 = vcmp.gt.f32.partialorder %v745_v61, 1.0  ;;  %v5931_v59 = vld [vmem:[#allocation5 + $0x170] ss:$12 sps:$4 sm:$0xff]  }
 0x17d   :  { %v748_v63 = vpop.f32.mrb[34].mxu0  ;;  %1372 = vmatprep.mubr.bf16.mxu1 %v7976_v0  ;;  %2736 = vmatpush1.bf16.msra.mxu1 %v5916_v33  ;;  %v5928_v62 = vld [vmem:[#allocation5 + $0x168] ss:$12 sps:$4 sm:$0xff]  }
 0x17e   :  { %v5985_v1 = vpop.eup %5984  ;;  %5990 = vrsqrt.f32 %v748_v63  ;;  %v750_v2 = vpop.f32.mrb[35].mxu0  ;;  %vm953_vm4 = vcmp.gt.f32.partialorder %v748_v63, 1.0  ;;  %2737 = vmatprep.subr.bf16.mxu1 %v5922_v43  ;;  %3095 = vmatpush1.bf16.msra.mxu0 %v5931_v59 }
 0x17f   :  { %v1078_v4 = vsel %vm950_vm0, %v5985_v1, 1.0 }
 0x180   :  { %v5987_v3 = vpop.eup %5986 }
 0x181   :  { %v1079_v5 = vsel %vm951_vm1, %v5987_v3, 1.0  ;;  %2738 = vmatpush1.bf16.msra.mxu1 %v5920_v47 }
 0x182   :  { %v1135_v6 = vpack.c.bf16 %v1079_v5, %v1078_v4  ;;  %2739 = vmatprep.subr.bf16.mxu1 %v5926_v51 }
 0x183   :  { %v753_v7 = vpop.f32.mrb[36].mxu0 }
 0x184   :  { %5992 = vrsqrt.f32 %v753_v7  ;;  %v755_v8 = vpop.f32.mrb[37].mxu0  ;;  %5291 = vmatmul.mubr.msk.bf16.gmra.mrb[28].mxu1 %vm1166_vm3, %v1135_v6  ;;  %vm954_vm5 = vcmp.gt.f32.partialorder %v753_v7, 1.0 }
 0x185   :  { %v756_v9 = vpop.f32.mrb[38].mxu0  ;;  %1382 = vmatprep.mubr.bf16.mxu1 %v7976_v0  ;;  %2740 = vmatpush1.bf16.msra.mxu1 %v5924_v54 }
 0x186   :  { %v5989_v10 = vpop.eup %5988  ;;  %5994 = vrsqrt.f32 %v756_v9  ;;  %v758_v11 = vpop.f32.mrb[39].mxu0  ;;  %vm955_vm6 = vcmp.gt.f32.partialorder %v756_v9, 1.0  ;;  %2741 = vmatprep.subr.bf16.mxu1 %v5930_v58 }
 0x187   :  { %v1080_v15 = vsel %vm952_vm2, %v5989_v10, 1.0 }
 0x188   :  { %v5991_v14 = vpop.eup %5990 }
 0x189   :  { %v1081_v16 = vsel %vm953_vm4, %v5991_v14, 1.0  ;;  %2742 = vmatpush1.bf16.msra.mxu1 %v5928_v62 }
 0x18a   :  { %v1136_v17 = vpack.c.bf16 %v1081_v16, %v1080_v15 }
 0x18b   :  { %v761_v19 = vpop.f32.mrb[40].mxu0 }
 0x18c   :  { %5996 = vrsqrt.f32 %v761_v19  ;;  %v763_v20 = vpop.f32.mrb[41].mxu0  ;;  %5292 = vmatmul.mubr.msk.bf16.gmra.mrb[32].mxu1 %vm1166_vm3, %v1136_v17  ;;  %vm956_vm7 = vcmp.gt.f32.partialorder %v761_v19, 1.0 }
 0x18d   :  { %v764_v21 = vpop.f32.mrb[42].mxu0  ;;  %1392 = vmatprep.mubr.bf16.mxu1 %v7976_v0 }
 0x18e   :  { %v5993_v22 = vpop.eup %5992  ;;  %5998 = vrsqrt.f32 %v764_v21  ;;  %v766_v23 = vpop.f32.mrb[43].mxu0  ;;  %vm957_vm8 = vcmp.gt.f32.partialorder %v764_v21, 1.0 }
 0x18f   :  { %v1082_v25 = vsel %vm954_vm5, %v5993_v22, 1.0 }
 0x190   :  { %v5995_v24 = vpop.eup %5994 }
 0x191   :  { %v1083_v26 = vsel %vm955_vm6, %v5995_v24, 1.0 }
 0x192   :  { %v1137_v27 = vpack.c.bf16 %v1083_v26, %v1082_v25 }
 0x193   :  { %v769_v28 = vpop.f32.mrb[44].mxu0 }
 0x194   :  { %6000 = vrsqrt.f32 %v769_v28  ;;  %v771_v29 = vpop.f32.mrb[45].mxu0  ;;  %5293 = vmatmul.mubr.msk.bf16.gmra.mrb[36].mxu1 %vm1166_vm3, %v1137_v27  ;;  %vm958_vm9 = vcmp.gt.f32.partialorder %v769_v28, 1.0 }
 0x195   :  { %v772_v30 = vpop.f32.mrb[46].mxu0  ;;  %1402 = vmatprep.mubr.bf16.mxu1 %v7976_v0 }
 0x196   :  { %v5997_v31 = vpop.eup %5996  ;;  %6002 = vrsqrt.f32 %v772_v30  ;;  %v774_v32 = vpop.f32.mrb[47].mxu0  ;;  %vm959_vm10 = vcmp.gt.f32.partialorder %v772_v30, 1.0 }
 0x197   :  { %v1084_v36 = vsel %vm956_vm7, %v5997_v31, 1.0 }
 0x198   :  { %v5999_v35 = vpop.eup %5998 }
 0x199   :  { %v1085_v37 = vsel %vm957_vm8, %v5999_v35, 1.0 }
 0x19a   :  { %v1138_v39 = vpack.c.bf16 %v1085_v37, %v1084_v36 }
 0x19b   :  { %v777_v40 = vpop.f32.mrb[48].mxu0 }
 0x19c   :  { %6004 = vrsqrt.f32 %v777_v40  ;;  %v779_v41 = vpop.f32.mrb[49].mxu0  ;;  %5294 = vmatmul.mubr.msk.bf16.gmra.mrb[40].mxu1 %vm1166_vm3, %v1138_v39  ;;  %vm960_vm11 = vcmp.gt.f32.partialorder %v777_v40, 1.0 }
 0x19d   :  { %v780_v42 = vpop.f32.mrb[50].mxu0  ;;  %1412 = vmatprep.mubr.bf16.mxu1 %v7976_v0 }
 0x19e   :  { %v6001_v45 = vpop.eup %6000  ;;  %6006 = vrsqrt.f32 %v780_v42  ;;  %v782_v46 = vpop.f32.mrb[51].mxu0  ;;  %vm961_vm12 = vcmp.gt.f32.partialorder %v780_v42, 1.0 }
 0x19f   :  { %v1086_v49 = vsel %vm958_vm9, %v6001_v45, 1.0 }
 0x1a0   :  { %v6003_v48 = vpop.eup %6002 }
 0x1a1   :  { %v1087_v50 = vsel %vm959_vm10, %v6003_v48, 1.0 }
 0x1a2   :  { %v1139_v53 = vpack.c.bf16 %v1087_v50, %v1086_v49 }
 0x1a3   :  { %v785_v55 = vpop.f32.mrb[52].mxu0 }
 0x1a4   :  { %6008 = vrsqrt.f32 %v785_v55  ;;  %v787_v56 = vpop.f32.mrb[53].mxu0  ;;  %5295 = vmatmul.mubr.msk.bf16.gmra.mrb[44].mxu1 %vm1166_vm3, %v1139_v53  ;;  %vm962_vm13 = vcmp.gt.f32.partialorder %v785_v55, 1.0 }
 0x1a5   :  { %v788_v57 = vpop.f32.mrb[54].mxu0  ;;  %1422 = vmatprep.mubr.bf16.mxu1 %v7976_v0 }
 0x1a6   :  { %v6005_v60 = vpop.eup %6004  ;;  %6010 = vrsqrt.f32 %v788_v57  ;;  %v790_v61 = vpop.f32.mrb[55].mxu0  ;;  %vm963_vm14 = vcmp.gt.f32.partialorder %v788_v57, 1.0 }
 0x1a7   :  { %v1088_v1 = vsel %vm960_vm11, %v6005_v60, 1.0 }
 0x1a8   :  { %v6007_v63 = vpop.eup %6006 }
 0x1a9   :  { %v1089_v2 = vsel %vm961_vm12, %v6007_v63, 1.0 }
 0x1aa   :  { %v1140_v3 = vpack.c.bf16 %v1089_v2, %v1088_v1 }
 0x1ab   :  { %v793_v4 = vpop.f32.mrb[56].mxu0 }
 0x1ac   :  { %6012 = vrsqrt.f32 %v793_v4  ;;  %v795_v5 = vpop.f32.mrb[57].mxu0  ;;  %5296 = vmatmul.mubr.msk.bf16.gmra.mrb[48].mxu1 %vm1166_vm3, %v1140_v3  ;;  %vm964_vm15 = vcmp.gt.f32.partialorder %v793_v4, 1.0 }
 0x1ad   :  { %v796_v6 = vpop.f32.mrb[58].mxu0  ;;  %1432 = vmatprep.mubr.bf16.mxu1 %v7976_v0 }
 0x1ae   :  { %v6009_v7 = vpop.eup %6008  ;;  %6014 = vrsqrt.f32 %v796_v6  ;;  %v798_v8 = vpop.f32.mrb[59].mxu0  ;;  %vm965_vm0 = vcmp.gt.f32.partialorder %v796_v6, 1.0 }
 0x1af   :  { %v1090_v10 = vsel %vm962_vm13, %v6009_v7, 1.0 }
 0x1b0   :  { %v6011_v9 = vpop.eup %6010 }
 0x1b1   :  { %v1091_v11 = vsel %vm963_vm14, %v6011_v9, 1.0 }
 0x1b2   :  { %v1141_v12 = vpack.c.bf16 %v1091_v11, %v1090_v10 }
 0x1b3   :  { %v801_v13 = vpop.f32.mrb[60].mxu0 }
 0x1b4   :  { %6016 = vrsqrt.f32 %v801_v13  ;;  %v803_v14 = vpop.f32.mrb[61].mxu0  ;;  %5297 = vmatmul.mubr.msk.bf16.gmra.mrb[52].mxu1 %vm1166_vm3, %v1141_v12  ;;  %vm966_vm1 = vcmp.gt.f32.partialorder %v801_v13, 1.0 }
 0x1b5   :  { %v804_v15 = vpop.f32.mrb[62].mxu0  ;;  %1442 = vmatprep.mubr.bf16.mxu1 %v7976_v0 }
 0x1b6   :  { %v6013_v16 = vpop.eup %6012  ;;  %6018 = vrsqrt.f32 %v804_v15  ;;  %v806_v17 = vpop.f32.mrb[63].mxu0  ;;  %vm967_vm2 = vcmp.gt.f32.partialorder %v804_v15, 1.0 }
 0x1b7   :  { %v1092_v19 = vsel %vm964_vm15, %v6013_v16, 1.0 }
 0x1b8   :  { %v6015_v18 = vpop.eup %6014 }
 0x1b9   :  { %v1093_v20 = vsel %vm965_vm0, %v6015_v18, 1.0 }
 0x1ba   :  { %v1142_v21 = vpack.c.bf16 %v1093_v20, %v1092_v19 }
 0x1bb   :  { %v809_v22 = vpop.f32.mrb[64].mxu0 }
 0x1bc   :  { %6020 = vrsqrt.f32 %v809_v22  ;;  %v811_v23 = vpop.f32.mrb[65].mxu0  ;;  %5298 = vmatmul.mubr.msk.bf16.gmra.mrb[56].mxu1 %vm1166_vm3, %v1142_v21  ;;  %vm968_vm4 = vcmp.gt.f32.partialorder %v809_v22, 1.0 }
 0x1bd   :  { %v812_v24 = vpop.f32.mrb[66].mxu0  ;;  %1452 = vmatprep.mubr.bf16.mxu1 %v7976_v0 }
 0x1be   :  { %v6017_v25 = vpop.eup %6016  ;;  %6022 = vrsqrt.f32 %v812_v24  ;;  %v814_v26 = vpop.f32.mrb[67].mxu0  ;;  %vm969_vm5 = vcmp.gt.f32.partialorder %v812_v24, 1.0 }
 0x1bf   :  { %v1094_v28 = vsel %vm966_vm1, %v6017_v25, 1.0 }
 0x1c0   :  { %v6019_v27 = vpop.eup %6018 }
 0x1c1   :  { %v1095_v29 = vsel %vm967_vm2, %v6019_v27, 1.0 }
 0x1c2   :  { %v1143_v30 = vpack.c.bf16 %v1095_v29, %v1094_v28 }
 0x1c3   :  { %v817_v31 = vpop.f32.mrb[68].mxu0 }
 0x1c4   :  { %6024 = vrsqrt.f32 %v817_v31  ;;  %v819_v32 = vpop.f32.mrb[69].mxu0  ;;  %5299 = vmatmul.mubr.msk.bf16.gmra.mrb[60].mxu1 %vm1166_vm3, %v1143_v30  ;;  %vm970_vm6 = vcmp.gt.f32.partialorder %v817_v31, 1.0 }
 0x1c5   :  { %v820_v33 = vpop.f32.mrb[70].mxu0  ;;  %1462 = vmatprep.mubr.bf16.mxu1 %v7976_v0 }
 0x1c6   :  { %v6021_v34 = vpop.eup %6020  ;;  %6026 = vrsqrt.f32 %v820_v33  ;;  %v822_v35 = vpop.f32.mrb[71].mxu0  ;;  %vm971_vm7 = vcmp.gt.f32.partialorder %v820_v33, 1.0 }
 0x1c7   :  { %v1096_v37 = vsel %vm968_vm4, %v6021_v34, 1.0 }
 0x1c8   :  { %v6023_v36 = vpop.eup %6022 }
 0x1c9   :  { %v1097_v38 = vsel %vm969_vm5, %v6023_v36, 1.0 }
 0x1ca   :  { %v1144_v39 = vpack.c.bf16 %v1097_v38, %v1096_v37 }
 0x1cb   :  { %v825_v40 = vpop.f32.mrb[72].mxu0 }
 0x1cc   :  { %6028 = vrsqrt.f32 %v825_v40  ;;  %v827_v41 = vpop.f32.mrb[73].mxu0  ;;  %5300 = vmatmul.mubr.msk.bf16.gmra.mrb[64].mxu1 %vm1166_vm3, %v1144_v39  ;;  %vm972_vm8 = vcmp.gt.f32.partialorder %v825_v40, 1.0 }
 0x1cd   :  { %v828_v42 = vpop.f32.mrb[74].mxu0  ;;  %1472 = vmatprep.mubr.bf16.mxu1 %v7976_v0 }
 0x1ce   :  { %v6025_v43 = vpop.eup %6024  ;;  %6030 = vrsqrt.f32 %v828_v42  ;;  %v830_v44 = vpop.f32.mrb[75].mxu0  ;;  %vm973_vm9 = vcmp.gt.f32.partialorder %v828_v42, 1.0 }
 0x1cf   :  { %v1098_v46 = vsel %vm970_vm6, %v6025_v43, 1.0 }
 0x1d0   :  { %v6027_v45 = vpop.eup %6026 }
 0x1d1   :  { %v1099_v47 = vsel %vm971_vm7, %v6027_v45, 1.0 }
 0x1d2   :  { %v1145_v48 = vpack.c.bf16 %v1099_v47, %v1098_v46 }
 0x1d3   :  { %v833_v49 = vpop.f32.mrb[76].mxu0 }
 0x1d4   :  { %6032 = vrsqrt.f32 %v833_v49  ;;  %v835_v50 = vpop.f32.mrb[77].mxu0  ;;  %5301 = vmatmul.mubr.msk.bf16.gmra.mrb[68].mxu1 %vm1166_vm3, %v1145_v48  ;;  %vm974_vm10 = vcmp.gt.f32.partialorder %v833_v49, 1.0 }
 0x1d5   :  { %v836_v51 = vpop.f32.mrb[78].mxu0  ;;  %1482 = vmatprep.mubr.bf16.mxu1 %v7976_v0 }
 0x1d6   :  { %v6029_v52 = vpop.eup %6028  ;;  %6034 = vrsqrt.f32 %v836_v51  ;;  %v838_v53 = vpop.f32.mrb[79].mxu0  ;;  %vm975_vm11 = vcmp.gt.f32.partialorder %v836_v51, 1.0 }
 0x1d7   :  { %v1100_v55 = vsel %vm972_vm8, %v6029_v52, 1.0 }
 0x1d8   :  { %v6031_v54 = vpop.eup %6030 }
 0x1d9   :  { %v1101_v56 = vsel %vm973_vm9, %v6031_v54, 1.0 }
 0x1da   :  { %v1146_v57 = vpack.c.bf16 %v1101_v56, %v1100_v55 }
 0x1db   :  { %v841_v58 = vpop.f32.mrb[80].mxu0 }
 0x1dc   :  { %6036 = vrsqrt.f32 %v841_v58  ;;  %v843_v59 = vpop.f32.mrb[81].mxu0  ;;  %5302 = vmatmul.mubr.msk.bf16.gmra.mrb[72].mxu1 %vm1166_vm3, %v1146_v57  ;;  %vm976_vm12 = vcmp.gt.f32.partialorder %v841_v58, 1.0 }
 0x1dd   :  { %v844_v60 = vpop.f32.mrb[82].mxu0  ;;  %1492 = vmatprep.mubr.bf16.mxu1 %v7976_v0 }
 0x1de   :  { %v6033_v61 = vpop.eup %6032  ;;  %6038 = vrsqrt.f32 %v844_v60  ;;  %v846_v62 = vpop.f32.mrb[83].mxu0  ;;  %vm977_vm13 = vcmp.gt.f32.partialorder %v844_v60, 1.0 }
 0x1df   :  { %v1102_v1 = vsel %vm974_vm10, %v6033_v61, 1.0 }
 0x1e0   :  { %v6035_v63 = vpop.eup %6034 }
 0x1e1   :  { %v1103_v2 = vsel %vm975_vm11, %v6035_v63, 1.0 }
 0x1e2   :  { %v1147_v3 = vpack.c.bf16 %v1103_v2, %v1102_v1 }
 0x1e3   :  { %v849_v4 = vpop.f32.mrb[84].mxu0 }
 0x1e4   :  { %6040 = vrsqrt.f32 %v849_v4  ;;  %v851_v5 = vpop.f32.mrb[85].mxu0  ;;  %5303 = vmatmul.mubr.msk.bf16.gmra.mrb[76].mxu1 %vm1166_vm3, %v1147_v3  ;;  %vm978_vm14 = vcmp.gt.f32.partialorder %v849_v4, 1.0 }
 0x1e5   :  { %v852_v6 = vpop.f32.mrb[86].mxu0  ;;  %1502 = vmatprep.mubr.bf16.mxu1 %v7976_v0 }
 0x1e6   :  { %v6037_v7 = vpop.eup %6036  ;;  %6042 = vrsqrt.f32 %v852_v6  ;;  %v854_v8 = vpop.f32.mrb[87].mxu0  ;;  %vm979_vm15 = vcmp.gt.f32.partialorder %v852_v6, 1.0 }
 0x1e7   :  { %v1104_v10 = vsel %vm976_vm12, %v6037_v7, 1.0 }
 0x1e8   :  { %v6039_v9 = vpop.eup %6038 }
 0x1e9   :  { %v1105_v11 = vsel %vm977_vm13, %v6039_v9, 1.0 }
 0x1ea   :  { %v1148_v12 = vpack.c.bf16 %v1105_v11, %v1104_v10 }
 0x1eb   :  { %v857_v13 = vpop.f32.mrb[88].mxu0 }
 0x1ec   :  { %6044 = vrsqrt.f32 %v857_v13  ;;  %v859_v14 = vpop.f32.mrb[89].mxu0  ;;  %5304 = vmatmul.mubr.msk.bf16.gmra.mrb[80].mxu1 %vm1166_vm3, %v1148_v12  ;;  %vm980_vm0 = vcmp.gt.f32.partialorder %v857_v13, 1.0 }
 0x1ed   :  { %v860_v15 = vpop.f32.mrb[90].mxu0  ;;  %1512 = vmatprep.mubr.bf16.mxu1 %v7976_v0 }
 0x1ee   :  { %v6041_v16 = vpop.eup %6040  ;;  %6046 = vrsqrt.f32 %v860_v15  ;;  %v862_v17 = vpop.f32.mrb[91].mxu0  ;;  %vm981_vm1 = vcmp.gt.f32.partialorder %v860_v15, 1.0 }
 0x1ef   :  { %v1106_v19 = vsel %vm978_vm14, %v6041_v16, 1.0 }
 0x1f0   :  { %v6043_v18 = vpop.eup %6042 }
 0x1f1   :  { %v1107_v20 = vsel %vm979_vm15, %v6043_v18, 1.0 }
 0x1f2   :  { %v1149_v21 = vpack.c.bf16 %v1107_v20, %v1106_v19 }
 0x1f3   :  { %v865_v22 = vpop.f32.mrb[92].mxu0 }
 0x1f4   :  { %6048 = vrsqrt.f32 %v865_v22  ;;  %v867_v23 = vpop.f32.mrb[93].mxu0  ;;  %5305 = vmatmul.mubr.msk.bf16.gmra.mrb[84].mxu1 %vm1166_vm3, %v1149_v21  ;;  %vm982_vm2 = vcmp.gt.f32.partialorder %v865_v22, 1.0  ;;  %v6116_v21 = vld [vmem:[#allocation2] sm:$0xff] }
 0x1f5   :  { %v868_v24 = vpop.f32.mrb[94].mxu0  ;;  %1522 = vmatprep.mubr.bf16.mxu1 %v7976_v0  ;;  %v6117_v23 = vld [vmem:[#allocation2 + $0x8] sm:$0xff] }
 0x1f6   :  { %v6045_v25 = vpop.eup %6044  ;;  %6050 = vrsqrt.f32 %v868_v24  ;;  %v870_v26 = vpop.f32.mrb[95].mxu0  ;;  %vm983_vm4 = vcmp.gt.f32.partialorder %v868_v24, 1.0 }
 0x1f7   :  { %v1108_v28 = vsel %vm980_vm0, %v6045_v25, 1.0 }
 0x1f8   :  { %v6047_v27 = vpop.eup %6046 }
 0x1f9   :  { %v1109_v29 = vsel %vm981_vm1, %v6047_v27, 1.0 }
 0x1fa   :  { %v1150_v30 = vpack.c.bf16 %v1109_v29, %v1108_v28 }
 0x1fb   :  { %v873_v31 = vpop.f32.mrb[96].mxu0 }
 0x1fc   :  { %6052 = vrsqrt.f32 %v873_v31  ;;  %v875_v32 = vpop.f32.mrb[97].mxu0  ;;  %5306 = vmatmul.mubr.msk.bf16.gmra.mrb[88].mxu1 %vm1166_vm3, %v1150_v30  ;;  %vm984_vm5 = vcmp.gt.f32.partialorder %v873_v31, 1.0 }
 0x1fd   :  { %v876_v33 = vpop.f32.mrb[98].mxu0  ;;  %1532 = vmatprep.mubr.bf16.mxu1 %v7976_v0 }
 0x1fe   :  { %v6049_v34 = vpop.eup %6048  ;;  %6054 = vrsqrt.f32 %v876_v33  ;;  %v878_v35 = vpop.f32.mrb[99].mxu0  ;;  %vm985_vm6 = vcmp.gt.f32.partialorder %v876_v33, 1.0 }
 0x1ff   :  { %v1110_v37 = vsel %vm982_vm2, %v6049_v34, 1.0 }
 0x200   :  { %v6051_v36 = vpop.eup %6050 }
 0x201   :  { %v1111_v38 = vsel %vm983_vm4, %v6051_v36, 1.0 }
 0x202   :  { %v1151_v39 = vpack.c.bf16 %v1111_v38, %v1110_v37 }
 0x203   :  { %v881_v40 = vpop.f32.mrb[100].mxu0 }
 0x204   :  { %6056 = vrsqrt.f32 %v881_v40  ;;  %v883_v41 = vpop.f32.mrb[101].mxu0  ;;  %5307 = vmatmul.mubr.msk.bf16.gmra.mrb[92].mxu1 %vm1166_vm3, %v1151_v39  ;;  %vm986_vm7 = vcmp.gt.f32.partialorder %v881_v40, 1.0 }
 0x205   :  { %v884_v42 = vpop.f32.mrb[102].mxu0  ;;  %1542 = vmatprep.mubr.bf16.mxu1 %v7976_v0 }
 0x206   :  { %v6053_v43 = vpop.eup %6052  ;;  %6058 = vrsqrt.f32 %v884_v42  ;;  %v886_v44 = vpop.f32.mrb[103].mxu0  ;;  %vm987_vm8 = vcmp.gt.f32.partialorder %v884_v42, 1.0  ;;  %v6118_v42 = vld [vmem:[#allocation2 + $0x10] sm:$0xff] }
 0x207   :  { %v1112_v46 = vsel %vm984_vm5, %v6053_v43, 1.0  ;;  %v6119_v44 = vld [vmem:[#allocation2 + $0x18] sm:$0xff] }
 0x208   :  { %v6055_v45 = vpop.eup %6054 }
 0x209   :  { %v1113_v47 = vsel %vm985_vm6, %v6055_v45, 1.0 }
 0x20a   :  { %v1152_v48 = vpack.c.bf16 %v1113_v47, %v1112_v46 }
 0x20b   :  { %v889_v49 = vpop.f32.mrb[104].mxu0 }
 0x20c   :  { %6060 = vrsqrt.f32 %v889_v49  ;;  %v891_v50 = vpop.f32.mrb[105].mxu0  ;;  %5308 = vmatmul.mubr.msk.bf16.gmra.mrb[96].mxu1 %vm1166_vm3, %v1152_v48  ;;  %vm988_vm9 = vcmp.gt.f32.partialorder %v889_v49, 1.0 }
 0x20d   :  { %v892_v51 = vpop.f32.mrb[106].mxu0  ;;  %1552 = vmatprep.mubr.bf16.mxu1 %v7976_v0 }
 0x20e   :  { %v6057_v52 = vpop.eup %6056  ;;  %6062 = vrsqrt.f32 %v892_v51  ;;  %v894_v53 = vpop.f32.mrb[107].mxu0  ;;  %vm989_vm10 = vcmp.gt.f32.partialorder %v892_v51, 1.0 }
 0x20f   :  { %v1114_v55 = vsel %vm986_vm7, %v6057_v52, 1.0 }
 0x210   :  { %v6059_v54 = vpop.eup %6058 }
 0x211   :  { %v1115_v56 = vsel %vm987_vm8, %v6059_v54, 1.0 }
 0x212   :  { %v1153_v57 = vpack.c.bf16 %v1115_v56, %v1114_v55 }
 0x213   :  { %v897_v58 = vpop.f32.mrb[108].mxu0 }
 0x214   :  { %6064 = vrsqrt.f32 %v897_v58  ;;  %v899_v59 = vpop.f32.mrb[109].mxu0  ;;  %5309 = vmatmul.mubr.msk.bf16.gmra.mrb[100].mxu1 %vm1166_vm3, %v1153_v57  ;;  %vm990_vm11 = vcmp.gt.f32.partialorder %v897_v58, 1.0 }
 0x215   :  { %v900_v60 = vpop.f32.mrb[110].mxu0  ;;  %1562 = vmatprep.mubr.bf16.mxu1 %v7976_v0 }
 0x216   :  { %v6061_v61 = vpop.eup %6060  ;;  %6066 = vrsqrt.f32 %v900_v60  ;;  %v902_v62 = vpop.f32.mrb[111].mxu0  ;;  %vm991_vm12 = vcmp.gt.f32.partialorder %v900_v60, 1.0 }
 0x217   :  { %v1116_v1 = vsel %vm988_vm9, %v6061_v61, 1.0 }
 0x218   :  { %v6063_v63 = vpop.eup %6062 }
 0x219   :  { %v1117_v2 = vsel %vm989_vm10, %v6063_v63, 1.0  ;;  %v6120_v63 = vld [vmem:[#allocation2 + $0x20] sm:$0xff] }
 0x21a   :  { %v1154_v3 = vpack.c.bf16 %v1117_v2, %v1116_v1  ;;  %v6121_v2 = vld [vmem:[#allocation2 + $0x28] sm:$0xff] }
 0x21b   :  { %v905_v4 = vpop.f32.mrb[112].mxu0 }
 0x21c   :  { %6068 = vrsqrt.f32 %v905_v4  ;;  %v907_v5 = vpop.f32.mrb[113].mxu0  ;;  %5310 = vmatmul.mubr.msk.bf16.gmra.mrb[104].mxu1 %vm1166_vm3, %v1154_v3  ;;  %vm992_vm13 = vcmp.gt.f32.partialorder %v905_v4, 1.0 }
 0x21d   :  { %v908_v6 = vpop.f32.mrb[114].mxu0  ;;  %1572 = vmatprep.mubr.bf16.mxu1 %v7976_v0 }
 0x21e   :  { %v6065_v7 = vpop.eup %6064  ;;  %6070 = vrsqrt.f32 %v908_v6  ;;  %v910_v8 = vpop.f32.mrb[115].mxu0  ;;  %vm993_vm14 = vcmp.gt.f32.partialorder %v908_v6, 1.0 }
 0x21f   :  { %v1304_v9 = vpop.f32.mrb[0].mxu1  ;;  %v1118_v12 = vsel %vm990_vm11, %v6065_v7, 1.0 }
 0x220   :  { %v6067_v10 = vpop.eup %6066  ;;  %v1306_v11 = vpop.f32.mrb[1].mxu1 }
 0x221   :  { %v1119_v13 = vsel %vm991_vm12, %v6067_v10, 1.0  ;;  %v5529_v14 = vpack.c.bf16 %v1306_v11, %v1304_v9  ;;  %v1308_v15 = vpop.f32.mrb[2].mxu1 }
 0x222   :  { %v1155_v16 = vpack.c.bf16 %v1119_v13, %v1118_v12  ;;  %v1310_v17 = vpop.f32.mrb[3].mxu1 }
 0x223   :  { %v5530_v18 = vpack.c.bf16 %v1310_v17, %v1308_v15  ;;  %v913_v19 = vpop.f32.mrb[116].mxu0  ;;  %v2007_v22 = vmul.bf16 %v6116_v21, %v5529_v14  ;;  %v6123_v21 = vld [vmem:[#allocation2 + $0x38] sm:$0xff] }
 0x224   :  { %6072 = vrsqrt.f32 %v913_v19  ;;  %v915_v20 = vpop.f32.mrb[117].mxu0  ;;  %5311 = vmatmul.mubr.msk.bf16.gmra.mrb[108].mxu1 %vm1166_vm3, %v1155_v16  ;;  %vm994_vm15 = vcmp.gt.f32.partialorder %v913_v19, 1.0  ;;  %v6122_v19 = vld [vmem:[#allocation2 + $0x30] sm:$0xff] }
 0x225   :  { %v2008_v24 = vmul.bf16 %v6117_v23, %v5530_v18  ;;  %v916_v25 = vpop.f32.mrb[118].mxu0  ;;  %1582 = vmatprep.mubr.bf16.mxu1 %v7976_v0 }
 0x226   :  { %v6069_v26 = vpop.eup %6068  ;;  %6074 = vrsqrt.f32 %v916_v25  ;;  %v918_v27 = vpop.f32.mrb[119].mxu0  ;;  %vm995_vm0 = vcmp.gt.f32.partialorder %v916_v25, 1.0 }
 0x227   :  { %v6492_v28 = vcombine.low %v2007_v22, %v2008_v24  ;;  %v1314_v29 = vpop.f32.mrb[4].mxu1  ;;  %v6494_v30 = vcombine.high %v2007_v22, %v2008_v24  ;;  %v1120_v33 = vsel %vm992_vm13, %v6069_v26, 1.0 }
 0x228   :  { %v6071_v31 = vpop.eup %6070  ;;  %v1316_v32 = vpop.f32.mrb[5].mxu1 }
 0x229   :  { %v1121_v34 = vsel %vm993_vm14, %v6071_v31, 1.0  ;;  %v5531_v35 = vpack.c.bf16 %v1316_v32, %v1314_v29  ;;  %v1318_v36 = vpop.f32.mrb[6].mxu1  ;;  %3096 = vmatprep.mubr.bf16.mxu0 %v6494_v30  ;;  %3635 = vmatprep.subr.bf16.mxu1 %v6494_v30 }
 0x22a   :  { %v1156_v37 = vpack.c.bf16 %v1121_v34, %v1120_v33  ;;  %v1320_v38 = vpop.f32.mrb[7].mxu1  ;;  %3097 = vmatmul.mubr.bf16.vlgmr.msra.gmra.mrb[128].mxu0 %v6492_v28 }
 0x22b   :  { %v5532_v39 = vpack.c.bf16 %v1320_v38, %v1318_v36  ;;  %v921_v40 = vpop.f32.mrb[120].mxu0  ;;  %v2009_v43 = vmul.bf16 %v6118_v42, %v5531_v35  ;;  %v6124_v38 = vld [vmem:[#allocation2 + $0x40] sm:$0xff] }
 0x22c   :  { %6076 = vrsqrt.f32 %v921_v40  ;;  %v923_v41 = vpop.f32.mrb[121].mxu0  ;;  %5312 = vmatmul.mubr.msk.bf16.gmra.mrb[112].mxu1 %vm1166_vm3, %v1156_v37  ;;  %vm996_vm1 = vcmp.gt.f32.partialorder %v921_v40, 1.0  ;;  %v6125_v40 = vld [vmem:[#allocation2 + $0x48] sm:$0xff] }
 0x22d   :  { %v2010_v45 = vmul.bf16 %v6119_v44, %v5532_v39  ;;  %v924_v46 = vpop.f32.mrb[122].mxu0  ;;  %1592 = vmatprep.mubr.bf16.mxu1 %v7976_v0 }
 0x22e   :  { %v6073_v47 = vpop.eup %6072  ;;  %6078 = vrsqrt.f32 %v924_v46  ;;  %v926_v48 = vpop.f32.mrb[123].mxu0  ;;  %vm997_vm2 = vcmp.gt.f32.partialorder %v924_v46, 1.0 }
 0x22f   :  { %v1324_v49 = vpop.f32.mrb[8].mxu1  ;;  %v6501_v50 = vcombine.high %v2009_v43, %v2010_v45  ;;  %v6503_v51 = vcombine.low %v2009_v43, %v2010_v45  ;;  %v1122_v54 = vsel %vm994_vm15, %v6073_v47, 1.0 }
 0x230   :  { %v6075_v52 = vpop.eup %6074  ;;  %v1326_v53 = vpop.f32.mrb[9].mxu1 }
 0x231   :  { %v1123_v55 = vsel %vm995_vm0, %v6075_v52, 1.0  ;;  %v5533_v56 = vpack.c.bf16 %v1326_v53, %v1324_v49  ;;  %v1328_v57 = vpop.f32.mrb[10].mxu1  ;;  %3104 = vmatprep.mubr.bf16.mxu0 %v6501_v50  ;;  %v6126_v52 = vld [vmem:[#allocation2 + $0x50] sm:$0xff] }
 0x232   :  { %v1157_v58 = vpack.c.bf16 %v1123_v55, %v1122_v54  ;;  %v1330_v59 = vpop.f32.mrb[11].mxu1  ;;  %3105 = vmatmul.mubr.bf16.gmra.mrb[132].mxu0 %v6503_v51  ;;  %v6127_v54 = vld [vmem:[#allocation2 + $0x58] sm:$0xff] }
 0x233   :  { %v5534_v60 = vpack.c.bf16 %v1330_v59, %v1328_v57  ;;  %v929_v61 = vpop.f32.mrb[124].mxu0  ;;  %v2011_v1 = vmul.bf16 %v6120_v63, %v5533_v56 }
 0x234   :  { %6080 = vrsqrt.f32 %v929_v61  ;;  %v931_v62 = vpop.f32.mrb[125].mxu0  ;;  %5313 = vmatmul.mubr.msk.bf16.gmra.mrb[116].mxu1 %vm1166_vm3, %v1157_v58  ;;  %vm998_vm4 = vcmp.gt.f32.partialorder %v929_v61, 1.0 }
 0x235   :  { %v2012_v3 = vmul.bf16 %v6121_v2, %v5534_v60  ;;  %v932_v4 = vpop.f32.mrb[126].mxu0  ;;  %1602 = vmatprep.mubr.bf16.mxu1 %v7976_v0 }
 0x236   :  { %v6077_v5 = vpop.eup %6076  ;;  %6082 = vrsqrt.f32 %v932_v4  ;;  %v934_v6 = vpop.f32.mrb[127].mxu0  ;;  %vm999_vm5 = vcmp.gt.f32.partialorder %v932_v4, 1.0 }
 0x237   :  { %v1334_v7 = vpop.f32.mrb[12].mxu1  ;;  %v6509_v8 = vcombine.high %v2011_v1, %v2012_v3  ;;  %v6511_v9 = vcombine.low %v2011_v1, %v2012_v3  ;;  %v1124_v12 = vsel %vm996_vm1, %v6077_v5, 1.0  ;;  %v6128_v1 = vld [vmem:[#allocation2 + $0x60] sm:$0xff]  ;;  %v6129_v3 = vld [vmem:[#allocation2 + $0x68] sm:$0xff] }
 0x238   :  { %v6079_v10 = vpop.eup %6078  ;;  %v1336_v11 = vpop.f32.mrb[13].mxu1 }
 0x239   :  { %8041 = vst [vmem:[#allocation11_spill] sm:$0xff] %v6511_v9  ;;  %v1125_v13 = vsel %vm997_vm2, %v6079_v10, 1.0  ;;  %v5535_v14 = vpack.c.bf16 %v1336_v11, %v1334_v7  ;;  %v1338_v15 = vpop.f32.mrb[14].mxu1  ;;  %3112 = vmatprep.mubr.bf16.mxu0 %v6509_v8 }
 0x23a   :  { %v1158_v16 = vpack.c.bf16 %v1125_v13, %v1124_v12  ;;  %v1340_v17 = vpop.f32.mrb[15].mxu1  ;;  %3113 = vmatmul.mubr.bf16.gmra.mrb[136].mxu0 %v6511_v9 }
 0x23b   :  { %v5536_v18 = vpack.c.bf16 %v1340_v17, %v1338_v15  ;;  %v2013_v20 = vmul.bf16 %v6122_v19, %v5535_v14  ;;  %v6130_v15 = vld [vmem:[#allocation2 + $0x70] sm:$0xff]  ;;  %v6131_v17 = vld [vmem:[#allocation2 + $0x78] sm:$0xff] }
 0x23c   :  { %5314 = vmatmul.mubr.msk.bf16.gmra.mrb[120].mxu1 %vm1166_vm3, %v1158_v16 }
 0x23d   :  { %v2014_v22 = vmul.bf16 %v6123_v21, %v5536_v18  ;;  %1612 = vmatprep.mubr.bf16.mxu1 %v7976_v0 }
 0x23e   :  { %v6081_v23 = vpop.eup %6080 }
 0x23f   :  { %v1344_v24 = vpop.f32.mrb[16].mxu1  ;;  %v6517_v25 = vcombine.high %v2013_v20, %v2014_v22  ;;  %v6519_v26 = vcombine.low %v2013_v20, %v2014_v22  ;;  %v1126_v31 = vsel %vm998_vm4, %v6081_v23, 1.0 }
 0x240   :  { %v6083_v27 = vpop.eup %6082  ;;  %v1346_v29 = vpop.f32.mrb[17].mxu1 }
 0x241   :  { %8042 = vst [vmem:[#allocation12_spill] sm:$0xff] %v6517_v25  ;;  %8043 = vst [vmem:[#allocation13_spill] sm:$0xff] %v6519_v26  ;;  %v1127_v32 = vsel %vm999_vm5, %v6083_v27, 1.0  ;;  %v5537_v33 = vpack.c.bf16 %v1346_v29, %v1344_v24  ;;  %v1348_v34 = vpop.f32.mrb[18].mxu1  ;;  %3120 = vmatprep.mubr.bf16.mxu0 %v6517_v25 }
 0x242   :  { %v1159_v35 = vpack.c.bf16 %v1127_v32, %v1126_v31  ;;  %v1350_v36 = vpop.f32.mrb[19].mxu1  ;;  %3121 = vmatmul.mubr.bf16.gmra.mrb[140].mxu0 %v6519_v26  ;;  %v6132_v31 = vld [vmem:[#allocation2 + $0x80] sm:$0xff] }
 0x243   :  { %v5538_v37 = vpack.c.bf16 %v1350_v36, %v1348_v34  ;;  %v2015_v39 = vmul.bf16 %v6124_v38, %v5537_v33  ;;  %v6133_v33 = vld [vmem:[#allocation2 + $0x88] sm:$0xff] }
 0x244   :  { %5315 = vmatmul.mubr.msk.bf16.gmra.mrb[124].mxu1 %vm1166_vm3, %v1159_v35  ;;  %vm4917_vm3 = vcmask 523264  }
 0x245   :  { %v2016_v41 = vmul.bf16 %v6125_v40, %v5538_v37  ;;  %2743 = vmatprep.mubr.bf16.mxu1 %v6494_v30 }
 0x247   :  { %v1354_v42 = vpop.f32.mrb[20].mxu1  ;;  %v6525_v43 = vcombine.high %v2015_v39, %v2016_v41  ;;  %v6527_v44 = vcombine.low %v2015_v39, %v2016_v41 }
 0x248   :  { %v1356_v45 = vpop.f32.mrb[21].mxu1 }
 0x249   :  { %8044 = vst [vmem:[#allocation14_spill] sm:$0xff] %v6525_v43  ;;  %8045 = vst [vmem:[#allocation15_spill] sm:$0xff] %v6527_v44  ;;  %v5539_v46 = vpack.c.bf16 %v1356_v45, %v1354_v42  ;;  %v1358_v47 = vpop.f32.mrb[22].mxu1  ;;  %3128 = vmatprep.mubr.bf16.mxu0 %v6525_v43  ;;  %v6134_v45 = vld [vmem:[#allocation2 + $0x90] sm:$0xff] }
 0x24a   :  { %v1360_v48 = vpop.f32.mrb[23].mxu1  ;;  %3129 = vmatmul.mubr.bf16.gmra.mrb[144].mxu0 %v6527_v44 }
 0x24b   :  { %v5540_v49 = vpack.c.bf16 %v1360_v48, %v1358_v47  ;;  %v2017_v53 = vmul.bf16 %v6126_v52, %v5539_v46  ;;  %v6135_v47 = vld [vmem:[#allocation2 + $0x98] sm:$0xff] }
 0x24c   :  { %2744 = vmatmul.mubr.bf16.vlgmr.msra.gmra.mrb[128].mxu1 %v6492_v28 }
 0x24d   :  { %v2018_v55 = vmul.bf16 %v6127_v54, %v5540_v49  ;;  %3636 = vmatpush1.bf16.xpose.msra.mxu1 %v6492_v28  ;;  %2753 = vmatprep.mubr.bf16.mxu1 %v6501_v50 }
 0x24e   :  { %3637 = vmatprep.subr.bf16.mxu1 %v6501_v50 }
 0x24f   :  { %v1364_v56 = vpop.f32.mrb[24].mxu1  ;;  %v6535_v57 = vcombine.high %v2017_v53, %v2018_v55  ;;  %v6537_v58 = vcombine.low %v2017_v53, %v2018_v55 }
 0x250   :  { %v1366_v59 = vpop.f32.mrb[25].mxu1 }
 0x251   :  { %8046 = vst [vmem:[#allocation16_spill] sm:$0xff] %v6535_v57  ;;  %8047 = vst [vmem:[#allocation17_spill] sm:$0xff] %v6537_v58  ;;  %v5541_v60 = vpack.c.bf16 %v1366_v59, %v1364_v56  ;;  %v1368_v61 = vpop.f32.mrb[26].mxu1  ;;  %3136 = vmatprep.mubr.bf16.mxu0 %v6535_v57 }
 0x252   :  { %v1370_v62 = vpop.f32.mrb[27].mxu1  ;;  %3137 = vmatmul.mubr.bf16.gmra.mrb[148].mxu0 %v6537_v58 }
 0x253   :  { %v5542_v63 = vpack.c.bf16 %v1370_v62, %v1368_v61  ;;  %v2019_v2 = vmul.bf16 %v6128_v1, %v5541_v60  ;;  %v6136_v61 = vld [vmem:[#allocation2 + $0xa0] sm:$0xff] }
 0x254   :  { %2754 = vmatmul.mubr.bf16.gmra.mrb[132].mxu1 %v6503_v51 }
 0x255   :  { %v2020_v4 = vmul.bf16 %v6129_v3, %v5542_v63  ;;  %3638 = vmatpush1.bf16.xpose.msra.mxu1 %v6503_v51  ;;  %2763 = vmatprep.mubr.bf16.mxu1 %v6509_v8  ;;  %v6137_v63 = vld [vmem:[#allocation2 + $0xa8] sm:$0xff] }
 0x256   :  { %3639 = vmatprep.subr.bf16.mxu1 %v6509_v8 }
 0x257   :  { %v1374_v5 = vpop.f32.mrb[28].mxu1  ;;  %v6545_v6 = vcombine.high %v2019_v2, %v2020_v4  ;;  %v6547_v7 = vcombine.low %v2019_v2, %v2020_v4 }
 0x258   :  { %v1376_v10 = vpop.f32.mrb[29].mxu1 }
 0x259   :  { %8048 = vst [vmem:[#allocation18_spill] sm:$0xff] %v6545_v6  ;;  %8049 = vst [vmem:[#allocation19_spill] sm:$0xff] %v6547_v7  ;;  %v5543_v11 = vpack.c.bf16 %v1376_v10, %v1374_v5  ;;  %v1378_v12 = vpop.f32.mrb[30].mxu1  ;;  %3144 = vmatprep.mubr.bf16.mxu0 %v6545_v6 }
 0x25a   :  { %v1380_v13 = vpop.f32.mrb[31].mxu1  ;;  %3145 = vmatmul.mubr.bf16.gmra.mrb[152].mxu0 %v6547_v7 }
 0x25b   :  { %v5544_v14 = vpack.c.bf16 %v1380_v13, %v1378_v12  ;;  %v2021_v16 = vmul.bf16 %v6130_v15, %v5543_v11 }
 0x25c   :  { %2764 = vmatmul.mubr.bf16.gmra.mrb[136].mxu1 %v6511_v9 }
 0x25d   :  { %v2022_v18 = vmul.bf16 %v6131_v17, %v5544_v14  ;;  %3640 = vmatpush1.bf16.xpose.msra.mxu1 %v6511_v9  ;;  %2773 = vmatprep.mubr.bf16.mxu1 %v6517_v25  ;;  %v6138_v14 = vld [vmem:[#allocation2 + $0xb0] sm:$0xff] }
 0x25e   :  { %3641 = vmatprep.subr.bf16.mxu1 %v6517_v25 }
 0x25f   :  { %v1384_v19 = vpop.f32.mrb[32].mxu1  ;;  %v6555_v20 = vcombine.high %v2021_v16, %v2022_v18  ;;  %v6557_v21 = vcombine.low %v2021_v16, %v2022_v18  ;;  %v6139_v16 = vld [vmem:[#allocation2 + $0xb8] sm:$0xff] }
 0x260   :  { %v1386_v22 = vpop.f32.mrb[33].mxu1 }
 0x261   :  { %8050 = vst [vmem:[#allocation20_spill] sm:$0xff] %v6555_v20  ;;  %8051 = vst [vmem:[#allocation21_spill] sm:$0xff] %v6557_v21  ;;  %v5545_v23 = vpack.c.bf16 %v1386_v22, %v1384_v19  ;;  %v1388_v24 = vpop.f32.mrb[34].mxu1  ;;  %3152 = vmatprep.mubr.bf16.mxu0 %v6555_v20 }
 0x262   :  { %v1390_v27 = vpop.f32.mrb[35].mxu1  ;;  %3153 = vmatmul.mubr.bf16.gmra.mrb[156].mxu0 %v6557_v21 }
 0x263   :  { %v5546_v29 = vpack.c.bf16 %v1390_v27, %v1388_v24  ;;  %v2023_v32 = vmul.bf16 %v6132_v31, %v5545_v23 }
 0x264   :  { %2774 = vmatmul.mubr.bf16.gmra.mrb[140].mxu1 %v6519_v26 }
 0x265   :  { %v2024_v34 = vmul.bf16 %v6133_v33, %v5546_v29  ;;  %3642 = vmatpush1.bf16.xpose.msra.mxu1 %v6519_v26  ;;  %2783 = vmatprep.mubr.bf16.mxu1 %v6525_v43 }
 0x266   :  { %3643 = vmatprep.subr.bf16.mxu1 %v6525_v43 }
 0x267   :  { %v1394_v35 = vpop.f32.mrb[36].mxu1  ;;  %v6565_v36 = vcombine.high %v2023_v32, %v2024_v34  ;;  %v6567_v37 = vcombine.low %v2023_v32, %v2024_v34  ;;  %v6140_v32 = vld [vmem:[#allocation2 + $0xc0] sm:$0xff]  ;;  %v6141_v34 = vld [vmem:[#allocation2 + $0xc8] sm:$0xff] }
 0x268   :  { %v1396_v38 = vpop.f32.mrb[37].mxu1 }
 0x269   :  { %8052 = vst [vmem:[#allocation22_spill] sm:$0xff] %v6565_v36  ;;  %8053 = vst [vmem:[#allocation23_spill] sm:$0xff] %v6567_v37  ;;  %v5547_v39 = vpack.c.bf16 %v1396_v38, %v1394_v35  ;;  %v1398_v40 = vpop.f32.mrb[38].mxu1  ;;  %3160 = vmatprep.mubr.bf16.mxu0 %v6565_v36 }
 0x26a   :  { %v1400_v41 = vpop.f32.mrb[39].mxu1  ;;  %3161 = vmatmul.mubr.bf16.gmra.mrb[160].mxu0 %v6567_v37 }
 0x26b   :  { %v5548_v42 = vpack.c.bf16 %v1400_v41, %v1398_v40  ;;  %v2025_v46 = vmul.bf16 %v6134_v45, %v5547_v39 }
 0x26c   :  { %2784 = vmatmul.mubr.bf16.gmra.mrb[144].mxu1 %v6527_v44 }
 0x26d   :  { %v2026_v48 = vmul.bf16 %v6135_v47, %v5548_v42  ;;  %3644 = vmatpush1.bf16.xpose.msra.mxu1 %v6527_v44  ;;  %2793 = vmatprep.mubr.bf16.mxu1 %v6535_v57 }
 0x26e   :  { %3645 = vmatprep.subr.bf16.mxu1 %v6535_v57 }
 0x26f   :  { %v1404_v49 = vpop.f32.mrb[40].mxu1  ;;  %v6575_v52 = vcombine.high %v2025_v46, %v2026_v48  ;;  %v6577_v53 = vcombine.low %v2025_v46, %v2026_v48  ;;  %v6142_v48 = vld [vmem:[#allocation2 + $0xd0] sm:$0xff] }
 0x270   :  { %v1406_v54 = vpop.f32.mrb[41].mxu1 }
 0x271   :  { %8054 = vst [vmem:[#allocation24_spill] sm:$0xff] %v6575_v52  ;;  %8055 = vst [vmem:[#allocation25_spill] sm:$0xff] %v6577_v53  ;;  %v5549_v55 = vpack.c.bf16 %v1406_v54, %v1404_v49  ;;  %v1408_v56 = vpop.f32.mrb[42].mxu1  ;;  %3168 = vmatprep.mubr.bf16.mxu0 %v6575_v52  ;;  %v6143_v54 = vld [vmem:[#allocation2 + $0xd8] sm:$0xff] }
 0x272   :  { %v1410_v59 = vpop.f32.mrb[43].mxu1  ;;  %3169 = vmatmul.mubr.bf16.gmra.mrb[164].mxu0 %v6577_v53 }
 0x273   :  { %v5550_v60 = vpack.c.bf16 %v1410_v59, %v1408_v56  ;;  %v2027_v62 = vmul.bf16 %v6136_v61, %v5549_v55 }
 0x274   :  { %2794 = vmatmul.mubr.bf16.gmra.mrb[148].mxu1 %v6537_v58 }
 0x275   :  { %v2028_v1 = vmul.bf16 %v6137_v63, %v5550_v60  ;;  %3646 = vmatpush1.bf16.xpose.msra.mxu1 %v6537_v58  ;;  %2803 = vmatprep.mubr.bf16.mxu1 %v6545_v6 }
 0x276   :  { %3647 = vmatprep.subr.bf16.mxu1 %v6545_v6 }
 0x277   :  { %v1414_v2 = vpop.f32.mrb[44].mxu1  ;;  %v6585_v3 = vcombine.high %v2027_v62, %v2028_v1  ;;  %v6587_v4 = vcombine.low %v2027_v62, %v2028_v1 }
 0x278   :  { %v1416_v5 = vpop.f32.mrb[45].mxu1 }
 0x279   :  { %8056 = vst [vmem:[#allocation26_spill] sm:$0xff] %v6585_v3  ;;  %8057 = vst [vmem:[#allocation27_spill] sm:$0xff] %v6587_v4  ;;  %v5551_v10 = vpack.c.bf16 %v1416_v5, %v1414_v2  ;;  %v1418_v11 = vpop.f32.mrb[46].mxu1  ;;  %3176 = vmatprep.mubr.bf16.mxu0 %v6585_v3  ;;  %v6144_v5 = vld [vmem:[#allocation2 + $0xe0] sm:$0xff] }
 0x27a   :  { %v1420_v12 = vpop.f32.mrb[47].mxu1  ;;  %3177 = vmatmul.mubr.bf16.gmra.mrb[168].mxu0 %v6587_v4 }
 0x27b   :  { %v5552_v13 = vpack.c.bf16 %v1420_v12, %v1418_v11  ;;  %v2029_v15 = vmul.bf16 %v6138_v14, %v5551_v10  ;;  %v6145_v11 = vld [vmem:[#allocation2 + $0xe8] sm:$0xff] }
 0x27c   :  { %2804 = vmatmul.mubr.bf16.gmra.mrb[152].mxu1 %v6547_v7 }
 0x27d   :  { %v2030_v17 = vmul.bf16 %v6139_v16, %v5552_v13  ;;  %3648 = vmatpush1.bf16.xpose.msra.mxu1 %v6547_v7  ;;  %2813 = vmatprep.mubr.bf16.mxu1 %v6555_v20 }
 0x27e   :  { %3649 = vmatprep.subr.bf16.mxu1 %v6555_v20 }
 0x27f   :  { %v1424_v18 = vpop.f32.mrb[48].mxu1  ;;  %v6595_v19 = vcombine.high %v2029_v15, %v2030_v17  ;;  %v6597_v22 = vcombine.low %v2029_v15, %v2030_v17 }
 0x280   :  { %v1426_v23 = vpop.f32.mrb[49].mxu1 }
 0x281   :  { %8058 = vst [vmem:[#allocation28_spill] sm:$0xff] %v6595_v19  ;;  %8059 = vst [vmem:[#allocation29_spill] sm:$0xff] %v6597_v22  ;;  %v5553_v24 = vpack.c.bf16 %v1426_v23, %v1424_v18  ;;  %v1428_v27 = vpop.f32.mrb[50].mxu1  ;;  %3184 = vmatprep.mubr.bf16.mxu0 %v6595_v19 }
 0x282   :  { %v1430_v29 = vpop.f32.mrb[51].mxu1  ;;  %3185 = vmatmul.mubr.bf16.gmra.mrb[172].mxu0 %v6597_v22 }
 0x283   :  { %v5554_v31 = vpack.c.bf16 %v1430_v29, %v1428_v27  ;;  %v2031_v33 = vmul.bf16 %v6140_v32, %v5553_v24  ;;  %v6146_v27 = vld [vmem:[#allocation2 + $0xf0] sm:$0xff] }
 0x284   :  { %2814 = vmatmul.mubr.bf16.gmra.mrb[156].mxu1 %v6557_v21 }
 0x285   :  { %v2032_v35 = vmul.bf16 %v6141_v34, %v5554_v31  ;;  %3650 = vmatpush1.bf16.xpose.msra.mxu1 %v6557_v21  ;;  %2823 = vmatprep.mubr.bf16.mxu1 %v6565_v36  ;;  %v6147_v31 = vld [vmem:[#allocation2 + $0xf8] sm:$0xff] }
 0x286   :  { %3651 = vmatprep.subr.bf16.mxu1 %v6565_v36 }
 0x287   :  { %v1434_v38 = vpop.f32.mrb[52].mxu1  ;;  %v6605_v39 = vcombine.high %v2031_v33, %v2032_v35  ;;  %v6607_v40 = vcombine.low %v2031_v33, %v2032_v35 }
 0x288   :  { %v1436_v41 = vpop.f32.mrb[53].mxu1 }
 0x289   :  { %8060 = vst [vmem:[#allocation30_spill] sm:$0xff] %v6605_v39  ;;  %8061 = vst [vmem:[#allocation31_spill] sm:$0xff] %v6607_v40  ;;  %v5555_v42 = vpack.c.bf16 %v1436_v41, %v1434_v38  ;;  %v1438_v45 = vpop.f32.mrb[54].mxu1  ;;  %3192 = vmatprep.mubr.bf16.mxu0 %v6605_v39 }
 0x28a   :  { %v1440_v46 = vpop.f32.mrb[55].mxu1  ;;  %3193 = vmatmul.mubr.bf16.gmra.mrb[176].mxu0 %v6607_v40 }
 0x28b   :  { %v5556_v47 = vpack.c.bf16 %v1440_v46, %v1438_v45  ;;  %v2033_v49 = vmul.bf16 %v6142_v48, %v5555_v42 }
 0x28c   :  { %2824 = vmatmul.mubr.bf16.gmra.mrb[160].mxu1 %v6567_v37 }
 0x28d   :  { %v2034_v55 = vmul.bf16 %v6143_v54, %v5556_v47  ;;  %3652 = vmatpush1.bf16.xpose.msra.mxu1 %v6567_v37  ;;  %2833 = vmatprep.mubr.bf16.mxu1 %v6575_v52  ;;  %v6148_v47 = vld [vmem:[#allocation2 + $0x100] sm:$0xff] }
 0x28e   :  { %3653 = vmatprep.subr.bf16.mxu1 %v6575_v52 }
 0x28f   :  { %v1444_v56 = vpop.f32.mrb[56].mxu1  ;;  %v6615_v59 = vcombine.high %v2033_v49, %v2034_v55  ;;  %v6617_v60 = vcombine.low %v2033_v49, %v2034_v55  ;;  %v6149_v49 = vld [vmem:[#allocation2 + $0x108] sm:$0xff] }
 0x290   :  { %v1446_v61 = vpop.f32.mrb[57].mxu1 }
 0x291   :  { %8062 = vst [vmem:[#allocation32_spill] sm:$0xff] %v6615_v59  ;;  %8063 = vst [vmem:[#allocation33_spill] sm:$0xff] %v6617_v60  ;;  %v5557_v62 = vpack.c.bf16 %v1446_v61, %v1444_v56  ;;  %v1448_v63 = vpop.f32.mrb[58].mxu1  ;;  %3200 = vmatprep.mubr.bf16.mxu0 %v6615_v59 }
 0x292   :  { %v1450_v1 = vpop.f32.mrb[59].mxu1  ;;  %3201 = vmatmul.mubr.bf16.gmra.mrb[180].mxu0 %v6617_v60 }
 0x293   :  { %v5558_v2 = vpack.c.bf16 %v1450_v1, %v1448_v63  ;;  %v2035_v10 = vmul.bf16 %v6144_v5, %v5557_v62 }
 0x294   :  { %2834 = vmatmul.mubr.bf16.gmra.mrb[164].mxu1 %v6577_v53 }
 0x295   :  { %v2036_v12 = vmul.bf16 %v6145_v11, %v5558_v2  ;;  %3654 = vmatpush1.bf16.xpose.msra.mxu1 %v6577_v53  ;;  %2843 = vmatprep.mubr.bf16.mxu1 %v6585_v3 }
 0x296   :  { %3655 = vmatprep.subr.bf16.mxu1 %v6585_v3 }
 0x297   :  { %v1454_v13 = vpop.f32.mrb[60].mxu1  ;;  %v6625_v14 = vcombine.high %v2035_v10, %v2036_v12  ;;  %v6627_v15 = vcombine.low %v2035_v10, %v2036_v12  ;;  %v6150_v10 = vld [vmem:[#allocation2 + $0x110] sm:$0xff]  ;;  %v6151_v12 = vld [vmem:[#allocation2 + $0x118] sm:$0xff] }
 0x298   :  { %v1456_v16 = vpop.f32.mrb[61].mxu1 }
 0x299   :  { %8064 = vst [vmem:[#allocation34_spill] sm:$0xff] %v6625_v14  ;;  %8065 = vst [vmem:[#allocation35_spill] sm:$0xff] %v6627_v15  ;;  %v5559_v17 = vpack.c.bf16 %v1456_v16, %v1454_v13  ;;  %v1458_v18 = vpop.f32.mrb[62].mxu1  ;;  %3208 = vmatprep.mubr.bf16.mxu0 %v6625_v14 }
 0x29a   :  { %v1460_v23 = vpop.f32.mrb[63].mxu1  ;;  %3209 = vmatmul.mubr.bf16.gmra.mrb[184].mxu0 %v6627_v15 }
 0x29b   :  { %v5560_v24 = vpack.c.bf16 %v1460_v23, %v1458_v18  ;;  %v2037_v29 = vmul.bf16 %v6146_v27, %v5559_v17 }
 0x29c   :  { %2844 = vmatmul.mubr.bf16.gmra.mrb[168].mxu1 %v6587_v4 }
 0x29d   :  { %v2038_v32 = vmul.bf16 %v6147_v31, %v5560_v24  ;;  %3656 = vmatpush1.bf16.xpose.msra.mxu1 %v6587_v4  ;;  %2853 = vmatprep.mubr.bf16.mxu1 %v6595_v19 }
 0x29e   :  { %3657 = vmatprep.subr.bf16.mxu1 %v6595_v19 }
 0x29f   :  { %v1464_v33 = vpop.f32.mrb[64].mxu1  ;;  %v6635_v34 = vcombine.high %v2037_v29, %v2038_v32  ;;  %v6637_v35 = vcombine.low %v2037_v29, %v2038_v32  ;;  %v6152_v32 = vld [vmem:[#allocation2 + $0x120] sm:$0xff] }
 0x2a0   :  { %v1466_v38 = vpop.f32.mrb[65].mxu1 }
 0x2a1   :  { %8066 = vst [vmem:[#allocation36_spill] sm:$0xff] %v6635_v34  ;;  %8067 = vst [vmem:[#allocation37_spill] sm:$0xff] %v6637_v35  ;;  %v5561_v41 = vpack.c.bf16 %v1466_v38, %v1464_v33  ;;  %v1468_v42 = vpop.f32.mrb[66].mxu1  ;;  %3216 = vmatprep.mubr.bf16.mxu0 %v6635_v34  ;;  %v6153_v38 = vld [vmem:[#allocation2 + $0x128] sm:$0xff] }
 0x2a2   :  { %v1470_v45 = vpop.f32.mrb[67].mxu1  ;;  %3217 = vmatmul.mubr.bf16.gmra.mrb[188].mxu0 %v6637_v35 }
 0x2a3   :  { %v5562_v46 = vpack.c.bf16 %v1470_v45, %v1468_v42  ;;  %v2039_v48 = vmul.bf16 %v6148_v47, %v5561_v41 }
 0x2a4   :  { %2854 = vmatmul.mubr.bf16.gmra.mrb[172].mxu1 %v6597_v22 }
 0x2a5   :  { %v2040_v54 = vmul.bf16 %v6149_v49, %v5562_v46  ;;  %3658 = vmatpush1.bf16.xpose.msra.mxu1 %v6597_v22  ;;  %2863 = vmatprep.mubr.bf16.mxu1 %v6605_v39 }
 0x2a6   :  { %3659 = vmatprep.subr.bf16.mxu1 %v6605_v39 }
 0x2a7   :  { %v1474_v55 = vpop.f32.mrb[68].mxu1  ;;  %v6645_v56 = vcombine.high %v2039_v48, %v2040_v54  ;;  %v6647_v61 = vcombine.low %v2039_v48, %v2040_v54 }
 0x2a8   :  { %v1476_v62 = vpop.f32.mrb[69].mxu1 }
 0x2a9   :  { %8068 = vst [vmem:[#allocation38_spill] sm:$0xff] %v6645_v56  ;;  %8069 = vst [vmem:[#allocation39_spill] sm:$0xff] %v6647_v61  ;;  %v5563_v63 = vpack.c.bf16 %v1476_v62, %v1474_v55  ;;  %v1478_v1 = vpop.f32.mrb[70].mxu1  ;;  %3224 = vmatprep.mubr.bf16.mxu0 %v6645_v56  ;;  %3676 = vmatprep.subr.bf16.mxu0 %v6645_v56  ;;  %v6154_v62 = vld [vmem:[#allocation2 + $0x130] sm:$0xff] }
 0x2aa   :  { %v1480_v2 = vpop.f32.mrb[71].mxu1  ;;  %3225 = vmatmul.mubr.bf16.gmra.mrb[192].mxu0 %v6647_v61 }
 0x2ab   :  { %v5564_v5 = vpack.c.bf16 %v1480_v2, %v1478_v1  ;;  %3677 = vmatpush1.bf16.xpose.msra.mxu0 %v6647_v61  ;;  %v2041_v11 = vmul.bf16 %v6150_v10, %v5563_v63  ;;  %v6155_v1 = vld [vmem:[#allocation2 + $0x138] sm:$0xff] }
 0x2ac   :  { %2864 = vmatmul.mubr.bf16.gmra.mrb[176].mxu1 %v6607_v40 }
 0x2ad   :  { %v2042_v13 = vmul.bf16 %v6151_v12, %v5564_v5  ;;  %3660 = vmatpush1.bf16.xpose.msra.mxu1 %v6607_v40  ;;  %2873 = vmatprep.mubr.bf16.mxu1 %v6615_v59 }
 0x2ae   :  { %3661 = vmatprep.subr.bf16.mxu1 %v6615_v59 }
 0x2af   :  { %v1484_v16 = vpop.f32.mrb[72].mxu1  ;;  %v6657_v17 = vcombine.high %v2041_v11, %v2042_v13  ;;  %v6659_v18 = vcombine.low %v2041_v11, %v2042_v13 }
 0x2b0   :  { %v1486_v23 = vpop.f32.mrb[73].mxu1 }
 0x2b1   :  { %8070 = vst [vmem:[#allocation40_spill] sm:$0xff] %v6657_v17  ;;  %8071 = vst [vmem:[#allocation41_spill] sm:$0xff] %v6659_v18  ;;  %v5565_v24 = vpack.c.bf16 %v1486_v23, %v1484_v16  ;;  %v1488_v27 = vpop.f32.mrb[74].mxu1  ;;  %3232 = vmatprep.mubr.bf16.mxu0 %v6657_v17  ;;  %3678 = vmatprep.subr.bf16.mxu0 %v6657_v17 }
 0x2b2   :  { %v1490_v29 = vpop.f32.mrb[75].mxu1  ;;  %3233 = vmatmul.mubr.bf16.gmra.mrb[196].mxu0 %v6659_v18 }
 0x2b3   :  { %v5566_v31 = vpack.c.bf16 %v1490_v29, %v1488_v27  ;;  %3679 = vmatpush1.bf16.xpose.msra.mxu0 %v6659_v18  ;;  %v2043_v33 = vmul.bf16 %v6152_v32, %v5565_v24  ;;  %v6156_v27 = vld [vmem:[#allocation2 + $0x140] sm:$0xff] }
 0x2b4   :  { %2874 = vmatmul.mubr.bf16.gmra.mrb[180].mxu1 %v6617_v60 }
 0x2b5   :  { %v2044_v41 = vmul.bf16 %v6153_v38, %v5566_v31  ;;  %3662 = vmatpush1.bf16.xpose.msra.mxu1 %v6617_v60  ;;  %2883 = vmatprep.mubr.bf16.mxu1 %v6625_v14  ;;  %v6157_v31 = vld [vmem:[#allocation2 + $0x148] sm:$0xff] }
 0x2b6   :  { %3663 = vmatprep.subr.bf16.mxu1 %v6625_v14 }
 0x2b7   :  { %v1494_v42 = vpop.f32.mrb[76].mxu1  ;;  %v6669_v45 = vcombine.high %v2043_v33, %v2044_v41  ;;  %v6671_v46 = vcombine.low %v2043_v33, %v2044_v41 }
 0x2b8   :  { %v1496_v47 = vpop.f32.mrb[77].mxu1 }
 0x2b9   :  { %8072 = vst [vmem:[#allocation42_spill] sm:$0xff] %v6669_v45  ;;  %8073 = vst [vmem:[#allocation43_spill] sm:$0xff] %v6671_v46  ;;  %v5567_v48 = vpack.c.bf16 %v1496_v47, %v1494_v42  ;;  %v1498_v49 = vpop.f32.mrb[78].mxu1  ;;  %3240 = vmatprep.mubr.bf16.mxu0 %v6669_v45  ;;  %3680 = vmatprep.subr.bf16.mxu0 %v6669_v45 }
 0x2ba   :  { %v1500_v54 = vpop.f32.mrb[79].mxu1  ;;  %3241 = vmatmul.mubr.bf16.gmra.mrb[200].mxu0 %v6671_v46 }
 0x2bb   :  { %v5568_v55 = vpack.c.bf16 %v1500_v54, %v1498_v49  ;;  %3681 = vmatpush1.bf16.xpose.msra.mxu0 %v6671_v46  ;;  %v2045_v63 = vmul.bf16 %v6154_v62, %v5567_v48 }
 0x2bc   :  { %2884 = vmatmul.mubr.bf16.gmra.mrb[184].mxu1 %v6627_v15 }
 0x2bd   :  { %v2046_v2 = vmul.bf16 %v6155_v1, %v5568_v55  ;;  %3664 = vmatpush1.bf16.xpose.msra.mxu1 %v6627_v15  ;;  %2893 = vmatprep.mubr.bf16.mxu1 %v6635_v34  ;;  %v6158_v55 = vld [vmem:[#allocation2 + $0x150] sm:$0xff] }
 0x2be   :  { %3665 = vmatprep.subr.bf16.mxu1 %v6635_v34 }
 0x2bf   :  { %v1504_v5 = vpop.f32.mrb[80].mxu1  ;;  %v6681_v10 = vcombine.high %v2045_v63, %v2046_v2  ;;  %v6683_v11 = vcombine.low %v2045_v63, %v2046_v2  ;;  %v6159_v63 = vld [vmem:[#allocation2 + $0x158] sm:$0xff] }
 0x2c0   :  { %v1506_v12 = vpop.f32.mrb[81].mxu1 }
 0x2c1   :  { %8074 = vst [vmem:[#allocation44_spill] sm:$0xff] %v6681_v10  ;;  %8075 = vst [vmem:[#allocation45_spill] sm:$0xff] %v6683_v11  ;;  %v5569_v13 = vpack.c.bf16 %v1506_v12, %v1504_v5  ;;  %v1508_v16 = vpop.f32.mrb[82].mxu1  ;;  %3248 = vmatprep.mubr.bf16.mxu0 %v6681_v10  ;;  %3682 = vmatprep.subr.bf16.mxu0 %v6681_v10 }
 0x2c2   :  { %v1510_v23 = vpop.f32.mrb[83].mxu1  ;;  %3249 = vmatmul.mubr.bf16.gmra.mrb[204].mxu0 %v6683_v11 }
 0x2c3   :  { %v5570_v24 = vpack.c.bf16 %v1510_v23, %v1508_v16  ;;  %3683 = vmatpush1.bf16.xpose.msra.mxu0 %v6683_v11  ;;  %v2047_v29 = vmul.bf16 %v6156_v27, %v5569_v13 }
 0x2c4   :  { %2894 = vmatmul.mubr.bf16.gmra.mrb[188].mxu1 %v6637_v35 }
 0x2c5   :  { %v2048_v32 = vmul.bf16 %v6157_v31, %v5570_v24  ;;  %3666 = vmatpush1.bf16.xpose.msra.mxu1 %v6637_v35  ;;  %2903 = vmatprep.mubr.bf16.mxu1 %v6645_v56 }
 0x2c7   :  { %v1514_v33 = vpop.f32.mrb[84].mxu1  ;;  %v6692_v38 = vcombine.high %v2047_v29, %v2048_v32  ;;  %v6694_v41 = vcombine.low %v2047_v29, %v2048_v32  ;;  %v6160_v29 = vld [vmem:[#allocation2 + $0x160] sm:$0xff]  ;;  %v6161_v32 = vld [vmem:[#allocation2 + $0x168] sm:$0xff] }
 0x2c8   :  { %v1516_v42 = vpop.f32.mrb[85].mxu1 }
 0x2c9   :  { %8076 = vst [vmem:[#allocation46_spill] sm:$0xff] %v6692_v38  ;;  %8077 = vst [vmem:[#allocation47_spill] sm:$0xff] %v6694_v41  ;;  %v5571_v47 = vpack.c.bf16 %v1516_v42, %v1514_v33  ;;  %v1518_v48 = vpop.f32.mrb[86].mxu1  ;;  %3256 = vmatprep.mubr.bf16.mxu0 %v6692_v38  ;;  %3684 = vmatprep.subr.bf16.mxu0 %v6692_v38 }
 0x2ca   :  { %v1520_v49 = vpop.f32.mrb[87].mxu1  ;;  %3257 = vmatmul.mubr.bf16.gmra.mrb[208].mxu0 %v6694_v41 }
 0x2cb   :  { %v5572_v54 = vpack.c.bf16 %v1520_v49, %v1518_v48  ;;  %3685 = vmatpush1.bf16.xpose.msra.mxu0 %v6694_v41  ;;  %v2049_v62 = vmul.bf16 %v6158_v55, %v5571_v47 }
 0x2cc   :  { %2904 = vmatmul.mubr.bf16.gmra.mrb[192].mxu1 %v6647_v61 }
 0x2cd   :  { %v2050_v1 = vmul.bf16 %v6159_v63, %v5572_v54  ;;  %2913 = vmatprep.mubr.bf16.mxu1 %v6657_v17 }
 0x2cf   :  { %v1524_v2 = vpop.f32.mrb[88].mxu1  ;;  %v6702_v5 = vcombine.high %v2049_v62, %v2050_v1  ;;  %v6704_v12 = vcombine.low %v2049_v62, %v2050_v1  ;;  %v6162_v1 = vld [vmem:[#allocation2 + $0x170] sm:$0xff] }
 0x2d0   :  { %v1526_v13 = vpop.f32.mrb[89].mxu1 }
 0x2d1   :  { %8078 = vst [vmem:[#allocation48_spill] sm:$0xff] %v6702_v5  ;;  %8079 = vst [vmem:[#allocation49_spill] sm:$0xff] %v6704_v12  ;;  %v5573_v16 = vpack.c.bf16 %v1526_v13, %v1524_v2  ;;  %v1528_v23 = vpop.f32.mrb[90].mxu1  ;;  %3264 = vmatprep.mubr.bf16.mxu0 %v6702_v5  ;;  %3686 = vmatprep.subr.bf16.mxu0 %v6702_v5  ;;  %v6163_v13 = vld [vmem:[#allocation2 + $0x178] sm:$0xff] }
 0x2d2   :  { %v1530_v24 = vpop.f32.mrb[91].mxu1  ;;  %3265 = vmatmul.mubr.bf16.gmra.mrb[212].mxu0 %v6704_v12 }
 0x2d3   :  { %v5574_v27 = vpack.c.bf16 %v1530_v24, %v1528_v23  ;;  %3687 = vmatpush1.bf16.xpose.msra.mxu0 %v6704_v12  ;;  %v2051_v31 = vmul.bf16 %v6160_v29, %v5573_v16 }
 0x2d4   :  { %2914 = vmatmul.mubr.bf16.gmra.mrb[196].mxu1 %v6659_v18 }
 0x2d5   :  { %v2052_v33 = vmul.bf16 %v6161_v32, %v5574_v27  ;;  %2923 = vmatprep.mubr.bf16.mxu1 %v6669_v45 }
 0x2d7   :  { %v1534_v42 = vpop.f32.mrb[92].mxu1  ;;  %v6712_v47 = vcombine.high %v2051_v31, %v2052_v33  ;;  %v6714_v48 = vcombine.low %v2051_v31, %v2052_v33 }
 0x2d8   :  { %v1536_v49 = vpop.f32.mrb[93].mxu1 }
 0x2d9   :  { %8080 = vst [vmem:[#allocation50_spill] sm:$0xff] %v6712_v47  ;;  %8081 = vst [vmem:[#allocation51_spill] sm:$0xff] %v6714_v48  ;;  %v5575_v54 = vpack.c.bf16 %v1536_v49, %v1534_v42  ;;  %v1538_v55 = vpop.f32.mrb[94].mxu1  ;;  %3272 = vmatprep.mubr.bf16.mxu0 %v6712_v47  ;;  %3688 = vmatprep.subr.bf16.mxu0 %v6712_v47  ;;  %v6164_v49 = vld [vmem:[#allocation2 + $0x180] sm:$0xff] }
 0x2da   :  { %v1540_v62 = vpop.f32.mrb[95].mxu1  ;;  %3273 = vmatmul.mubr.bf16.gmra.mrb[216].mxu0 %v6714_v48 }
 0x2db   :  { %v5576_v63 = vpack.c.bf16 %v1540_v62, %v1538_v55  ;;  %3689 = vmatpush1.bf16.xpose.msra.mxu0 %v6714_v48  ;;  %v2053_v2 = vmul.bf16 %v6162_v1, %v5575_v54  ;;  %v6165_v55 = vld [vmem:[#allocation2 + $0x188] sm:$0xff] }
 0x2dc   :  { %2924 = vmatmul.mubr.bf16.gmra.mrb[200].mxu1 %v6671_v46 }
 0x2dd   :  { %v2054_v16 = vmul.bf16 %v6163_v13, %v5576_v63  ;;  %2933 = vmatprep.mubr.bf16.mxu1 %v6681_v10 }
 0x2df   :  { %v1544_v23 = vpop.f32.mrb[96].mxu1  ;;  %v6722_v24 = vcombine.high %v2053_v2, %v2054_v16  ;;  %v6724_v27 = vcombine.low %v2053_v2, %v2054_v16 }
 0x2e0   :  { %v1546_v29 = vpop.f32.mrb[97].mxu1 }
 0x2e1   :  { %8082 = vst [vmem:[#allocation52_spill] sm:$0xff] %v6722_v24  ;;  %8083 = vst [vmem:[#allocation53_spill] sm:$0xff] %v6724_v27  ;;  %v5577_v31 = vpack.c.bf16 %v1546_v29, %v1544_v23  ;;  %v1548_v32 = vpop.f32.mrb[98].mxu1  ;;  %3280 = vmatprep.mubr.bf16.mxu0 %v6722_v24  ;;  %3690 = vmatprep.subr.bf16.mxu0 %v6722_v24 }
 0x2e2   :  { %v1550_v33 = vpop.f32.mrb[99].mxu1  ;;  %3281 = vmatmul.mubr.bf16.gmra.mrb[220].mxu0 %v6724_v27 }
 0x2e3   :  { %v5578_v42 = vpack.c.bf16 %v1550_v33, %v1548_v32  ;;  %3691 = vmatpush1.bf16.xpose.msra.mxu0 %v6724_v27  ;;  %v2055_v54 = vmul.bf16 %v6164_v49, %v5577_v31  ;;  %v6166_v32 = vld [vmem:[#allocation2 + $0x190] sm:$0xff] }
 0x2e4   :  { %2934 = vmatmul.mubr.bf16.gmra.mrb[204].mxu1 %v6683_v11 }
 0x2e5   :  { %v2056_v62 = vmul.bf16 %v6165_v55, %v5578_v42  ;;  %2943 = vmatprep.mubr.bf16.mxu1 %v6692_v38  ;;  %v6167_v42 = vld [vmem:[#allocation2 + $0x198] sm:$0xff] }
 0x2e7   :  { %v1554_v63 = vpop.f32.mrb[100].mxu1  ;;  %v6732_v1 = vcombine.high %v2055_v54, %v2056_v62  ;;  %v6734_v2 = vcombine.low %v2055_v54, %v2056_v62 }
 0x2e8   :  { %v1556_v13 = vpop.f32.mrb[101].mxu1 }
 0x2e9   :  { %8084 = vst [vmem:[#allocation54_spill] sm:$0xff] %v6732_v1  ;;  %8085 = vst [vmem:[#allocation55_spill] sm:$0xff] %v6734_v2  ;;  %v5579_v16 = vpack.c.bf16 %v1556_v13, %v1554_v63  ;;  %v1558_v23 = vpop.f32.mrb[102].mxu1  ;;  %3288 = vmatprep.mubr.bf16.mxu0 %v6732_v1  ;;  %3692 = vmatprep.subr.bf16.mxu0 %v6732_v1 }
 0x2ea   :  { %v1560_v29 = vpop.f32.mrb[103].mxu1  ;;  %3289 = vmatmul.mubr.bf16.gmra.mrb[224].mxu0 %v6734_v2 }
 0x2eb   :  { %v5580_v31 = vpack.c.bf16 %v1560_v29, %v1558_v23  ;;  %3693 = vmatpush1.bf16.xpose.msra.mxu0 %v6734_v2  ;;  %v2057_v33 = vmul.bf16 %v6166_v32, %v5579_v16  ;;  %v6168_v29 = vld [vmem:[#allocation2 + $0x1a0] sm:$0xff]  ;;  %v6169_v32 = vld [vmem:[#allocation2 + $0x1a8] sm:$0xff] }
 0x2ec   :  { %2944 = vmatmul.mubr.bf16.gmra.mrb[208].mxu1 %v6694_v41 }
 0x2ed   :  { %v2058_v49 = vmul.bf16 %v6167_v42, %v5580_v31  ;;  %2953 = vmatprep.mubr.bf16.mxu1 %v6702_v5 }
 0x2ef   :  { %v1564_v54 = vpop.f32.mrb[104].mxu1  ;;  %v6742_v55 = vcombine.high %v2057_v33, %v2058_v49  ;;  %v6744_v62 = vcombine.low %v2057_v33, %v2058_v49 }
 0x2f0   :  { %v1566_v63 = vpop.f32.mrb[105].mxu1 }
 0x2f1   :  { %8086 = vst [vmem:[#allocation56_spill] sm:$0xff] %v6742_v55  ;;  %8087 = vst [vmem:[#allocation57_spill] sm:$0xff] %v6744_v62  ;;  %v5581_v13 = vpack.c.bf16 %v1566_v63, %v1564_v54  ;;  %v1568_v0 = vpop.f32.mrb[106].mxu1  ;;  %3296 = vmatprep.mubr.bf16.mxu0 %v6742_v55  ;;  %3694 = vmatprep.subr.bf16.mxu0 %v6742_v55 }
 0x2f2   :  { %v1570_v23 = vpop.f32.mrb[107].mxu1  ;;  %3297 = vmatmul.mubr.bf16.gmra.mrb[228].mxu0 %v6744_v62 }
 0x2f3   :  { %v5582_v16 = vpack.c.bf16 %v1570_v23, %v1568_v0  ;;  %3695 = vmatpush1.bf16.xpose.msra.mxu0 %v6744_v62  ;;  %v2059_v31 = vmul.bf16 %v6168_v29, %v5581_v13  ;;  %v6170_v23 = vld [vmem:[#allocation2 + $0x1b0] sm:$0xff]  ;;  %v6171_v29 = vld [vmem:[#allocation2 + $0x1b8] sm:$0xff] }
 0x2f4   :  { %2954 = vmatmul.mubr.bf16.gmra.mrb[212].mxu1 %v6704_v12 }
 0x2f5   :  { %v2060_v33 = vmul.bf16 %v6169_v32, %v5582_v16  ;;  %2963 = vmatprep.mubr.bf16.mxu1 %v6712_v47 }
 0x2f7   :  { %v1574_v42 = vpop.f32.mrb[108].mxu1  ;;  %v6752_v49 = vcombine.high %v2059_v31, %v2060_v33  ;;  %v6754_v54 = vcombine.low %v2059_v31, %v2060_v33 }
 0x2f8   :  { %v1576_v63 = vpop.f32.mrb[109].mxu1 }
 0x2f9   :  { %8088 = vst [vmem:[#allocation58_spill] sm:$0xff] %v6752_v49  ;;  %8089 = vst [vmem:[#allocation59_spill] sm:$0xff] %v6754_v54  ;;  %v5583_v5 = vpack.c.bf16 %v1576_v63, %v1574_v42  ;;  %v1578_v41 = vpop.f32.mrb[110].mxu1  ;;  %3304 = vmatprep.mubr.bf16.mxu0 %v6752_v49  ;;  %3696 = vmatprep.subr.bf16.mxu0 %v6752_v49 }
 0x2fa   :  { %v1580_v0 = vpop.f32.mrb[111].mxu1  ;;  %3305 = vmatmul.mubr.bf16.gmra.mrb[232].mxu0 %v6754_v54 }
 0x2fb   :  { %v5584_v13 = vpack.c.bf16 %v1580_v0, %v1578_v41  ;;  %3697 = vmatpush1.bf16.xpose.msra.mxu0 %v6754_v54  ;;  %v2061_v16 = vmul.bf16 %v6170_v23, %v5583_v5  ;;  %v6172_v23 = vld [vmem:[#allocation2 + $0x1c0] sm:$0xff] }
 0x2fc   :  { %2964 = vmatmul.mubr.bf16.gmra.mrb[216].mxu1 %v6714_v48 }
 0x2fd   :  { %v2062_v31 = vmul.bf16 %v6171_v29, %v5584_v13  ;;  %2973 = vmatprep.mubr.bf16.mxu1 %v6722_v24  ;;  %v6762_v32 = vpop.f32.mrb[128].mxu0 }
 0x2fe   :  { %v3100_v33 = vpop.f32.mrb[129].mxu0 }
 0x2ff   :  { %v1584_v42 = vpop.f32.mrb[112].mxu1  ;;  %v6764_v63 = vpop.f32.mrb[130].mxu0  ;;  %v6766_v47 = vcombine.high %v2061_v16, %v2062_v31  ;;  %v6768_v12 = vcombine.low %v2061_v16, %v2062_v31  ;;  %v6173_v16 = vld [vmem:[#allocation2 + $0x1c8] sm:$0xff] }
 0x300   :  { %v1586_v41 = vpop.f32.mrb[113].mxu1  ;;  %v3103_v0 = vpop.f32.mrb[131].mxu0 }
 0x301   :  { %8090 = vst [vmem:[#allocation60_spill] sm:$0xff] %v6766_v47  ;;  %8091 = vst [vmem:[#allocation61_spill] sm:$0xff] %v6768_v12  ;;  %v5585_v38 = vpack.c.bf16 %v1586_v41, %v1584_v42  ;;  %v1588_v48 = vpop.f32.mrb[114].mxu1  ;;  %3312 = vmatprep.mubr.bf16.mxu0 %v6766_v47  ;;  %3698 = vmatprep.subr.bf16.mxu0 %v6766_v47 }
 0x302   :  { %v1590_v5 = vpop.f32.mrb[115].mxu1  ;;  %3313 = vmatmul.mubr.bf16.gmra.mrb[236].mxu0 %v6768_v12 }
 0x303   :  { %v5586_v13 = vpack.c.bf16 %v1590_v5, %v1588_v48  ;;  %3699 = vmatpush1.bf16.xpose.msra.mxu0 %v6768_v12  ;;  %v2063_v29 = vmul.bf16 %v6172_v23, %v5585_v38  ;;  %v6174_v23 = vld [vmem:[#allocation2 + $0x1d0] sm:$0xff] }
 0x304   :  { %2974 = vmatmul.mubr.bf16.gmra.mrb[220].mxu1 %v6724_v27 }
 0x305   :  { %v2064_v31 = vmul.bf16 %v6173_v16, %v5586_v13  ;;  %2983 = vmatprep.mubr.bf16.mxu1 %v6732_v1  ;;  %v6776_v33 = vpop.f32.mrb[132].mxu0 }
 0x306   :  { %v3108_v42 = vpop.f32.mrb[133].mxu0 }
 0x307   :  { %v1594_v41 = vpop.f32.mrb[116].mxu1  ;;  %v6778_v0 = vpop.f32.mrb[134].mxu0  ;;  %v6780_v24 = vcombine.high %v2063_v29, %v2064_v31  ;;  %v6782_v11 = vcombine.low %v2063_v29, %v2064_v31  ;;  %v6175_v29 = vld [vmem:[#allocation2 + $0x1d8] sm:$0xff] }
 0x308   :  { %v1596_v48 = vpop.f32.mrb[117].mxu1  ;;  %v3111_v5 = vpop.f32.mrb[135].mxu0 }
 0x309   :  { %8092 = vst [vmem:[#allocation62_spill] sm:$0xff] %v6780_v24  ;;  %8093 = vst [vmem:[#allocation63_spill] sm:$0xff] %v6782_v11  ;;  %v5587_v10 = vpack.c.bf16 %v1596_v48, %v1594_v41  ;;  %v1598_v27 = vpop.f32.mrb[118].mxu1  ;;  %3320 = vmatprep.mubr.bf16.mxu0 %v6780_v24  ;;  %3700 = vmatprep.subr.bf16.mxu0 %v6780_v24 }
 0x30a   :  { %v1600_v38 = vpop.f32.mrb[119].mxu1  ;;  %3321 = vmatmul.mubr.bf16.gmra.mrb[240].mxu0 %v6782_v11 }
 0x30b   :  { %v5588_v13 = vpack.c.bf16 %v1600_v38, %v1598_v27  ;;  %3701 = vmatpush1.bf16.xpose.msra.mxu0 %v6782_v11  ;;  %v2065_v16 = vmul.bf16 %v6174_v23, %v5587_v10  ;;  %v6176_v23 = vld [vmem:[#allocation2 + $0x1e0] sm:$0xff] }
 0x30c   :  { %2984 = vmatmul.mubr.bf16.gmra.mrb[224].mxu1 %v6734_v2 }
 0x30d   :  { %v2066_v31 = vmul.bf16 %v6175_v29, %v5588_v13  ;;  %2993 = vmatprep.mubr.bf16.mxu1 %v6742_v55  ;;  %v6790_v42 = vpop.f32.mrb[136].mxu0 }
 0x30e   :  { %v3116_v41 = vpop.f32.mrb[137].mxu0 }
 0x30f   :  { %v1604_v48 = vpop.f32.mrb[120].mxu1  ;;  %v6792_v5 = vpop.f32.mrb[138].mxu0  ;;  %v6794_v1 = vcombine.high %v2065_v16, %v2066_v31  ;;  %v6796_v46 = vcombine.low %v2065_v16, %v2066_v31  ;;  %v6177_v16 = vld [vmem:[#allocation2 + $0x1e8] sm:$0xff] }
 0x310   :  { %v1606_v27 = vpop.f32.mrb[121].mxu1  ;;  %v3119_v38 = vpop.f32.mrb[139].mxu0 }
 0x311   :  { %8094 = vst [vmem:[#allocation64_spill] sm:$0xff] %v6794_v1  ;;  %8095 = vst [vmem:[#allocation65_spill] sm:$0xff] %v6796_v46  ;;  %v5589_v45 = vpack.c.bf16 %v1606_v27, %v1604_v48  ;;  %v1608_v2 = vpop.f32.mrb[122].mxu1  ;;  %3328 = vmatprep.mubr.bf16.mxu0 %v6794_v1  ;;  %3702 = vmatprep.subr.bf16.mxu0 %v6794_v1  ;;  %v6260_v48 = vmov 1966171168   ;;  %v7997_v38 = vlaneseq }
 0x312   :  { %v1610_v10 = vpop.f32.mrb[123].mxu1  ;;  %3329 = vmatmul.mubr.bf16.gmra.mrb[244].mxu0 %v6796_v46  ;;  %v3620_v27 = vunpack.c.l.s4 %v6260_v48 }
 0x313   :  { %v5590_v13 = vpack.c.bf16 %v1610_v10, %v1608_v2  ;;  %3703 = vmatpush1.bf16.xpose.msra.mxu0 %v6796_v46  ;;  %v2067_v29 = vmul.bf16 %v6176_v23, %v5589_v45 }
 0x314   :  { %2994 = vmatmul.mubr.bf16.gmra.mrb[228].mxu1 %v6744_v62 }
 0x315   :  { %v2068_v31 = vmul.bf16 %v6177_v16, %v5590_v13  ;;  %3003 = vmatprep.mubr.bf16.mxu1 %v6752_v49  ;;  %v6804_v41 = vpop.f32.mrb[140].mxu0  ;;  %v3621_v13 = vunpack.c.0.s8 %v3620_v27  ;;  %v6815_v16 = vshrl.u32 %v7997_v38, 7 }
 0x316   :  { %v3124_v55 = vpop.f32.mrb[141].mxu0 }
 0x317   :  { %v1614_v18 = vpop.f32.mrb[124].mxu1  ;;  %v6806_v17 = vpop.f32.mrb[142].mxu0  ;;  %v6808_v2 = vcombine.high %v2067_v29, %v2068_v31  ;;  %v6810_v10 = vcombine.low %v2067_v29, %v2068_v31  ;;  %8098 = vst [vmem:[#allocation68_spill] sm:$0xff] %v6815_v16  ;;  %v6827_v49 = vsub.s32 %v3621_v13, %v6815_v16 }
 0x318   :  { %v1616_v62 = vpop.f32.mrb[125].mxu1  ;;  %v3127_v61 = vpop.f32.mrb[143].mxu0  ;;  %v5492_v29 = vld.sshfl [vmem:[%s7967_s4] sm:$0x11 pattern:$0x75316420] }
 0x319   :  { %8096 = vst [vmem:[#allocation66_spill] sm:$0xff] %v6808_v2  ;;  %8097 = vst [vmem:[#allocation67_spill] sm:$0xff] %v6810_v10  ;;  %v5591_v45 = vpack.c.bf16 %v1616_v62, %v1614_v18  ;;  %v1618_v23 = vpop.f32.mrb[126].mxu1  ;;  %3336 = vmatprep.mubr.bf16.mxu0 %v6808_v2  ;;  %3704 = vmatprep.subr.bf16.mxu0 %v6808_v2  ;;  %v6178_v61 = vld [vmem:[#allocation2 + $0x1f0] sm:$0xff]  ;;  %v6179_v62 = vld [vmem:[#allocation2 + $0x1f8] sm:$0xff]  ;;  %v3618_v38 = vcombine.high %v5492_v29, %v5492_v29 }
 0x31a   :  { %v1620_v55 = vpop.f32.mrb[127].mxu1  ;;  %3337 = vmatmul.mubr.bf16.gmra.mrb[248].mxu0 %v6810_v10  ;;  %8099 = vst [vmem:[#allocation69_spill] sm:$0xff] %v6827_v49 }
 0x31b   :  { %v5592_v31 = vpack.c.bf16 %v1620_v55, %v1618_v23  ;;  %3705 = vmatpush1.bf16.xpose.msra.mxu0 %v6810_v10  ;;  %v2069_v18 = vmul.bf16 %v6178_v61, %v5591_v45 }
 0x31c   :  { %3004 = vmatmul.mubr.bf16.gmra.mrb[232].mxu1 %v6754_v54 }
 0x31d   :  { %v2070_v48 = vmul.bf16 %v6179_v62, %v5592_v31  ;;  %3013 = vmatprep.mubr.bf16.mxu1 %v6766_v47  ;;  %v6824_v27 = vpop.f32.mrb[144].mxu0 }
 0x31e   :  { %v3132_v56 = vpop.f32.mrb[145].mxu0 }
 0x31f   :  { %v2745_v35 = vpop.f32.mrb[128].mxu1  ;;  %v6829_v34 = vpop.f32.mrb[146].mxu0  ;;  %v6831_v23 = vcombine.high %v2069_v18, %v2070_v48  ;;  %v6833_v55 = vcombine.low %v2069_v18, %v2070_v48  ;;  %v6842_v56 = vrot.slane %v3618_v38, %v6827_v49 }
 0x320   :  { %v2747_v54 = vpop.f32.mrb[129].mxu1  ;;  %v3135_v45 = vpop.f32.mrb[147].mxu0 }
 0x321   :  { %8100 = vst [vmem:[#allocation70_spill] sm:$0xff] %v6831_v23  ;;  %8101 = vst [vmem:[#allocation71_spill] sm:$0xff] %v6833_v55  ;;  %v3353_v31 = vadd.f32 %v6762_v32, %v2747_v54  ;;  %v6837_v61 = vmul.f32 %v6762_v32, %v2747_v54  ;;  %v2749_v62 = vpop.f32.mrb[130].mxu1  ;;  %3344 = vmatprep.mubr.bf16.mxu0 %v6831_v23  ;;  %3706 = vmatprep.subr.bf16.mxu0 %v6831_v23 }
 0x322   :  { %v2751_v13 = vpop.f32.mrb[131].mxu1  ;;  %3345 = vmatmul.mubr.bf16.gmra.mrb[252].mxu0 %v6833_v55 }
 0x323   :  { %v6845_v18 = vmul.f32 %v3353_v31, %v2745_v35  ;;  %v3354_v48 = vadd.f32 %v6764_v63, %v2751_v13  ;;  %v6849_v45 = vmul.f32 %v6764_v63, %v2751_v13  ;;  %3707 = vmatpush1.bf16.xpose.msra.mxu0 %v6833_v55  ;;  %3708 = vmatprep.mubr.bf16.mxu0 %v6842_v56 }
 0x324   :  { %3014 = vmatmul.mubr.bf16.gmra.mrb[236].mxu1 %v6768_v12  ;;  %v6866_v12 = vrot.slane %v5492_v29, %v6827_v49 }
 0x325   :  { %v6854_v54 = vmul.f32 %v3354_v48, %v2749_v62  ;;  %3023 = vmatprep.mubr.bf16.mxu1 %v6780_v24  ;;  %v6857_v32 = vpop.f32.mrb[148].mxu0 }
 0x326   :  { %v3140_v38 = vpop.f32.mrb[149].mxu0 }
 0x327   :  { %v2755_v31 = vpop.f32.mrb[132].mxu1  ;;  %v6861_v16 = vpop.f32.mrb[150].mxu0  ;;  %v6875_v38 = vld [vmem:[%s7968_s5] sm:$0x1] }
 0x328   :  { %v2757_v13 = vpop.f32.mrb[133].mxu1  ;;  %v3143_v47 = vpop.f32.mrb[151].mxu0 }
 0x329   :  { %v3355_v62 = vadd.f32 %v6776_v33, %v2757_v13  ;;  %v6870_v48 = vmul.f32 %v6776_v33, %v2757_v13  ;;  %v2759_v24 = vpop.f32.mrb[134].mxu1 }
 0x32a   :  { %v2761_v15 = vpop.f32.mrb[135].mxu1  ;;  %3709 = vmatmul.mubr.bf16.vlgmr.msra.gmra.mrb[0].mxu0 %v6866_v12 }
 0x32b   :  { %v6878_v63 = vmul.f32 %v3355_v62, %v2755_v31  ;;  %v3356_v47 = vadd.f32 %v6778_v0, %v2761_v15  ;;  %v6882_v29 = vmul.f32 %v6778_v0, %v2761_v15  ;;  %5627 = vmatprep.mubr.bf16.mxu0 %v6875_v38 }
 0x32c   :  { %3024 = vmatmul.mubr.bf16.gmra.mrb[240].mxu1 %v6782_v11 }
 0x32d   :  { %v6886_v33 = vmul.f32 %v3356_v47, %v2759_v24  ;;  %3033 = vmatprep.mubr.bf16.mxu1 %v6794_v1  ;;  %v6889_v13 = vpop.f32.mrb[152].mxu0 }
 0x32e   :  { %v3148_v31 = vpop.f32.mrb[153].mxu0 }
 0x32f   :  { %v2765_v62 = vpop.f32.mrb[136].mxu1  ;;  %v6893_v49 = vpop.f32.mrb[154].mxu0 }
 0x330   :  { %v2767_v0 = vpop.f32.mrb[137].mxu1  ;;  %v3151_v14 = vpop.f32.mrb[155].mxu0 }
 0x331   :  { %v3357_v11 = vadd.f32 %v6790_v42, %v2767_v0  ;;  %v6899_v24 = vmul.f32 %v6790_v42, %v2767_v0  ;;  %v2769_v47 = vpop.f32.mrb[138].mxu1 }
 0x332   :  { %v2771_v1 = vpop.f32.mrb[139].mxu1 }
 0x333   :  { %v6901_v60 = vmul.f32 %v3357_v11, %v2765_v62  ;;  %v3358_v35 = vadd.f32 %v6792_v5, %v2771_v1  ;;  %v6905_v31 = vmul.f32 %v6792_v5, %v2771_v1 }
 0x334   :  { %3034 = vmatmul.mubr.bf16.gmra.mrb[244].mxu1 %v6796_v46 }
 0x335   :  { %v6908_v59 = vmul.f32 %v3358_v35, %v2769_v47  ;;  %3043 = vmatprep.mubr.bf16.mxu1 %v6808_v2  ;;  %v6911_v14 = vpop.f32.mrb[156].mxu0 }
 0x336   :  { %v3156_v0 = vpop.f32.mrb[157].mxu0 }
 0x337   :  { %v2775_v15 = vpop.f32.mrb[140].mxu1  ;;  %v6915_v11 = vpop.f32.mrb[158].mxu0 }
 0x338   :  { %v2777_v1 = vpop.f32.mrb[141].mxu1  ;;  %v3159_v5 = vpop.f32.mrb[159].mxu0 }
 0x339   :  { %v3359_v46 = vadd.f32 %v6804_v41, %v2777_v1  ;;  %v6921_v35 = vmul.f32 %v6804_v41, %v2777_v1  ;;  %v2779_v47 = vpop.f32.mrb[142].mxu1 }
 0x33a   :  { %v2781_v2 = vpop.f32.mrb[143].mxu1 }
 0x33b   :  { %v6923_v40 = vmul.f32 %v3359_v46, %v2775_v15  ;;  %v3360_v42 = vadd.f32 %v6806_v17, %v2781_v2  ;;  %v6927_v0 = vmul.f32 %v6806_v17, %v2781_v2 }
 0x33c   :  { %3044 = vmatmul.mubr.bf16.gmra.mrb[248].mxu1 %v6810_v10 }
 0x33d   :  { %v6930_v39 = vmul.f32 %v3360_v42, %v2779_v47  ;;  %3053 = vmatprep.mubr.bf16.mxu1 %v6831_v23  ;;  %v6935_v41 = vpop.f32.mrb[160].mxu0 }
 0x33e   :  { %v3164_v1 = vpop.f32.mrb[161].mxu0 }
 0x33f   :  { %v2785_v15 = vpop.f32.mrb[144].mxu1  ;;  %v6939_v62 = vpop.f32.mrb[162].mxu0 }
 0x340   :  { %v2787_v17 = vpop.f32.mrb[145].mxu1  ;;  %v3167_v2 = vpop.f32.mrb[163].mxu0 }
 0x341   :  { %v3361_v10 = vadd.f32 %v6824_v27, %v2787_v17  ;;  %v6943_v42 = vmul.f32 %v6824_v27, %v2787_v17  ;;  %v2789_v47 = vpop.f32.mrb[146].mxu1 }
 0x342   :  { %v2791_v5 = vpop.f32.mrb[147].mxu1 }
 0x343   :  { %v6945_v22 = vmul.f32 %v3361_v10, %v2785_v15  ;;  %v3362_v23 = vadd.f32 %v6829_v34, %v2791_v5  ;;  %v6949_v1 = vmul.f32 %v6829_v34, %v2791_v5 }
 0x344   :  { %3054 = vmatmul.mubr.bf16.gmra.mrb[252].mxu1 %v6833_v55 }
 0x345   :  { %v6952_v46 = vmul.f32 %v3362_v23, %v2789_v47  ;;  %v6956_v19 = vpop.f32.mrb[164].mxu0  ;;  %3667 = vmatprep.mubr.bf16.mxu1 %v6842_v56 }
 0x346   :  { %v3172_v27 = vpop.f32.mrb[165].mxu0 }
 0x347   :  { %v2795_v15 = vpop.f32.mrb[148].mxu1  ;;  %v6961_v17 = vpop.f32.mrb[166].mxu0 }
 0x348   :  { %v2797_v34 = vpop.f32.mrb[149].mxu1  ;;  %v3175_v5 = vpop.f32.mrb[167].mxu0 }
 0x349   :  { %v3363_v55 = vadd.f32 %v6857_v32, %v2797_v34  ;;  %v6965_v23 = vmul.f32 %v6857_v32, %v2797_v34  ;;  %v2799_v47 = vpop.f32.mrb[150].mxu1 }
 0x34a   :  { %v2801_v2 = vpop.f32.mrb[151].mxu1 }
 0x34b   :  { %v6967_v4 = vmul.f32 %v3363_v55, %v2795_v15  ;;  %v3364_v56 = vadd.f32 %v6861_v16, %v2801_v2  ;;  %v6971_v27 = vmul.f32 %v6861_v16, %v2801_v2 }
 0x34c   :  { %3668 = vmatmul.mubr.bf16.vlgmr.msra.gmra.mrb[0].mxu1 %v6866_v12 }
 0x34d   :  { %v6974_v10 = vmul.f32 %v3364_v56, %v2799_v47  ;;  %v6978_v3 = vpop.f32.mrb[168].mxu0  ;;  %5609 = vmatprep.mubr.bf16.mxu1 %v6875_v38 }
 0x34e   :  { %v3180_v32 = vpop.f32.mrb[169].mxu0 }
 0x34f   :  { %v2805_v15 = vpop.f32.mrb[152].mxu1  ;;  %v6983_v34 = vpop.f32.mrb[170].mxu0 }
 0x350   :  { %v2807_v16 = vpop.f32.mrb[153].mxu1  ;;  %v3183_v2 = vpop.f32.mrb[171].mxu0 }
 0x351   :  { %v3365_v12 = vadd.f32 %v6889_v13, %v2807_v16  ;;  %v6987_v47 = vmul.f32 %v6889_v13, %v2807_v16  ;;  %v2809_v56 = vpop.f32.mrb[154].mxu1 }
 0x352   :  { %v2811_v5 = vpop.f32.mrb[155].mxu1 }
 0x353   :  { %v6989_v53 = vmul.f32 %v3365_v12, %v2805_v15  ;;  %v3366_v52 = vadd.f32 %v6893_v49, %v2811_v5  ;;  %v6993_v32 = vmul.f32 %v6893_v49, %v2811_v5 }
 0x355   :  { %v6995_v55 = vmul.f32 %v3366_v52, %v2809_v56  ;;  %v6999_v2 = vpop.f32.mrb[172].mxu0 }
 0x356   :  { %v3188_v36 = vpop.f32.mrb[173].mxu0 }
 0x357   :  { %v2815_v16 = vpop.f32.mrb[156].mxu1  ;;  %v7003_v21 = vpop.f32.mrb[174].mxu0 }
 0x358   :  { %v2817_v15 = vpop.f32.mrb[157].mxu1  ;;  %v3191_v12 = vpop.f32.mrb[175].mxu0 }
 0x359   :  { %v3367_v20 = vadd.f32 %v6911_v14, %v2817_v15  ;;  %v7007_v49 = vmul.f32 %v6911_v14, %v2817_v15  ;;  %v2819_v52 = vpop.f32.mrb[158].mxu1 }
 0x35a   :  { %v2821_v5 = vpop.f32.mrb[159].mxu1 }
 0x35b   :  { %v7009_v56 = vmul.f32 %v3367_v20, %v2815_v16  ;;  %v3368_v37 = vadd.f32 %v6915_v11, %v2821_v5  ;;  %v7013_v36 = vmul.f32 %v6915_v11, %v2821_v5 }
 0x35d   :  { %v7015_v13 = vmul.f32 %v3368_v37, %v2819_v52  ;;  %v7019_v12 = vpop.f32.mrb[176].mxu0 }
 0x35e   :  { %v3196_v6 = vpop.f32.mrb[177].mxu0 }
 0x35f   :  { %v2825_v15 = vpop.f32.mrb[160].mxu1  ;;  %v7023_v58 = vpop.f32.mrb[178].mxu0 }
 0x360   :  { %v2827_v20 = vpop.f32.mrb[161].mxu1  ;;  %v3199_v16 = vpop.f32.mrb[179].mxu0 }
 0x361   :  { %v3369_v57 = vadd.f32 %v6935_v41, %v2827_v20  ;;  %v3529_v11 = vmul.f32 %v6935_v41, %v2827_v20  ;;  %v2829_v37 = vpop.f32.mrb[162].mxu1 }
 0x362   :  { %v2831_v52 = vpop.f32.mrb[163].mxu1 }
 0x363   :  { %v7027_v5 = vmul.f32 %v3369_v57, %v2825_v15  ;;  %v3370_v7 = vadd.f32 %v6939_v62, %v2831_v52  ;;  %v3530_v6 = vmul.f32 %v6939_v62, %v2831_v52  ;;  %v8102_v15 = vpack.c.bf16 %v6849_v45, %v6837_v61 }
 0x365   :  { %v7031_v44 = vmul.f32 %v3370_v7, %v2829_v37  ;;  %v3585_v14 = vpack.c.bf16 %v3530_v6, %v3529_v11  ;;  %v7033_v43 = vpop.f32.mrb[180].mxu0 }
 0x366   :  { %v3204_v26 = vpop.f32.mrb[181].mxu0 }
 0x367   :  { %v2835_v25 = vpop.f32.mrb[164].mxu1  ;;  %v7035_v16 = vpop.f32.mrb[182].mxu0  ;;  %5593 = vmatprep.subr.bf16.mxu1 %v3585_v14 }
 0x368   :  { %v2837_v20 = vpop.f32.mrb[165].mxu1  ;;  %v3207_v57 = vpop.f32.mrb[183].mxu0  ;;  %5594 = vmatpush3.bf16.xpose.msra.mxu1 %v8102_v15  ;;  %v8103_v15 = vpack.c.bf16 %v6882_v29, %v6870_v48 }
 0x369   :  { %v3371_v7 = vadd.f32 %v6956_v19, %v2837_v20  ;;  %v3531_v62 = vmul.f32 %v6956_v19, %v2837_v20  ;;  %v2839_v11 = vpop.f32.mrb[166].mxu1 }
 0x36a   :  { %v2841_v37 = vpop.f32.mrb[167].mxu1 }
 0x36b   :  { %v7044_v26 = vmul.f32 %v3371_v7, %v2835_v25  ;;  %v3372_v52 = vadd.f32 %v6961_v17, %v2841_v37  ;;  %v3532_v14 = vmul.f32 %v6961_v17, %v2841_v37 }
 0x36d   :  { %v7048_v6 = vmul.f32 %v3372_v52, %v2839_v11  ;;  %v3586_v41 = vpack.c.bf16 %v3532_v14, %v3531_v62  ;;  %v7050_v57 = vpop.f32.mrb[184].mxu0 }
 0x36e   :  { %v3212_v9 = vpop.f32.mrb[185].mxu0 }
 0x36f   :  { %v2845_v61 = vpop.f32.mrb[168].mxu1  ;;  %v7052_v45 = vpop.f32.mrb[186].mxu0  ;;  %5595 = vmatprep.subr.bf16.mxu1 %v3586_v41 }
 0x370   :  { %v2847_v20 = vpop.f32.mrb[169].mxu1  ;;  %v3215_v25 = vpop.f32.mrb[187].mxu0  ;;  %5596 = vmatpush3.bf16.xpose.msra.mxu1 %v8103_v15  ;;  %v8104_v15 = vpack.c.bf16 %v6905_v31, %v6899_v24 }
 0x371   :  { %v3373_v17 = vadd.f32 %v6978_v3, %v2847_v20  ;;  %v3533_v7 = vmul.f32 %v6978_v3, %v2847_v20  ;;  %v2849_v62 = vpop.f32.mrb[170].mxu1 }
 0x372   :  { %v2851_v11 = vpop.f32.mrb[171].mxu1 }
 0x373   :  { %v7061_v9 = vmul.f32 %v3373_v17, %v2845_v61  ;;  %v3374_v37 = vadd.f32 %v6983_v34, %v2851_v11  ;;  %v3534_v41 = vmul.f32 %v6983_v34, %v2851_v11 }
 0x375   :  { %v7065_v52 = vmul.f32 %v3374_v37, %v2849_v62  ;;  %v3587_v14 = vpack.c.bf16 %v3534_v41, %v3533_v7  ;;  %v7067_v25 = vpop.f32.mrb[188].mxu0 }
 0x376   :  { %v3220_v19 = vpop.f32.mrb[189].mxu0 }
 0x377   :  { %v2855_v48 = vpop.f32.mrb[172].mxu1  ;;  %v7069_v29 = vpop.f32.mrb[190].mxu0  ;;  %5597 = vmatprep.subr.bf16.mxu1 %v3587_v14 }
 0x378   :  { %v2857_v20 = vpop.f32.mrb[173].mxu1  ;;  %v3223_v61 = vpop.f32.mrb[191].mxu0  ;;  %5598 = vmatpush3.bf16.xpose.msra.mxu1 %v8104_v15  ;;  %v8105_v15 = vpack.c.bf16 %v6927_v0, %v6921_v35 }
 0x379   :  { %v3375_v34 = vadd.f32 %v6999_v2, %v2857_v20  ;;  %v3535_v17 = vmul.f32 %v6999_v2, %v2857_v20  ;;  %v2859_v7 = vpop.f32.mrb[174].mxu1 }
 0x37a   :  { %v2861_v62 = vpop.f32.mrb[175].mxu1 }
 0x37b   :  { %v7078_v19 = vmul.f32 %v3375_v34, %v2855_v48  ;;  %v3376_v11 = vadd.f32 %v7003_v21, %v2861_v62  ;;  %v3536_v37 = vmul.f32 %v7003_v21, %v2861_v62 }
 0x37d   :  { %v7082_v41 = vmul.f32 %v3376_v11, %v2859_v7  ;;  %v3588_v14 = vpack.c.bf16 %v3536_v37, %v3535_v17  ;;  %v7084_v61 = vpop.f32.mrb[192].mxu0 }
 0x37e   :  { %v3228_v3 = vpop.f32.mrb[193].mxu0 }
 0x37f   :  { %v2865_v24 = vpop.f32.mrb[176].mxu1  ;;  %v7086_v31 = vpop.f32.mrb[194].mxu0  ;;  %5599 = vmatprep.subr.bf16.mxu1 %v3588_v14 }
 0x380   :  { %v2867_v20 = vpop.f32.mrb[177].mxu1  ;;  %v3231_v48 = vpop.f32.mrb[195].mxu0  ;;  %5600 = vmatpush3.bf16.xpose.msra.mxu1 %v8105_v15  ;;  %v8106_v15 = vpack.c.bf16 %v6949_v1, %v6943_v42 }
 0x381   :  { %v3377_v21 = vadd.f32 %v7019_v12, %v2867_v20  ;;  %v3537_v34 = vmul.f32 %v7019_v12, %v2867_v20  ;;  %v2869_v17 = vpop.f32.mrb[178].mxu1 }
 0x382   :  { %v2871_v7 = vpop.f32.mrb[179].mxu1 }
 0x383   :  { %v7095_v3 = vmul.f32 %v3377_v21, %v2865_v24  ;;  %v3378_v62 = vadd.f32 %v7023_v58, %v2871_v7  ;;  %v3538_v11 = vmul.f32 %v7023_v58, %v2871_v7 }
 0x385   :  { %v7099_v37 = vmul.f32 %v3378_v62, %v2869_v17  ;;  %v3589_v14 = vpack.c.bf16 %v3538_v11, %v3537_v34  ;;  %v7101_v48 = vpop.f32.mrb[196].mxu0 }
 0x386   :  { %v3236_v2 = vpop.f32.mrb[197].mxu0 }
 0x387   :  { %v2875_v35 = vpop.f32.mrb[180].mxu1  ;;  %v7103_v0 = vpop.f32.mrb[198].mxu0  ;;  %5601 = vmatprep.subr.bf16.mxu1 %v3589_v14 }
 0x388   :  { %v2877_v20 = vpop.f32.mrb[181].mxu1  ;;  %v3239_v24 = vpop.f32.mrb[199].mxu0  ;;  %5602 = vmatpush3.bf16.xpose.msra.mxu1 %v8106_v15  ;;  %v8107_v15 = vpack.c.bf16 %v6971_v27, %v6965_v23 }
 0x389   :  { %v3379_v58 = vadd.f32 %v7033_v43, %v2877_v20  ;;  %v3539_v21 = vmul.f32 %v7033_v43, %v2877_v20  ;;  %v2879_v34 = vpop.f32.mrb[182].mxu1 }
 0x38a   :  { %v2881_v17 = vpop.f32.mrb[183].mxu1 }
 0x38b   :  { %v7112_v2 = vmul.f32 %v3379_v58, %v2875_v35  ;;  %v3380_v7 = vadd.f32 %v7035_v16, %v2881_v17  ;;  %v3540_v62 = vmul.f32 %v7035_v16, %v2881_v17 }
 0x38d   :  { %v7116_v11 = vmul.f32 %v3380_v7, %v2879_v34  ;;  %v3590_v14 = vpack.c.bf16 %v3540_v62, %v3539_v21  ;;  %v7118_v24 = vpop.f32.mrb[200].mxu0 }
 0x38e   :  { %v3244_v12 = vpop.f32.mrb[201].mxu0 }
 0x38f   :  { %v2885_v42 = vpop.f32.mrb[184].mxu1  ;;  %v7120_v1 = vpop.f32.mrb[202].mxu0  ;;  %5603 = vmatprep.subr.bf16.mxu1 %v3590_v14 }
 0x390   :  { %v2887_v20 = vpop.f32.mrb[185].mxu1  ;;  %v3247_v35 = vpop.f32.mrb[203].mxu0  ;;  %5604 = vmatpush3.bf16.xpose.msra.mxu1 %v8107_v15  ;;  %v8108_v15 = vpack.c.bf16 %v6993_v32, %v6987_v47 }
 0x391   :  { %v3381_v16 = vadd.f32 %v7050_v57, %v2887_v20  ;;  %v3541_v58 = vmul.f32 %v7050_v57, %v2887_v20  ;;  %v2889_v21 = vpop.f32.mrb[186].mxu1 }
 0x392   :  { %v2891_v34 = vpop.f32.mrb[187].mxu1 }
 0x393   :  { %v7129_v12 = vmul.f32 %v3381_v16, %v2885_v42  ;;  %v3382_v17 = vadd.f32 %v7052_v45, %v2891_v34  ;;  %v3542_v7 = vmul.f32 %v7052_v45, %v2891_v34 }
 0x395   :  { %v7133_v62 = vmul.f32 %v3382_v17, %v2889_v21  ;;  %v3591_v14 = vpack.c.bf16 %v3542_v7, %v3541_v58  ;;  %v7135_v35 = vpop.f32.mrb[204].mxu0 }
 0x396   :  { %v3252_v43 = vpop.f32.mrb[205].mxu0 }
 0x397   :  { %v2895_v23 = vpop.f32.mrb[188].mxu1  ;;  %v7137_v27 = vpop.f32.mrb[206].mxu0  ;;  %5605 = vmatprep.subr.bf16.mxu1 %v3591_v14 }
 0x398   :  { %v2897_v20 = vpop.f32.mrb[189].mxu1  ;;  %v3255_v42 = vpop.f32.mrb[207].mxu0  ;;  %5606 = vmatpush3.bf16.xpose.msra.mxu1 %v8108_v15  ;;  %v8109_v15 = vpack.c.bf16 %v7013_v36, %v7007_v49 }
 0x399   :  { %v3383_v45 = vadd.f32 %v7067_v25, %v2897_v20  ;;  %v3543_v16 = vmul.f32 %v7067_v25, %v2897_v20  ;;  %v2899_v58 = vpop.f32.mrb[190].mxu1 }
 0x39a   :  { %v2901_v21 = vpop.f32.mrb[191].mxu1 }
 0x39b   :  { %v7146_v43 = vmul.f32 %v3383_v45, %v2895_v23  ;;  %v3384_v34 = vadd.f32 %v7069_v29, %v2901_v21  ;;  %v3544_v17 = vmul.f32 %v7069_v29, %v2901_v21 }
 0x39d   :  { %v7150_v7 = vmul.f32 %v3384_v34, %v2899_v58  ;;  %v3592_v14 = vpack.c.bf16 %v3544_v17, %v3543_v16  ;;  %v7152_v42 = vpop.f32.mrb[208].mxu0 }
 0x39e   :  { %v3260_v57 = vpop.f32.mrb[209].mxu0 }
 0x39f   :  { %v2905_v47 = vpop.f32.mrb[192].mxu1  ;;  %v7154_v32 = vpop.f32.mrb[210].mxu0  ;;  %5607 = vmatprep.subr.bf16.mxu1 %v3592_v14  ;;  %v8110_v57 = vpack.c.bf16 %v7031_v44, %v7027_v5 }
 0x3a0   :  { %v2907_v20 = vpop.f32.mrb[193].mxu1  ;;  %v3263_v23 = vpop.f32.mrb[211].mxu0  ;;  %5608 = vmatpush3.bf16.xpose.msra.mxu1 %v8109_v15 }
 0x3a1   :  { %v3385_v29 = vadd.f32 %v7084_v61, %v2907_v20  ;;  %v7163_v45 = vmul.f32 %v7084_v61, %v2907_v20  ;;  %v2909_v16 = vpop.f32.mrb[194].mxu1  ;;  %5629 = vmatprep.subr.bf16.mxu1 %v8110_v57  ;;  %v8112_v57 = vpack.c.bf16 %v7048_v6, %v7044_v26 }
 0x3a2   :  { %v2911_v58 = vpop.f32.mrb[195].mxu1 }
 0x3a3   :  { %v7168_v21 = vmul.f32 %v3385_v29, %v2905_v47  ;;  %v3386_v34 = vadd.f32 %v7086_v31, %v2911_v58  ;;  %v7172_v17 = vmul.f32 %v7086_v31, %v2911_v58  ;;  %v8111_v31 = vpack.c.bf16 %v6854_v54, %v6845_v18 }
 0x3a5   :  { %v7174_v49 = vmul.f32 %v3386_v34, %v2909_v16  ;;  %v7178_v61 = vpop.f32.mrb[212].mxu0 }
 0x3a6   :  { %v3268_v14 = vpop.f32.mrb[213].mxu0 }
 0x3a7   :  { %v2915_v5 = vpop.f32.mrb[196].mxu1  ;;  %v7182_v20 = vpop.f32.mrb[214].mxu0  ;;  %5610 = vmatmul.mubr.bf16.vlgmr.msra.gmra.mrb[4].mxu1 %v6875_v38 }
 0x3a8   :  { %v2917_v47 = vpop.f32.mrb[197].mxu1  ;;  %v3271_v23 = vpop.f32.mrb[215].mxu0  ;;  %5630 = vmatpush3.bf16.xpose.msra.mxu1 %v8111_v31  ;;  %5645 = vmatprep.mubr.bf16.mxu1 %v6875_v38 }
 0x3a9   :  { %v3387_v15 = vadd.f32 %v7101_v48, %v2917_v47  ;;  %v7191_v29 = vmul.f32 %v7101_v48, %v2917_v47  ;;  %v2919_v16 = vpop.f32.mrb[198].mxu1  ;;  %5631 = vmatprep.subr.bf16.mxu1 %v8112_v57 }
 0x3aa   :  { %v2921_v58 = vpop.f32.mrb[199].mxu1 }
 0x3ab   :  { %v7196_v34 = vmul.f32 %v3387_v15, %v2915_v5  ;;  %v3388_v14 = vadd.f32 %v7103_v0, %v2921_v58  ;;  %v7200_v18 = vmul.f32 %v7103_v0, %v2921_v58  ;;  %v8113_v0 = vpack.c.bf16 %v6886_v33, %v6878_v63 }
 0x3ad   :  { %v7202_v54 = vmul.f32 %v3388_v14, %v2919_v16  ;;  %v7206_v48 = vpop.f32.mrb[216].mxu0  ;;  %v8114_v14 = vpack.c.bf16 %v7065_v52, %v7061_v9 }
 0x3ae   :  { %v3276_v47 = vpop.f32.mrb[217].mxu0 }
 0x3af   :  { %v2925_v6 = vpop.f32.mrb[200].mxu1  ;;  %v7210_v31 = vpop.f32.mrb[218].mxu0 }
 0x3b0   :  { %v2927_v5 = vpop.f32.mrb[201].mxu1  ;;  %v3279_v15 = vpop.f32.mrb[219].mxu0  ;;  %5632 = vmatpush3.bf16.xpose.msra.mxu1 %v8113_v0 }
 0x3b1   :  { %v3389_v16 = vadd.f32 %v7118_v24, %v2927_v5  ;;  %v7217_v57 = vmul.f32 %v7118_v24, %v2927_v5  ;;  %v2929_v58 = vpop.f32.mrb[202].mxu1  ;;  %5633 = vmatprep.subr.bf16.mxu1 %v8114_v14 }
 0x3b2   :  { %v2931_v47 = vpop.f32.mrb[203].mxu1 }
 0x3b3   :  { %v7222_v26 = vmul.f32 %v3389_v16, %v2925_v6  ;;  %v3390_v44 = vadd.f32 %v7120_v1, %v2931_v47  ;;  %v7226_v15 = vmul.f32 %v7120_v1, %v2931_v47  ;;  %v8115_v1 = vpack.c.bf16 %v6908_v59, %v6901_v60 }
 0x3b4   :  { %v8116_v47 = vpack.c.bf16 %v7082_v41, %v7078_v19 }
 0x3b5   :  { %v7228_v63 = vmul.f32 %v3390_v44, %v2929_v58  ;;  %v7232_v24 = vpop.f32.mrb[220].mxu0 }
 0x3b6   :  { %v3284_v5 = vpop.f32.mrb[221].mxu0 }
 0x3b7   :  { %v2935_v52 = vpop.f32.mrb[204].mxu1  ;;  %v7236_v0 = vpop.f32.mrb[222].mxu0  ;;  %v3800_v5 = vld [vmem:[%s7974_s11] sm:$0x1] }
 0x3b8   :  { %v2937_v6 = vpop.f32.mrb[205].mxu1  ;;  %v3287_v16 = vpop.f32.mrb[223].mxu0  ;;  %5634 = vmatpush3.bf16.xpose.msra.mxu1 %v8115_v1  ;;  %v8119_v1 = vpack.c.bf16 %v7099_v37, %v7095_v3 }
 0x3b9   :  { %v3391_v44 = vadd.f32 %v7135_v35, %v2937_v6  ;;  %v7243_v58 = vmul.f32 %v7135_v35, %v2937_v6  ;;  %v2939_v14 = vpop.f32.mrb[206].mxu1  ;;  %5635 = vmatprep.subr.bf16.mxu1 %v8116_v47  ;;  %v6261_v16 = vmov 1  }
 0x3ba   :  { %v2941_v9 = vpop.f32.mrb[207].mxu1  ;;  %5847 = vset.pattern.permute.xlu0 %v6261_v16 }
 0x3bb   :  { %v7251_v33 = vmul.f32 %v3391_v44, %v2935_v52  ;;  %v3392_v59 = vadd.f32 %v7137_v27, %v2941_v9  ;;  %v7255_v60 = vmul.f32 %v7137_v27, %v2941_v9  ;;  %4910 = vperm.xlu0 %5847, %v3800_v5   ;;  %v8117_v44 = vmov 0  }
 0x3bc   :  { %v8118_v9 = vpack.c.bf16 %v6930_v39, %v6923_v40 }
 0x3bd   :  { %v7257_v35 = vmul.f32 %v3392_v59, %v2939_v14  ;;  %v7261_v41 = vpop.f32.mrb[224].mxu0 }
 0x3be   :  { %v3292_v6 = vpop.f32.mrb[225].mxu0 }
 0x3bf   :  { %v2945_v47 = vpop.f32.mrb[208].mxu1  ;;  %v7265_v52 = vpop.f32.mrb[226].mxu0  ;;  %5848 = vset.pattern.permute.xlu0 %v8117_v44 }
 0x3c0   :  { %v2947_v23 = vpop.f32.mrb[209].mxu1  ;;  %v3295_v27 = vpop.f32.mrb[227].mxu0  ;;  %5636 = vmatpush3.bf16.xpose.msra.mxu1 %v8118_v9  ;;  %3921 = vperm.xlu0 %5848, %v3800_v5  }
 0x3c1   :  { %v3393_v14 = vadd.f32 %v7152_v42, %v2947_v23  ;;  %v7273_v59 = vmul.f32 %v7152_v42, %v2947_v23  ;;  %v2949_v6 = vpop.f32.mrb[210].mxu1  ;;  %5637 = vmatprep.subr.bf16.mxu1 %v8119_v1 }
 0x3c2   :  { %v2951_v19 = vpop.f32.mrb[211].mxu1 }
 0x3c3   :  { %v7278_v36 = vmul.f32 %v3393_v14, %v2945_v47  ;;  %v3394_v27 = vadd.f32 %v7154_v32, %v2951_v19  ;;  %v7282_v25 = vmul.f32 %v7154_v32, %v2951_v19  ;;  %v8120_v32 = vpack.c.bf16 %v6952_v46, %v6945_v22 }
 0x3c4   :  { %5849 = vset.pattern.permute.xlu0 %v6261_v16  ;;  %v8121_v14 = vpack.c.bf16 %v7116_v11, %v7112_v2 }
 0x3c5   :  { %v7284_v39 = vmul.f32 %v3394_v27, %v2949_v6  ;;  %v3597_v40 = vpack.c.bf16 %v7282_v25, %v7273_v59  ;;  %v7288_v42 = vpop.f32.mrb[228].mxu0  ;;  %v5942_v59 = vld [vmem:[%s7969_s6 + $0x50] sm:$0xff]  }
 0x3c6   :  { %v3300_v23 = vpop.f32.mrb[229].mxu0 }
 0x3c7   :  { %v2955_v37 = vpop.f32.mrb[212].mxu1  ;;  %v7292_v5 = vpop.f32.mrb[230].mxu0 }
 0x3c8   :  { %v2957_v1 = vpop.f32.mrb[213].mxu1  ;;  %v3303_v47 = vpop.f32.mrb[231].mxu0  ;;  %5638 = vmatpush3.bf16.xpose.msra.mxu1 %v8120_v32 }
 0x3c9   :  { %v3395_v16 = vadd.f32 %v7178_v61, %v2957_v1  ;;  %v7299_v19 = vmul.f32 %v7178_v61, %v2957_v1  ;;  %v2959_v9 = vpop.f32.mrb[214].mxu1  ;;  %5639 = vmatprep.subr.bf16.mxu1 %v8121_v14 }
 0x3ca   :  { %v2961_v6 = vpop.f32.mrb[215].mxu1 }
 0x3cb   :  { %v7304_v27 = vmul.f32 %v3395_v16, %v2955_v37  ;;  %v3396_v23 = vadd.f32 %v7182_v20, %v2961_v6  ;;  %v7308_v47 = vmul.f32 %v7182_v20, %v2961_v6  ;;  %v8122_v20 = vpack.c.bf16 %v6974_v10, %v6967_v4 }
 0x3cd   :  { %v7310_v22 = vmul.f32 %v3396_v23, %v2959_v9  ;;  %v7314_v61 = vpop.f32.mrb[232].mxu0  ;;  %v8123_v23 = vpack.c.bf16 %v7133_v62, %v7129_v12 }
 0x3ce   :  { %v3308_v1 = vpop.f32.mrb[233].mxu0 }
 0x3cf   :  { %v2965_v11 = vpop.f32.mrb[216].mxu1  ;;  %v7318_v32 = vpop.f32.mrb[234].mxu0 }
 0x3d0   :  { %v2967_v37 = vpop.f32.mrb[217].mxu1  ;;  %v3311_v16 = vpop.f32.mrb[235].mxu0  ;;  %5640 = vmatpush3.bf16.xpose.msra.mxu1 %v8122_v20 }
 0x3d1   :  { %v3397_v9 = vadd.f32 %v7206_v48, %v2967_v37  ;;  %v7325_v14 = vmul.f32 %v7206_v48, %v2967_v37  ;;  %v2969_v6 = vpop.f32.mrb[218].mxu1  ;;  %5641 = vmatprep.subr.bf16.mxu1 %v8123_v23 }
 0x3d2   :  { %v2971_v1 = vpop.f32.mrb[219].mxu1 }
 0x3d3   :  { %v7330_v2 = vmul.f32 %v3397_v9, %v2965_v11  ;;  %v3398_v3 = vadd.f32 %v7210_v31, %v2971_v1  ;;  %v7334_v16 = vmul.f32 %v7210_v31, %v2971_v1  ;;  %v8124_v31 = vpack.c.bf16 %v6995_v55, %v6989_v53 }
 0x3d4   :  { %v8125_v1 = vpack.c.bf16 %v7150_v7, %v7146_v43 }
 0x3d5   :  { %v7336_v4 = vmul.f32 %v3398_v3, %v2969_v6  ;;  %v7340_v48 = vpop.f32.mrb[236].mxu0 }
 0x3d6   :  { %v3316_v37 = vpop.f32.mrb[237].mxu0 }
 0x3d7   :  { %v2975_v62 = vpop.f32.mrb[220].mxu1  ;;  %v7344_v20 = vpop.f32.mrb[238].mxu0 }
 0x3d8   :  { %v2977_v11 = vpop.f32.mrb[221].mxu1  ;;  %v3319_v9 = vpop.f32.mrb[239].mxu0  ;;  %5642 = vmatpush3.bf16.xpose.msra.mxu1 %v8124_v31 }
 0x3d9   :  { %v3399_v3 = vadd.f32 %v7232_v24, %v2977_v11  ;;  %v7351_v6 = vmul.f32 %v7232_v24, %v2977_v11  ;;  %v2979_v23 = vpop.f32.mrb[222].mxu1  ;;  %5643 = vmatprep.subr.bf16.mxu1 %v8125_v1 }
 0x3da   :  { %v2981_v37 = vpop.f32.mrb[223].mxu1 }
 0x3db   :  { %v7356_v12 = vmul.f32 %v3399_v3, %v2975_v62  ;;  %v3400_v10 = vadd.f32 %v7236_v0, %v2981_v37  ;;  %v7360_v9 = vmul.f32 %v7236_v0, %v2981_v37  ;;  %v8126_v0 = vpack.c.bf16 %v7015_v13, %v7009_v56 }
 0x3dd   :  { %v7362_v53 = vmul.f32 %v3400_v10, %v2979_v23  ;;  %v7366_v24 = vpop.f32.mrb[240].mxu0 }
 0x3de   :  { %v3324_v11 = vpop.f32.mrb[241].mxu0 }
 0x3df   :  { %v2985_v7 = vpop.f32.mrb[224].mxu1  ;;  %v7370_v31 = vpop.f32.mrb[242].mxu0 }
 0x3e0   :  { %v2987_v62 = vpop.f32.mrb[225].mxu1  ;;  %v3327_v3 = vpop.f32.mrb[243].mxu0  ;;  %5644 = vmatpush3.bf16.xpose.msra.mxu1 %v8126_v0 }
 0x3e1   :  { %v3401_v10 = vadd.f32 %v7261_v41, %v2987_v62  ;;  %v3561_v23 = vmul.f32 %v7261_v41, %v2987_v62  ;;  %v2989_v1 = vpop.f32.mrb[226].mxu1  ;;  %4067 = vmatprep.subr.bf16.mxu1 %v8117_v44  ;;  %v5932_v3 = vld [vmem:[%s7969_s6] sm:$0xff]  }
 0x3e2   :  { %v2991_v37 = vpop.f32.mrb[227].mxu1 }
 0x3e3   :  { %v7378_v11 = vmul.f32 %v3401_v10, %v2985_v7  ;;  %v3402_v43 = vadd.f32 %v7265_v52, %v2991_v37  ;;  %v3562_v55 = vmul.f32 %v7265_v52, %v2991_v37  ;;  %v8127_v37 = vpack.c.bf16 %v7172_v17, %v7163_v45 }
 0x3e5   :  { %v7385_v13 = vmul.f32 %v3402_v43, %v2989_v1  ;;  %v3601_v56 = vpack.c.bf16 %v3562_v55, %v3561_v23  ;;  %v7387_v0 = vpop.f32.mrb[244].mxu0  ;;  %v5933_v55 = vld [vmem:[%s7969_s6 + $0x8] sm:$0xff]  }
 0x3e6   :  { %v3332_v41 = vpop.f32.mrb[245].mxu0 }
 0x3e7   :  { %v2995_v62 = vpop.f32.mrb[228].mxu1  ;;  %v7389_v46 = vpop.f32.mrb[246].mxu0  ;;  %5611 = vmatprep.subr.bf16.mxu0 %v3601_v56  ;;  %5646 = vmatmul.mubr.bf16.vlgmr.msra.gmra.mrb[8].mxu1 %v6875_v38  ;;  %v3505_v7 = vpack.c.bf16 %v7385_v13, %v7378_v11  ;;  %v8148_v11 = vld [vmem:[#allocation19_spill] sm:$0xff]  ;;  %v8151_v13 = vld [vmem:[#allocation21_spill] sm:$0xff] }
 0x3e8   :  { %v2997_v52 = vpop.f32.mrb[229].mxu1  ;;  %v3335_v10 = vpop.f32.mrb[247].mxu0  ;;  %5612 = vmatpush3.bf16.xpose.msra.mxu0 %v8127_v37  ;;  %4068 = vmatpush1.bf16.msra.mxu1 %v5932_v3  ;;  %v5934_v3 = vld [vmem:[%s7969_s6 + $0x10] sm:$0xff]  }
 0x3e9   :  { %v3403_v43 = vadd.f32 %v7288_v42, %v2997_v52  ;;  %v3563_v23 = vmul.f32 %v7288_v42, %v2997_v52  ;;  %4099 = vmatprep.mubr.bf16.mxu1 %v6494_v30  ;;  %v2999_v38 = vpop.f32.mrb[230].mxu1  ;;  %4069 = vmatprep.subr.bf16.mxu1 %v8117_v44 }
 0x3ea   :  { %v3001_v1 = vpop.f32.mrb[231].mxu1 }
 0x3eb   :  { %v7404_v56 = vmul.f32 %v3403_v43, %v2995_v62  ;;  %v3404_v45 = vadd.f32 %v7292_v5, %v3001_v1  ;;  %v3564_v17 = vmul.f32 %v7292_v5, %v3001_v1  ;;  %v8128_v43 = vpack.c.bf16 %v7200_v18, %v7191_v29  ;;  %v5936_v18 = vld [vmem:[%s7969_s6 + $0x20] sm:$0xff]  }
 0x3ec   :  { %4070 = vmatpush1.bf16.msra.mxu1 %v5933_v55 }
 0x3ed   :  { %v7411_v41 = vmul.f32 %v3404_v45, %v2999_v38  ;;  %v3602_v42 = vpack.c.bf16 %v3564_v17, %v3563_v23  ;;  %v7413_v52 = vpop.f32.mrb[248].mxu0  ;;  %4071 = vmatprep.subr.bf16.mxu1 %v8117_v44  ;;  %v5935_v23 = vld [vmem:[%s7969_s6 + $0x18] sm:$0xff]  }
 0x3ee   :  { %v3340_v30 = vpop.f32.mrb[249].mxu0 }
 0x3ef   :  { %v3005_v10 = vpop.f32.mrb[232].mxu1  ;;  %v7416_v62 = vpop.f32.mrb[250].mxu0  ;;  %5613 = vmatprep.subr.bf16.mxu0 %v3602_v42  ;;  %v3506_v5 = vpack.c.bf16 %v7411_v41, %v7404_v56  ;;  %v8155_v56 = vld [vmem:[#allocation24_spill] sm:$0xff]  ;;  %v8156_v41 = vld [vmem:[#allocation25_spill] sm:$0xff] }
 0x3f0   :  { %v3007_v37 = vpop.f32.mrb[233].mxu1  ;;  %v3343_v55 = vpop.f32.mrb[251].mxu0  ;;  %5614 = vmatpush3.bf16.xpose.msra.mxu0 %v8128_v43  ;;  %4072 = vmatpush1.bf16.msra.mxu1 %v5934_v3 }
 0x3f1   :  { %v3405_v38 = vadd.f32 %v7314_v61, %v3007_v37  ;;  %v3565_v1 = vmul.f32 %v7314_v61, %v3007_v37  ;;  %v3009_v45 = vpop.f32.mrb[234].mxu1  ;;  %4073 = vmatprep.subr.bf16.mxu1 %v8117_v44 }
 0x3f2   :  { %v3011_v17 = vpop.f32.mrb[235].mxu1 }
 0x3f3   :  { %v7429_v42 = vmul.f32 %v3405_v38, %v3005_v10  ;;  %v3406_v30 = vadd.f32 %v7318_v32, %v3011_v17  ;;  %v3566_v29 = vmul.f32 %v7318_v32, %v3011_v17  ;;  %v8129_v17 = vpack.c.bf16 %v7226_v15, %v7217_v57  ;;  %v5938_v15 = vld [vmem:[%s7969_s6 + $0x30] sm:$0xff]  }
 0x3f4   :  { %4074 = vmatpush1.bf16.msra.mxu1 %v5935_v23 }
 0x3f5   :  { %v7436_v3 = vmul.f32 %v3406_v30, %v3009_v45  ;;  %v3603_v55 = vpack.c.bf16 %v3566_v29, %v3565_v1  ;;  %v7438_v43 = vpop.f32.mrb[252].mxu0  ;;  %4075 = vmatprep.subr.bf16.mxu1 %v8117_v44  ;;  %v5937_v1 = vld [vmem:[%s7969_s6 + $0x28] sm:$0xff]  }
 0x3f6   :  { %v3348_v61 = vpop.f32.mrb[253].mxu0 }
 0x3f7   :  { %v3015_v37 = vpop.f32.mrb[236].mxu1  ;;  %v7441_v10 = vpop.f32.mrb[254].mxu0  ;;  %5615 = vmatprep.subr.bf16.mxu0 %v3603_v55  ;;  %v3507_v32 = vpack.c.bf16 %v7436_v3, %v7429_v42  ;;  %v8158_v42 = vld [vmem:[#allocation27_spill] sm:$0xff]  ;;  %v8159_v3 = vld [vmem:[#allocation28_spill] sm:$0xff] }
 0x3f8   :  { %v3017_v23 = vpop.f32.mrb[237].mxu1  ;;  %v3351_v38 = vpop.f32.mrb[255].mxu0  ;;  %5616 = vmatpush3.bf16.xpose.msra.mxu0 %v8129_v17  ;;  %4076 = vmatpush1.bf16.msra.mxu1 %v5936_v18 }
 0x3f9   :  { %v3407_v45 = vadd.f32 %v7340_v48, %v3017_v23  ;;  %v3567_v30 = vmul.f32 %v7340_v48, %v3017_v23  ;;  %v3019_v29 = vpop.f32.mrb[238].mxu1  ;;  %4077 = vmatprep.subr.bf16.mxu1 %v8117_v44 }
 0x3fa   :  { %v3021_v55 = vpop.f32.mrb[239].mxu1 }
 0x3fb   :  { %v7454_v61 = vmul.f32 %v3407_v45, %v3015_v37  ;;  %v3408_v38 = vadd.f32 %v7344_v20, %v3021_v55  ;;  %v3568_v57 = vmul.f32 %v7344_v20, %v3021_v55  ;;  %v8130_v45 = vpack.c.bf16 %v7255_v60, %v7243_v58  ;;  %v5939_v20 = vld [vmem:[%s7969_s6 + $0x38] sm:$0xff]   ;;  %v5940_v60 = vld [vmem:[%s7969_s6 + $0x40] sm:$0xff]  }
 0x3fc   :  { %4078 = vmatpush1.bf16.msra.mxu1 %v5937_v1 }
 0x3fd   :  { %v7461_v18 = vmul.f32 %v3408_v38, %v3019_v29  ;;  %v3604_v17 = vpack.c.bf16 %v3568_v57, %v3567_v30  ;;  %4079 = vmatprep.subr.bf16.mxu1 %v8117_v44 }
 0x3ff   :  { %v3025_v48 = vpop.f32.mrb[240].mxu1  ;;  %5617 = vmatprep.subr.bf16.mxu0 %v3604_v17  ;;  %v3508_v37 = vpack.c.bf16 %v7461_v18, %v7454_v61  ;;  %v5952_v61 = vld [vmem:[%s7971_s8 + $0x20] sm:$0xff]  }
 0x400   :  { %v3027_v23 = vpop.f32.mrb[241].mxu1  ;;  %5618 = vmatpush3.bf16.xpose.msra.mxu0 %v8130_v45  ;;  %4080 = vmatpush1.bf16.msra.mxu1 %v5938_v15 }
 0x401   :  { %v3409_v1 = vadd.f32 %v7366_v24, %v3027_v23  ;;  %v3569_v30 = vmul.f32 %v7366_v24, %v3027_v23  ;;  %v3029_v29 = vpop.f32.mrb[242].mxu1  ;;  %4081 = vmatprep.subr.bf16.mxu1 %v8117_v44 }
 0x402   :  { %v3031_v55 = vpop.f32.mrb[243].mxu1 }
 0x403   :  { %v7475_v38 = vmul.f32 %v3409_v1, %v3025_v48  ;;  %v3410_v57 = vadd.f32 %v7370_v31, %v3031_v55  ;;  %v3570_v58 = vmul.f32 %v7370_v31, %v3031_v55  ;;  %v5941_v31 = vld [vmem:[%s7969_s6 + $0x48] sm:$0xff]  }
 0x404   :  { %4082 = vmatpush1.bf16.msra.mxu1 %v5939_v20 }
 0x405   :  { %v7482_v15 = vmul.f32 %v3410_v57, %v3029_v29  ;;  %v3605_v17 = vpack.c.bf16 %v3570_v58, %v3569_v30  ;;  %4083 = vmatprep.subr.bf16.mxu1 %v8117_v44 }
 0x407   :  { %v3035_v24 = vpop.f32.mrb[244].mxu1  ;;  %5619 = vmatprep.subr.bf16.mxu0 %v3605_v17  ;;  %v3509_v48 = vpack.c.bf16 %v7482_v15, %v7475_v38  ;;  %v8131_v17 = vpack.c.bf16 %v7308_v47, %v7299_v19  ;;  %v5944_v47 = vld [vmem:[%s7969_s6 + $0x60] sm:$0xff]  }
 0x408   :  { %v3037_v23 = vpop.f32.mrb[245].mxu1  ;;  %5620 = vmatpush3.bf16.xpose.msra.mxu0 %v3597_v40  ;;  %4084 = vmatpush1.bf16.msra.mxu1 %v5940_v60 }
 0x409   :  { %v3411_v45 = vadd.f32 %v7387_v0, %v3037_v23  ;;  %v3571_v20 = vmul.f32 %v7387_v0, %v3037_v23  ;;  %v3039_v1 = vpop.f32.mrb[246].mxu1  ;;  %4085 = vmatprep.subr.bf16.mxu1 %v8117_v44 }
 0x40a   :  { %v3041_v30 = vpop.f32.mrb[247].mxu1 }
 0x40b   :  { %v7496_v29 = vmul.f32 %v3411_v45, %v3035_v24  ;;  %v3412_v55 = vadd.f32 %v7389_v46, %v3041_v30  ;;  %v3572_v25 = vmul.f32 %v7389_v46, %v3041_v30  ;;  %v5943_v46 = vld [vmem:[%s7969_s6 + $0x58] sm:$0xff]  }
 0x40c   :  { %4086 = vmatpush1.bf16.msra.mxu1 %v5941_v31 }
 0x40d   :  { %v7503_v40 = vmul.f32 %v3412_v55, %v3039_v1  ;;  %v3606_v57 = vpack.c.bf16 %v3572_v25, %v3571_v20  ;;  %4087 = vmatprep.subr.bf16.mxu1 %v8117_v44 }
 0x40f   :  { %v3045_v0 = vpop.f32.mrb[248].mxu1  ;;  %5621 = vmatprep.subr.bf16.mxu0 %v3606_v57  ;;  %v3510_v58 = vpack.c.bf16 %v7503_v40, %v7496_v29  ;;  %v8132_v57 = vpack.c.bf16 %v7334_v16, %v7325_v14  ;;  %v5946_v14 = vld [vmem:[%s7969_s6 + $0x70] sm:$0xff]   ;;  %v5953_v29 = vld [vmem:[%s7971_s8 + $0x28] sm:$0xff]  }
 0x410   :  { %v3047_v60 = vpop.f32.mrb[249].mxu1  ;;  %5622 = vmatpush3.bf16.xpose.msra.mxu0 %v8131_v17  ;;  %4088 = vmatpush1.bf16.msra.mxu1 %v5942_v59  ;;  %v8160_v40 = vld [vmem:[#allocation29_spill] sm:$0xff] }
 0x411   :  { %v3413_v24 = vadd.f32 %v7413_v52, %v3047_v60  ;;  %v3573_v23 = vmul.f32 %v7413_v52, %v3047_v60  ;;  %v3049_v31 = vpop.f32.mrb[250].mxu1  ;;  %4089 = vmatprep.subr.bf16.mxu1 %v8117_v44 }
 0x412   :  { %v3051_v45 = vpop.f32.mrb[251].mxu1 }
 0x413   :  { %v7517_v20 = vmul.f32 %v3413_v24, %v3045_v0  ;;  %v3414_v1 = vadd.f32 %v7416_v62, %v3051_v45  ;;  %v3574_v19 = vmul.f32 %v7416_v62, %v3051_v45  ;;  %v5945_v62 = vld [vmem:[%s7969_s6 + $0x68] sm:$0xff]  }
 0x414   :  { %4090 = vmatpush1.bf16.msra.mxu1 %v5943_v46 }
 0x415   :  { %v3478_v30 = vmul.f32 %v3414_v1, %v3049_v31  ;;  %v3607_v55 = vpack.c.bf16 %v3574_v19, %v3573_v23  ;;  %4091 = vmatprep.subr.bf16.mxu1 %v8117_v44  ;;  %v8133_v1 = vpack.c.bf16 %v7360_v9, %v7351_v6  ;;  %v6180_v6 = vld [vmem:[%s7968_s5] sm:$0x1]  ;;  %v8134_v9 = vpack.c.bf16 %v7174_v49, %v7168_v21  ;;  %v8136_v21 = vld [vmem:[#allocation11_spill] sm:$0xff]  ;;  %v8138_v49 = vld [vmem:[#allocation12_spill] sm:$0xff] }
 0x417   :  { %v3055_v52 = vpop.f32.mrb[252].mxu1  ;;  %5623 = vmatprep.subr.bf16.mxu0 %v3607_v55  ;;  %v3511_v25 = vpack.c.bf16 %v3478_v30, %v7517_v20  ;;  %v5954_v55 = vld [vmem:[%s7971_s8 + $0x30] sm:$0xff]  }
 0x418   :  { %v3057_v59 = vpop.f32.mrb[253].mxu1  ;;  %5624 = vmatpush3.bf16.xpose.msra.mxu0 %v8132_v57  ;;  %4092 = vmatpush1.bf16.msra.mxu1 %v5944_v47  ;;  %v8164_v57 = vld [vmem:[#allocation33_spill] sm:$0xff] }
 0x419   :  { %v3415_v0 = vadd.f32 %v7438_v43, %v3057_v59  ;;  %v3575_v60 = vmul.f32 %v7438_v43, %v3057_v59  ;;  %v3059_v17 = vpop.f32.mrb[254].mxu1  ;;  %4093 = vmatprep.subr.bf16.mxu1 %v8117_v44  ;;  %v8163_v59 = vld [vmem:[#allocation32_spill] sm:$0xff] }
 0x41a   :  { %v3061_v46 = vpop.f32.mrb[255].mxu1 }
 0x41b   :  { %v3479_v24 = vmul.f32 %v3415_v0, %v3055_v52  ;;  %v3416_v23 = vadd.f32 %v7441_v10, %v3061_v46  ;;  %v3576_v31 = vmul.f32 %v7441_v10, %v3061_v46  ;;  %v5947_v10 = vld [vmem:[%s7969_s6 + $0x78] sm:$0xff]   ;;  %v8166_v0 = vld [vmem:[#allocation35_spill] sm:$0xff] }
 0x41c   :  { %4094 = vmatpush1.bf16.msra.mxu1 %v5945_v62  ;;  %v5955_v52 = vld [vmem:[%s7971_s8 + $0x38] sm:$0xff]  }
 0x41d   :  { %v3480_v16 = vmul.f32 %v3416_v23, %v3059_v17  ;;  %v3608_v45 = vpack.c.bf16 %v3576_v31, %v3575_v60  ;;  %4095 = vmatprep.subr.bf16.mxu1 %v8117_v44  ;;  %v8165_v62 = vld [vmem:[#allocation34_spill] sm:$0xff]  ;;  %v8167_v60 = vld [vmem:[#allocation36_spill] sm:$0xff]  ;;  %v8168_v17 = vld [vmem:[#allocation37_spill] sm:$0xff] }
 0x41e   :  { %v8169_v46 = vld [vmem:[#allocation38_spill] sm:$0xff]  ;;  %v8171_v23 = vld [vmem:[#allocation40_spill] sm:$0xff]  ;;  %v8172_v31 = vld [vmem:[#allocation41_spill] sm:$0xff] }
 0x41f   :  { %5625 = vmatprep.subr.bf16.mxu0 %v3608_v45  ;;  %v7541_v43 = vpop.f32.mrb[0].mxu1  ;;  %v3512_v20 = vpack.c.bf16 %v3480_v16, %v3479_v24  ;;  %v8170_v24 = vld [vmem:[#allocation39_spill] sm:$0xff]  ;;  %v8175_v45 = vld [vmem:[#allocation44_spill] sm:$0xff] }
 0x420   :  { %5626 = vmatpush3.bf16.xpose.msra.mxu0 %v8133_v1  ;;  %4096 = vmatpush1.bf16.msra.mxu1 %v5946_v14  ;;  %v7549_v19 = vpop.f32.mrb[1].mxu1  ;;  %v8173_v14 = vld [vmem:[#allocation42_spill] sm:$0xff]  ;;  %v8174_v16 = vld [vmem:[#allocation43_spill] sm:$0xff]  ;;  %v3891_v1 = vrot.slane %v7541_v43, 1 }
 0x421   :  { %5647 = vmatprep.subr.bf16.mxu0 %v3505_v7  ;;  %4097 = vmatprep.subr.bf16.mxu1 %v8117_v44  ;;  %v3673_v47 = vpop.f32.mrb[2].mxu1  ;;  %v8147_v44 = vld [vmem:[#allocation18_spill] sm:$0xff]  ;;  %v8152_v7 = vpack.c.bf16 %v7362_v53, %v7356_v12  ;;  %v5950_v53 = vld [vmem:[%s7971_s8 + $0x10] sm:$0xff]  }
 0x422   :  { %v3674_v30 = vpop.f32.mrb[3].mxu1  ;;  %v8157_v12 = vld [vmem:[#allocation26_spill] sm:$0xff] }
 0x423   :  { %v3892_v30 = vrot.slane %v7549_v19, 1 }
 0x424   :  { %4098 = vmatpush1.bf16.msra.mxu1 %v5947_v10 }
 0x427   :  { %4100 = vmatmul.mubr.bf16.vlgmr.msra.gmra.mrb[12].mxu1 %v6492_v28  ;;  %5628 = vmatmul.mubr.bf16.vlgmr.msra.gmra.mrb[4].mxu0 %v6180_v6  ;;  %v8135_v28 = vpack.c.bf16 %v7202_v54, %v7196_v34  ;;  %v8141_v34 = vld [vmem:[#allocation14_spill] sm:$0xff]  ;;  %v8142_v54 = vld [vmem:[#allocation15_spill] sm:$0xff] }
 0x428   :  { %5648 = vmatpush3.bf16.xpose.msra.mxu0 %v8134_v9  ;;  %4107 = vmatprep.mubr.bf16.mxu1 %v6501_v50  ;;  %v8137_v50 = vpack.c.bf16 %v7228_v63, %v7222_v26  ;;  %v8143_v26 = vpack.c.bf16 %v7284_v39, %v7278_v36  ;;  %v8144_v63 = vld [vmem:[#allocation16_spill] sm:$0xff]  ;;  %v8149_v36 = vpack.c.bf16 %v7336_v4, %v7330_v2  ;;  %v5948_v2 = vld [vmem:[%s7971_s8] sm:$0xff]  }
 0x429   :  { %5649 = vmatprep.subr.bf16.mxu0 %v3506_v5  ;;  %5663 = vmatprep.mubr.bf16.mxu0 %v6180_v6  ;;  %v8150_v39 = vld [vmem:[#allocation20_spill] sm:$0xff]  ;;  %v5951_v5 = vld [vmem:[%s7971_s8 + $0x18] sm:$0xff]  }
 0x42a   :  { %v5949_v4 = vld [vmem:[%s7971_s8 + $0x8] sm:$0xff]  }
 0x42f   :  { %4108 = vmatmul.mubr.bf16.gmra.mrb[16].mxu1 %v6503_v51  ;;  %v8139_v51 = vld [vmem:[#allocation13_spill] sm:$0xff] }
 0x430   :  { %5650 = vmatpush3.bf16.xpose.msra.mxu0 %v8135_v28  ;;  %4115 = vmatprep.mubr.bf16.mxu1 %v6509_v8  ;;  %v8140_v8 = vpack.c.bf16 %v7257_v35, %v7251_v33  ;;  %v8145_v33 = vld [vmem:[#allocation17_spill] sm:$0xff]  ;;  %v8146_v35 = vpack.c.bf16 %v7310_v22, %v7304_v27  ;;  %v8153_v27 = vld [vmem:[#allocation22_spill] sm:$0xff]  ;;  %v8154_v22 = vld [vmem:[#allocation23_spill] sm:$0xff] }
 0x431   :  { %5651 = vmatprep.subr.bf16.mxu0 %v3507_v32 }
 0x437   :  { %4116 = vmatmul.mubr.bf16.gmra.mrb[20].mxu1 %v8136_v21 }
 0x438   :  { %5652 = vmatpush3.bf16.xpose.msra.mxu0 %v8137_v50  ;;  %4123 = vmatprep.mubr.bf16.mxu1 %v8138_v49  ;;  %v3907_v49 = vmul.f32 8.0, %v7541_v43 }
 0x439   :  { %5653 = vmatprep.subr.bf16.mxu0 %v3508_v37 }
 0x43f   :  { %4124 = vmatmul.mubr.bf16.gmra.mrb[24].mxu1 %v8139_v51 }
 0x440   :  { %5654 = vmatpush3.bf16.xpose.msra.mxu0 %v8140_v8  ;;  %4131 = vmatprep.mubr.bf16.mxu1 %v8141_v34  ;;  %v8176_v8 = vld [vmem:[#allocation45_spill] sm:$0xff]  ;;  %v3908_v34 = vmul.f32 8.0, %v7549_v19 }
 0x441   :  { %5655 = vmatprep.subr.bf16.mxu0 %v3509_v48 }
 0x447   :  { %4132 = vmatmul.mubr.bf16.gmra.mrb[28].mxu1 %v8142_v54 }
 0x448   :  { %5656 = vmatpush3.bf16.xpose.msra.mxu0 %v8143_v26  ;;  %4139 = vmatprep.mubr.bf16.mxu1 %v8144_v63  ;;  %v8177_v26 = vld [vmem:[#allocation46_spill] sm:$0xff] }
 0x449   :  { %5657 = vmatprep.subr.bf16.mxu0 %v3510_v58  ;;  %v8161_v58 = vld [vmem:[#allocation30_spill] sm:$0xff] }
 0x44f   :  { %4140 = vmatmul.mubr.bf16.gmra.mrb[32].mxu1 %v8145_v33 }
 0x450   :  { %5658 = vmatpush3.bf16.xpose.msra.mxu0 %v8146_v35  ;;  %4147 = vmatprep.mubr.bf16.mxu1 %v8147_v44  ;;  %v8178_v35 = vld [vmem:[#allocation47_spill] sm:$0xff]  ;;  %v8179_v44 = vld [vmem:[#allocation48_spill] sm:$0xff] }
 0x451   :  { %5659 = vmatprep.subr.bf16.mxu0 %v3511_v25  ;;  %v8162_v25 = vld [vmem:[#allocation31_spill] sm:$0xff] }
 0x457   :  { %4148 = vmatmul.mubr.bf16.gmra.mrb[36].mxu1 %v8148_v11  ;;  %v8180_v11 = vld [vmem:[#allocation49_spill] sm:$0xff] }
 0x458   :  { %5660 = vmatpush3.bf16.xpose.msra.mxu0 %v8149_v36  ;;  %4155 = vmatprep.mubr.bf16.mxu1 %v8150_v39  ;;  %v8181_v36 = vld [vmem:[#allocation50_spill] sm:$0xff] }
 0x459   :  { %5661 = vmatprep.subr.bf16.mxu0 %v3512_v20 }
 0x45f   :  { %4156 = vmatmul.mubr.bf16.gmra.mrb[40].mxu1 %v8151_v13  ;;  %v8182_v13 = vld [vmem:[#allocation51_spill] sm:$0xff] }
 0x460   :  { %5662 = vmatpush3.bf16.xpose.msra.mxu0 %v8152_v7  ;;  %4163 = vmatprep.mubr.bf16.mxu1 %v8153_v27  ;;  %v8183_v27 = vld [vmem:[#allocation52_spill] sm:$0xff] }
 0x461   :  { %5741 = vmatprep.subr.bf16.mxu0 %v5948_v2 }
 0x467   :  { %4164 = vmatmul.mubr.bf16.gmra.mrb[44].mxu1 %v8154_v22  ;;  %5664 = vmatmul.mubr.bf16.vlgmr.msra.gmra.mrb[8].mxu0 %v6180_v6  ;;  %v8184_v22 = vld [vmem:[#allocation53_spill] sm:$0xff] }
 0x468   :  { %4171 = vmatprep.mubr.bf16.mxu1 %v8155_v56  ;;  %5742 = vmatpush3.bf16.msra.mxu0 %v5948_v2  ;;  %v8185_v56 = vld [vmem:[#allocation54_spill] sm:$0xff]  ;;  %v8186_v2 = vld [vmem:[#allocation55_spill] sm:$0xff] }
 0x469   :  { %5743 = vmatprep.subr.bf16.mxu0 %v5949_v4 }
 0x46c   :  { %5744 = vmatpush3.bf16.msra.mxu0 %v5949_v4  ;;  %v8187_v4 = vld [vmem:[#allocation56_spill] sm:$0xff] }
 0x46d   :  { %5745 = vmatprep.subr.bf16.mxu0 %v5950_v53 }
 0x46f   :  { %4172 = vmatmul.mubr.bf16.gmra.mrb[48].mxu1 %v8156_v41  ;;  %v8188_v41 = vld [vmem:[#allocation57_spill] sm:$0xff] }
 0x470   :  { %4179 = vmatprep.mubr.bf16.mxu1 %v8157_v12  ;;  %5746 = vmatpush3.bf16.msra.mxu0 %v5950_v53  ;;  %v8189_v12 = vld [vmem:[#allocation58_spill] sm:$0xff]  ;;  %v8190_v53 = vld [vmem:[#allocation59_spill] sm:$0xff] }
 0x471   :  { %5747 = vmatprep.subr.bf16.mxu0 %v5951_v5 }
 0x474   :  { %5748 = vmatpush3.bf16.msra.mxu0 %v5951_v5  ;;  %v8191_v5 = vld [vmem:[#allocation60_spill] sm:$0xff] }
 0x475   :  { %5749 = vmatprep.subr.bf16.mxu0 %v5952_v61 }
 0x477   :  { %4180 = vmatmul.mubr.bf16.gmra.mrb[52].mxu1 %v8158_v42  ;;  %v7692_v42 = vld [vmem:[%s7970_s7] ss:$0 sm:$0xff] }
 0x478   :  { %4187 = vmatprep.mubr.bf16.mxu1 %v8159_v3  ;;  %5750 = vmatpush3.bf16.msra.mxu0 %v5952_v61 }
 0x479   :  { %5751 = vmatprep.subr.bf16.mxu0 %v5953_v29 }
 0x47a   :  { %v3752_v32 = vpop.f32.mrb[4].mxu1 }
 0x47b   :  { %v3801_v18 = vmul.f32 %v3752_v32, %v7541_v43  ;;  %v3754_v37 = vpop.f32.mrb[5].mxu1  ;;  %v7675_v43 = vpop.f32.mrb[0].mxu0 }
 0x47c   :  { %v3802_v38 = vmul.f32 %v3754_v37, %v7549_v19  ;;  %v3756_v15 = vpop.f32.mrb[6].mxu1  ;;  %5752 = vmatpush3.bf16.msra.mxu0 %v5953_v29  ;;  %v7677_v39 = vpop.f32.mrb[1].mxu0 }
 0x47d   :  { %v3757_v48 = vpop.f32.mrb[7].mxu1  ;;  %5753 = vmatprep.subr.bf16.mxu0 %v5954_v55  ;;  %v3714_v19 = vpop.f32.mrb[2].mxu0 }
 0x47e   :  { %v3715_v7 = vpop.f32.mrb[3].mxu0  ;;  %v8198_v19 = vld [vmem:[#allocation67_spill] sm:$0xff] }
 0x47f   :  { %4188 = vmatmul.mubr.bf16.gmra.mrb[56].mxu1 %v8160_v40 }
 0x480   :  { %4195 = vmatprep.mubr.bf16.mxu1 %v8161_v58  ;;  %5754 = vmatpush3.bf16.msra.mxu0 %v5954_v55 }
 0x481   :  { %5755 = vmatprep.subr.bf16.mxu0 %v5955_v52 }
 0x484   :  { %5756 = vmatpush3.bf16.msra.mxu0 %v5955_v52 }
 0x487   :  { %4196 = vmatmul.mubr.bf16.gmra.mrb[60].mxu1 %v8162_v25 }
 0x488   :  { %4203 = vmatprep.mubr.bf16.mxu1 %v8163_v59  ;;  %v8192_v59 = vld [vmem:[#allocation61_spill] sm:$0xff] }
 0x48f   :  { %4204 = vmatmul.mubr.bf16.gmra.mrb[64].mxu1 %v8164_v57  ;;  %v8193_v57 = vld [vmem:[#allocation62_spill] sm:$0xff] }
 0x490   :  { %4211 = vmatprep.mubr.bf16.mxu1 %v8165_v62 }
 0x497   :  { %4212 = vmatmul.mubr.bf16.gmra.mrb[68].mxu1 %v8166_v0 }
 0x498   :  { %4219 = vmatprep.mubr.bf16.mxu1 %v8167_v60 }
 0x49f   :  { %4220 = vmatmul.mubr.bf16.gmra.mrb[72].mxu1 %v8168_v17 }
 0x4a0   :  { %4227 = vmatprep.mubr.bf16.mxu1 %v8169_v46 }
 0x4a7   :  { %4228 = vmatmul.mubr.bf16.gmra.mrb[76].mxu1 %v8170_v24 }
 0x4a8   :  { %4235 = vmatprep.mubr.bf16.mxu1 %v8171_v23 }
 0x4af   :  { %4236 = vmatmul.mubr.bf16.gmra.mrb[80].mxu1 %v8172_v31 }
 0x4b0   :  { %4243 = vmatprep.mubr.bf16.mxu1 %v8173_v14 }
 0x4b7   :  { %4244 = vmatmul.mubr.bf16.gmra.mrb[84].mxu1 %v8174_v16  ;;  %v8194_v16 = vld [vmem:[#allocation63_spill] sm:$0xff] }
 0x4b8   :  { %4251 = vmatprep.mubr.bf16.mxu1 %v8175_v45  ;;  %v8195_v45 = vld [vmem:[#allocation64_spill] sm:$0xff] }
 0x4ba   :  { %v3839_v20 = vpop.f32.mrb[8].mxu1 }
 0x4bb   :  { %v3840_v10 = vadd.f32 %v3839_v20, %v3801_v18  ;;  %v3841_v47 = vpop.f32.mrb[9].mxu1 }
 0x4bc   :  { %v3842_v6 = vadd.f32 %v3841_v47, %v3802_v38  ;;  %v3843_v9 = vpop.f32.mrb[10].mxu1 }
 0x4bd   :  { %v3899_v28 = vadd.f32 %v3891_v1, %v3840_v10  ;;  %v3844_v21 = vpop.f32.mrb[11].mxu1 }
 0x4be   :  { %v3900_v50 = vadd.f32 %v3892_v30, %v3842_v6 }
 0x4bf   :  { %v3903_v51 = vmul.f32 256.0, %v3899_v28  ;;  %4252 = vmatmul.mubr.bf16.gmra.mrb[88].mxu1 %v8176_v8 }
 0x4c0   :  { %v3904_v54 = vmul.f32 256.0, %v3900_v50  ;;  %4259 = vmatprep.mubr.bf16.mxu1 %v8177_v26  ;;  %v8196_v50 = vld [vmem:[#allocation65_spill] sm:$0xff] }
 0x4c1   :  { %v7667_v63 = vadd.f32 %v3907_v49, %v3903_v51  ;;  %v8197_v49 = vld [vmem:[#allocation66_spill] sm:$0xff] }
 0x4c2   :  { %v7669_v33 = vadd.f32 %v3908_v34, %v3904_v54 }
 0x4c7   :  { %4260 = vmatmul.mubr.bf16.gmra.mrb[92].mxu1 %v8178_v35 }
 0x4c8   :  { %4267 = vmatprep.mubr.bf16.mxu1 %v8179_v44 }
 0x4cf   :  { %4268 = vmatmul.mubr.bf16.gmra.mrb[96].mxu1 %v8180_v11 }
 0x4d0   :  { %4275 = vmatprep.mubr.bf16.mxu1 %v8181_v36 }
 0x4d7   :  { %4276 = vmatmul.mubr.bf16.gmra.mrb[100].mxu1 %v8182_v13  ;;  %v8199_v13 = vld [vmem:[#allocation70_spill] sm:$0xff] }
 0x4d8   :  { %4283 = vmatprep.mubr.bf16.mxu1 %v8183_v27 }
 0x4df   :  { %4284 = vmatmul.mubr.bf16.gmra.mrb[104].mxu1 %v8184_v22 }
 0x4e0   :  { %4291 = vmatprep.mubr.bf16.mxu1 %v8185_v56 }
 0x4e7   :  { %4292 = vmatmul.mubr.bf16.gmra.mrb[108].mxu1 %v8186_v2 }
 0x4e8   :  { %4299 = vmatprep.mubr.bf16.mxu1 %v8187_v4 }
 0x4ef   :  { %4300 = vmatmul.mubr.bf16.gmra.mrb[112].mxu1 %v8188_v41 }
 0x4f0   :  { %4307 = vmatprep.mubr.bf16.mxu1 %v8189_v12 }
 0x4f7   :  { %4308 = vmatmul.mubr.bf16.gmra.mrb[116].mxu1 %v8190_v53 }
 0x4f8   :  { %4315 = vmatprep.mubr.bf16.mxu1 %v8191_v5  ;;  %v8200_v5 = vld [vmem:[#allocation71_spill] sm:$0xff] }
 0x4fa   :  { %v4101_v3 = vpop.f32.mrb[12].mxu1  ;;  %v3793_v32 = vpop.f32.mrb[4].mxu0 }
 0x4fb   :  { %v4102_v61 = vadd.f32 %v7692_v42, %v4101_v3  ;;  %v4103_v18 = vpop.f32.mrb[13].mxu1  ;;  %v7696_v37 = vmul.f32 %v3793_v32, %v7675_v43  ;;  %v3795_v38 = vpop.f32.mrb[5].mxu0 }
 0x4fc   :  { %v4104_v15 = vpop.f32.mrb[14].mxu1  ;;  %v7699_v48 = vmul.f32 %v3795_v38, %v7677_v39  ;;  %v3797_v29 = vpop.f32.mrb[6].mxu0 }
 0x4fd   :  { %v4105_v40 = vadd.f32 %v7692_v42, %v4104_v15  ;;  %v4106_v58 = vpop.f32.mrb[15].mxu1  ;;  %v3798_v55 = vpop.f32.mrb[7].mxu0  ;;  %v4356_v52 = vmax.f32 %v4102_v61, 0.0 }
 0x4ff   :  { %v4357_v25 = vmax.f32 %v4105_v40, 0.0  ;;  %4316 = vmatmul.mubr.bf16.gmra.mrb[120].mxu1 %v8192_v59 }
 0x500   :  { %4323 = vmatprep.mubr.bf16.mxu1 %v8193_v57 }
 0x501   :  { %v4420_v62 = vpack.c.bf16 %v4357_v25, %v4356_v52 }
 0x502   :  { %v4109_v0 = vpop.f32.mrb[16].mxu1 }
 0x503   :  { %v4110_v60 = vadd.f32 %v7692_v42, %v4109_v0  ;;  %v4111_v17 = vpop.f32.mrb[17].mxu1  ;;  %5757 = vmatprep.mubr.bf16.mxu0 %v4420_v62 }
 0x504   :  { %v4112_v46 = vpop.f32.mrb[18].mxu1 }
 0x505   :  { %v4113_v24 = vadd.f32 %v7692_v42, %v4112_v46  ;;  %v4114_v23 = vpop.f32.mrb[19].mxu1  ;;  %v4358_v31 = vmax.f32 %v4110_v60, 0.0 }
 0x507   :  { %v4359_v14 = vmax.f32 %v4113_v24, 0.0  ;;  %4324 = vmatmul.mubr.bf16.gmra.mrb[124].mxu1 %v8194_v16 }
 0x508   :  { %4331 = vmatprep.mubr.bf16.mxu1 %v8195_v45 }
 0x509   :  { %v4421_v20 = vpack.c.bf16 %v4359_v14, %v4358_v31 }
 0x50a   :  { %v4117_v1 = vpop.f32.mrb[20].mxu1 }
 0x50b   :  { %v4118_v10 = vadd.f32 %v7692_v42, %v4117_v1  ;;  %v4119_v47 = vpop.f32.mrb[21].mxu1  ;;  %5758 = vmatmul.mubr.bf16.vlgmr.msra.gmra.mrb[12].mxu0 %v4421_v20 }
 0x50c   :  { %v4120_v30 = vpop.f32.mrb[22].mxu1  ;;  %v3893_v47 = vrot.slane %v7675_v43, 1 }
 0x50d   :  { %v4121_v6 = vadd.f32 %v7692_v42, %v4120_v30  ;;  %v4122_v9 = vpop.f32.mrb[23].mxu1  ;;  %v4360_v28 = vmax.f32 %v4118_v10, 0.0 }
 0x50f   :  { %v4361_v21 = vmax.f32 %v4121_v6, 0.0  ;;  %4332 = vmatmul.mubr.bf16.gmra.mrb[128].mxu1 %v8196_v50  ;;  %v3894_v6 = vrot.slane %v7677_v39, 1 }
 0x510   :  { %4339 = vmatprep.mubr.bf16.mxu1 %v8197_v49 }
 0x511   :  { %v4422_v51 = vpack.c.bf16 %v4361_v21, %v4360_v28 }
 0x512   :  { %v4125_v8 = vpop.f32.mrb[24].mxu1 }
 0x513   :  { %v4126_v34 = vadd.f32 %v7692_v42, %v4125_v8  ;;  %v4127_v54 = vpop.f32.mrb[25].mxu1  ;;  %5761 = vmatprep.mubr.bf16.mxu0 %v4422_v51 }
 0x514   :  { %v4128_v26 = vpop.f32.mrb[26].mxu1 }
 0x515   :  { %v4129_v35 = vadd.f32 %v7692_v42, %v4128_v26  ;;  %v4130_v44 = vpop.f32.mrb[27].mxu1  ;;  %v4362_v11 = vmax.f32 %v4126_v34, 0.0 }
 0x517   :  { %v4363_v36 = vmax.f32 %v4129_v35, 0.0  ;;  %4340 = vmatmul.mubr.bf16.gmra.mrb[132].mxu1 %v8198_v19  ;;  %v3909_v35 = vmul.f32 8.0, %v7675_v43 }
 0x518   :  { %4347 = vmatprep.mubr.bf16.mxu1 %v8199_v13 }
 0x519   :  { %v4423_v7 = vpack.c.bf16 %v4363_v36, %v4362_v11  ;;  %v3910_v36 = vmul.f32 8.0, %v7677_v39 }
 0x51a   :  { %v4133_v27 = vpop.f32.mrb[28].mxu1 }
 0x51b   :  { %v4134_v22 = vadd.f32 %v7692_v42, %v4133_v27  ;;  %v4135_v56 = vpop.f32.mrb[29].mxu1  ;;  %5762 = vmatmul.mubr.bf16.gmra.mrb[16].mxu0 %v4423_v7 }
 0x51c   :  { %v4136_v2 = vpop.f32.mrb[30].mxu1 }
 0x51d   :  { %v4137_v4 = vadd.f32 %v7692_v42, %v4136_v2  ;;  %v4138_v41 = vpop.f32.mrb[31].mxu1  ;;  %v4364_v12 = vmax.f32 %v4134_v22, 0.0 }
 0x51f   :  { %v4365_v53 = vmax.f32 %v4137_v4, 0.0  ;;  %4348 = vmatmul.mubr.bf16.gmra.mrb[136].mxu1 %v8200_v5 }
 0x521   :  { %v4424_v3 = vpack.c.bf16 %v4365_v53, %v4364_v12 }
 0x522   :  { %v4141_v32 = vpop.f32.mrb[32].mxu1 }
 0x523   :  { %v4142_v61 = vadd.f32 %v7692_v42, %v4141_v32  ;;  %v4143_v18 = vpop.f32.mrb[33].mxu1  ;;  %5765 = vmatprep.mubr.bf16.mxu0 %v4424_v3 }
 0x524   :  { %v4144_v38 = vpop.f32.mrb[34].mxu1 }
 0x525   :  { %v4145_v15 = vadd.f32 %v7692_v42, %v4144_v38  ;;  %v4146_v29 = vpop.f32.mrb[35].mxu1  ;;  %v4366_v40 = vmax.f32 %v4142_v61, 0.0 }
 0x527   :  { %v4367_v58 = vmax.f32 %v4145_v15, 0.0 }
 0x529   :  { %v4425_v55 = vpack.c.bf16 %v4367_v58, %v4366_v40 }
 0x52a   :  { %v4149_v52 = vpop.f32.mrb[36].mxu1 }
 0x52b   :  { %v4150_v25 = vadd.f32 %v7692_v42, %v4149_v52  ;;  %v4151_v59 = vpop.f32.mrb[37].mxu1  ;;  %5766 = vmatmul.mubr.bf16.gmra.mrb[20].mxu0 %v4425_v55 }
 0x52c   :  { %v4152_v57 = vpop.f32.mrb[38].mxu1 }
 0x52d   :  { %v4153_v62 = vadd.f32 %v7692_v42, %v4152_v57  ;;  %v4154_v0 = vpop.f32.mrb[39].mxu1  ;;  %v4368_v60 = vmax.f32 %v4150_v25, 0.0 }
 0x52f   :  { %v4369_v17 = vmax.f32 %v4153_v62, 0.0 }
 0x531   :  { %v4426_v46 = vpack.c.bf16 %v4369_v17, %v4368_v60 }
 0x532   :  { %v4157_v24 = vpop.f32.mrb[40].mxu1 }
 0x533   :  { %v4158_v23 = vadd.f32 %v7692_v42, %v4157_v24  ;;  %v4159_v31 = vpop.f32.mrb[41].mxu1  ;;  %5769 = vmatprep.mubr.bf16.mxu0 %v4426_v46 }
 0x534   :  { %v4160_v14 = vpop.f32.mrb[42].mxu1 }
 0x535   :  { %v4161_v16 = vadd.f32 %v7692_v42, %v4160_v14  ;;  %v4162_v45 = vpop.f32.mrb[43].mxu1  ;;  %v4370_v20 = vmax.f32 %v4158_v23, 0.0 }
 0x537   :  { %v4371_v1 = vmax.f32 %v4161_v16, 0.0 }
 0x539   :  { %v4427_v10 = vpack.c.bf16 %v4371_v1, %v4370_v20 }
 0x53a   :  { %v4165_v30 = vpop.f32.mrb[44].mxu1  ;;  %v3880_v9 = vpop.f32.mrb[8].mxu0 }
 0x53b   :  { %v4166_v28 = vadd.f32 %v7692_v42, %v4165_v30  ;;  %v4167_v21 = vpop.f32.mrb[45].mxu1  ;;  %5770 = vmatmul.mubr.bf16.gmra.mrb[24].mxu0 %v4427_v10  ;;  %v3881_v50 = vadd.f32 %v3880_v9, %v7696_v37  ;;  %v3882_v49 = vpop.f32.mrb[9].mxu0 }
 0x53c   :  { %v4168_v51 = vpop.f32.mrb[46].mxu1  ;;  %v3883_v8 = vadd.f32 %v3882_v49, %v7699_v48  ;;  %v3884_v34 = vpop.f32.mrb[10].mxu0 }
 0x53d   :  { %v4169_v54 = vadd.f32 %v7692_v42, %v4168_v51  ;;  %v4170_v26 = vpop.f32.mrb[47].mxu1  ;;  %v3901_v44 = vadd.f32 %v3893_v47, %v3881_v50  ;;  %v3885_v11 = vpop.f32.mrb[11].mxu0  ;;  %v4372_v13 = vmax.f32 %v4166_v28, 0.0 }
 0x53e   :  { %v3902_v19 = vadd.f32 %v3894_v6, %v3883_v8 }
 0x53f   :  { %v4373_v7 = vmax.f32 %v4169_v54, 0.0  ;;  %v3905_v27 = vmul.f32 256.0, %v3901_v44 }
 0x540   :  { %v3906_v22 = vmul.f32 256.0, %v3902_v19 }
 0x541   :  { %v4428_v37 = vpack.c.bf16 %v4373_v7, %v4372_v13  ;;  %v7733_v56 = vadd.f32 %v3909_v35, %v3905_v27 }
 0x542   :  { %v4173_v2 = vpop.f32.mrb[48].mxu1  ;;  %v7735_v48 = vadd.f32 %v3910_v36, %v3906_v22 }
 0x543   :  { %v4174_v4 = vadd.f32 %v7692_v42, %v4173_v2  ;;  %v4175_v41 = vpop.f32.mrb[49].mxu1  ;;  %5773 = vmatprep.mubr.bf16.mxu0 %v4428_v37 }
 0x544   :  { %v4176_v43 = vpop.f32.mrb[50].mxu1 }
 0x545   :  { %v4177_v12 = vadd.f32 %v7692_v42, %v4176_v43  ;;  %v4178_v53 = vpop.f32.mrb[51].mxu1  ;;  %v4374_v39 = vmax.f32 %v4174_v4, 0.0 }
 0x547   :  { %v4375_v5 = vmax.f32 %v4177_v12, 0.0 }
 0x549   :  { %v4429_v3 = vpack.c.bf16 %v4375_v5, %v4374_v39 }
 0x54a   :  { %v4181_v32 = vpop.f32.mrb[52].mxu1 }
 0x54b   :  { %v4182_v61 = vadd.f32 %v7692_v42, %v4181_v32  ;;  %v4183_v18 = vpop.f32.mrb[53].mxu1  ;;  %5774 = vmatmul.mubr.bf16.gmra.mrb[28].mxu0 %v4429_v3 }
 0x54c   :  { %v4184_v38 = vpop.f32.mrb[54].mxu1 }
 0x54d   :  { %v4185_v15 = vadd.f32 %v7692_v42, %v4184_v38  ;;  %v4186_v29 = vpop.f32.mrb[55].mxu1  ;;  %v4376_v40 = vmax.f32 %v4182_v61, 0.0 }
 0x54f   :  { %v4377_v58 = vmax.f32 %v4185_v15, 0.0 }
 0x551   :  { %v4430_v55 = vpack.c.bf16 %v4377_v58, %v4376_v40 }
 0x552   :  { %v4189_v52 = vpop.f32.mrb[56].mxu1 }
 0x553   :  { %v4190_v25 = vadd.f32 %v7692_v42, %v4189_v52  ;;  %v4191_v59 = vpop.f32.mrb[57].mxu1  ;;  %5777 = vmatprep.mubr.bf16.mxu0 %v4430_v55 }
 0x554   :  { %v4192_v57 = vpop.f32.mrb[58].mxu1 }
 0x555   :  { %v4193_v62 = vadd.f32 %v7692_v42, %v4192_v57  ;;  %v4194_v0 = vpop.f32.mrb[59].mxu1  ;;  %v4378_v60 = vmax.f32 %v4190_v25, 0.0 }
 0x557   :  { %v4379_v17 = vmax.f32 %v4193_v62, 0.0 }
 0x559   :  { %v4431_v46 = vpack.c.bf16 %v4379_v17, %v4378_v60 }
 0x55a   :  { %v4197_v24 = vpop.f32.mrb[60].mxu1 }
 0x55b   :  { %v4198_v23 = vadd.f32 %v7692_v42, %v4197_v24  ;;  %v4199_v31 = vpop.f32.mrb[61].mxu1  ;;  %5778 = vmatmul.mubr.bf16.gmra.mrb[32].mxu0 %v4431_v46 }
 0x55c   :  { %v4200_v14 = vpop.f32.mrb[62].mxu1 }
 0x55d   :  { %v4201_v16 = vadd.f32 %v7692_v42, %v4200_v14  ;;  %v4202_v45 = vpop.f32.mrb[63].mxu1  ;;  %v4380_v20 = vmax.f32 %v4198_v23, 0.0 }
 0x55f   :  { %v4381_v1 = vmax.f32 %v4201_v16, 0.0 }
 0x561   :  { %v4432_v10 = vpack.c.bf16 %v4381_v1, %v4380_v20 }
 0x562   :  { %v4205_v47 = vpop.f32.mrb[64].mxu1 }
 0x563   :  { %v4206_v30 = vadd.f32 %v7692_v42, %v4205_v47  ;;  %v4207_v6 = vpop.f32.mrb[65].mxu1  ;;  %5781 = vmatprep.mubr.bf16.mxu0 %v4432_v10 }
 0x564   :  { %v4208_v9 = vpop.f32.mrb[66].mxu1 }
 0x565   :  { %v4209_v28 = vadd.f32 %v7692_v42, %v4208_v9  ;;  %v4210_v21 = vpop.f32.mrb[67].mxu1  ;;  %v4382_v50 = vmax.f32 %v4206_v30, 0.0 }
 0x567   :  { %v4383_v49 = vmax.f32 %v4209_v28, 0.0 }
 0x569   :  { %v4433_v51 = vpack.c.bf16 %v4383_v49, %v4382_v50 }
 0x56a   :  { %v4213_v8 = vpop.f32.mrb[68].mxu1 }
 0x56b   :  { %v4214_v34 = vadd.f32 %v7692_v42, %v4213_v8  ;;  %v4215_v54 = vpop.f32.mrb[69].mxu1  ;;  %5782 = vmatmul.mubr.bf16.gmra.mrb[36].mxu0 %v4433_v51 }
 0x56c   :  { %v4216_v26 = vpop.f32.mrb[70].mxu1 }
 0x56d   :  { %v4217_v35 = vadd.f32 %v7692_v42, %v4216_v26  ;;  %v4218_v44 = vpop.f32.mrb[71].mxu1  ;;  %v4384_v11 = vmax.f32 %v4214_v34, 0.0 }
 0x56f   :  { %v4385_v36 = vmax.f32 %v4217_v35, 0.0 }
 0x571   :  { %v4434_v19 = vpack.c.bf16 %v4385_v36, %v4384_v11 }
 0x572   :  { %v4221_v13 = vpop.f32.mrb[72].mxu1 }
 0x573   :  { %v4222_v7 = vadd.f32 %v7692_v42, %v4221_v13  ;;  %v4223_v27 = vpop.f32.mrb[73].mxu1  ;;  %5785 = vmatprep.mubr.bf16.mxu0 %v4434_v19 }
 0x574   :  { %v4224_v22 = vpop.f32.mrb[74].mxu1 }
 0x575   :  { %v4225_v37 = vadd.f32 %v7692_v42, %v4224_v22  ;;  %v4226_v2 = vpop.f32.mrb[75].mxu1  ;;  %v4386_v4 = vmax.f32 %v4222_v7, 0.0 }
 0x577   :  { %v4387_v41 = vmax.f32 %v4225_v37, 0.0 }
 0x579   :  { %v4435_v43 = vpack.c.bf16 %v4387_v41, %v4386_v4 }
 0x57a   :  { %v4229_v12 = vpop.f32.mrb[76].mxu1 }
 0x57b   :  { %v4230_v53 = vadd.f32 %v7692_v42, %v4229_v12  ;;  %v4231_v39 = vpop.f32.mrb[77].mxu1  ;;  %5786 = vmatmul.mubr.bf16.gmra.mrb[40].mxu0 %v4435_v43 }
 0x57c   :  { %v4232_v5 = vpop.f32.mrb[78].mxu1 }
 0x57d   :  { %v4233_v3 = vadd.f32 %v7692_v42, %v4232_v5  ;;  %v4234_v32 = vpop.f32.mrb[79].mxu1  ;;  %v4388_v61 = vmax.f32 %v4230_v53, 0.0 }
 0x57f   :  { %v4389_v18 = vmax.f32 %v4233_v3, 0.0 }
 0x581   :  { %v4436_v38 = vpack.c.bf16 %v4389_v18, %v4388_v61 }
 0x582   :  { %v4237_v15 = vpop.f32.mrb[80].mxu1 }
 0x583   :  { %v4238_v29 = vadd.f32 %v7692_v42, %v4237_v15  ;;  %v4239_v40 = vpop.f32.mrb[81].mxu1  ;;  %5789 = vmatprep.mubr.bf16.mxu0 %v4436_v38 }
 0x584   :  { %v4240_v58 = vpop.f32.mrb[82].mxu1 }
 0x585   :  { %v4241_v55 = vadd.f32 %v7692_v42, %v4240_v58  ;;  %v4242_v52 = vpop.f32.mrb[83].mxu1  ;;  %v4390_v25 = vmax.f32 %v4238_v29, 0.0 }
 0x587   :  { %v4391_v59 = vmax.f32 %v4241_v55, 0.0 }
 0x589   :  { %v4437_v57 = vpack.c.bf16 %v4391_v59, %v4390_v25 }
 0x58a   :  { %v4245_v62 = vpop.f32.mrb[84].mxu1 }
 0x58b   :  { %v4246_v0 = vadd.f32 %v7692_v42, %v4245_v62  ;;  %v4247_v60 = vpop.f32.mrb[85].mxu1  ;;  %5790 = vmatmul.mubr.bf16.gmra.mrb[44].mxu0 %v4437_v57 }
 0x58c   :  { %v4248_v17 = vpop.f32.mrb[86].mxu1 }
 0x58d   :  { %v4249_v46 = vadd.f32 %v7692_v42, %v4248_v17  ;;  %v4250_v24 = vpop.f32.mrb[87].mxu1  ;;  %v4392_v23 = vmax.f32 %v4246_v0, 0.0 }
 0x58f   :  { %v4393_v31 = vmax.f32 %v4249_v46, 0.0 }
 0x591   :  { %v4438_v14 = vpack.c.bf16 %v4393_v31, %v4392_v23 }
 0x592   :  { %v4253_v16 = vpop.f32.mrb[88].mxu1 }
 0x593   :  { %v4254_v45 = vadd.f32 %v7692_v42, %v4253_v16  ;;  %v4255_v20 = vpop.f32.mrb[89].mxu1  ;;  %5793 = vmatprep.mubr.bf16.mxu0 %v4438_v14 }
 0x594   :  { %v4256_v1 = vpop.f32.mrb[90].mxu1 }
 0x595   :  { %v4257_v10 = vadd.f32 %v7692_v42, %v4256_v1  ;;  %v4258_v47 = vpop.f32.mrb[91].mxu1  ;;  %v4394_v30 = vmax.f32 %v4254_v45, 0.0 }
 0x597   :  { %v4395_v6 = vmax.f32 %v4257_v10, 0.0 }
 0x599   :  { %v4439_v9 = vpack.c.bf16 %v4395_v6, %v4394_v30 }
 0x59a   :  { %v4261_v28 = vpop.f32.mrb[92].mxu1 }
 0x59b   :  { %v4262_v21 = vadd.f32 %v7692_v42, %v4261_v28  ;;  %v4263_v50 = vpop.f32.mrb[93].mxu1  ;;  %5794 = vmatmul.mubr.bf16.gmra.mrb[48].mxu0 %v4439_v9 }
 0x59c   :  { %v4264_v49 = vpop.f32.mrb[94].mxu1 }
 0x59d   :  { %v4265_v51 = vadd.f32 %v7692_v42, %v4264_v49  ;;  %v4266_v8 = vpop.f32.mrb[95].mxu1  ;;  %v4396_v34 = vmax.f32 %v4262_v21, 0.0 }
 0x59f   :  { %v4397_v54 = vmax.f32 %v4265_v51, 0.0 }
 0x5a1   :  { %v4440_v26 = vpack.c.bf16 %v4397_v54, %v4396_v34 }
 0x5a2   :  { %v4269_v35 = vpop.f32.mrb[96].mxu1 }
 0x5a3   :  { %v4270_v44 = vadd.f32 %v7692_v42, %v4269_v35  ;;  %v4271_v11 = vpop.f32.mrb[97].mxu1  ;;  %5797 = vmatprep.mubr.bf16.mxu0 %v4440_v26 }
 0x5a4   :  { %v4272_v36 = vpop.f32.mrb[98].mxu1 }
 0x5a5   :  { %v4273_v19 = vadd.f32 %v7692_v42, %v4272_v36  ;;  %v4274_v13 = vpop.f32.mrb[99].mxu1  ;;  %v4398_v7 = vmax.f32 %v4270_v44, 0.0 }
 0x5a7   :  { %v4399_v27 = vmax.f32 %v4273_v19, 0.0 }
 0x5a9   :  { %v4441_v22 = vpack.c.bf16 %v4399_v27, %v4398_v7 }
 0x5aa   :  { %v4277_v37 = vpop.f32.mrb[100].mxu1 }
 0x5ab   :  { %v4278_v2 = vadd.f32 %v7692_v42, %v4277_v37  ;;  %v4279_v4 = vpop.f32.mrb[101].mxu1  ;;  %5798 = vmatmul.mubr.bf16.gmra.mrb[52].mxu0 %v4441_v22  ;;  %v7779_v22 = vld [vmem:[%s7972_s9] ss:$0 sm:$0xff] }
 0x5ac   :  { %v4280_v41 = vpop.f32.mrb[102].mxu1 }
 0x5ad   :  { %v4281_v43 = vadd.f32 %v7692_v42, %v4280_v41  ;;  %v4282_v12 = vpop.f32.mrb[103].mxu1  ;;  %v4400_v53 = vmax.f32 %v4278_v2, 0.0 }
 0x5af   :  { %v4401_v39 = vmax.f32 %v4281_v43, 0.0 }
 0x5b1   :  { %v4442_v5 = vpack.c.bf16 %v4401_v39, %v4400_v53 }
 0x5b2   :  { %v4285_v3 = vpop.f32.mrb[104].mxu1 }
 0x5b3   :  { %v4286_v32 = vadd.f32 %v7692_v42, %v4285_v3  ;;  %v4287_v61 = vpop.f32.mrb[105].mxu1  ;;  %5801 = vmatprep.mubr.bf16.mxu0 %v4442_v5 }
 0x5b4   :  { %v4288_v18 = vpop.f32.mrb[106].mxu1 }
 0x5b5   :  { %v4289_v38 = vadd.f32 %v7692_v42, %v4288_v18  ;;  %v4290_v15 = vpop.f32.mrb[107].mxu1  ;;  %v4402_v29 = vmax.f32 %v4286_v32, 0.0 }
 0x5b7   :  { %v4403_v40 = vmax.f32 %v4289_v38, 0.0 }
 0x5b9   :  { %v4443_v58 = vpack.c.bf16 %v4403_v40, %v4402_v29 }
 0x5ba   :  { %v4293_v55 = vpop.f32.mrb[108].mxu1 }
 0x5bb   :  { %v4294_v52 = vadd.f32 %v7692_v42, %v4293_v55  ;;  %v4295_v25 = vpop.f32.mrb[109].mxu1  ;;  %5802 = vmatmul.mubr.bf16.gmra.mrb[56].mxu0 %v4443_v58 }
 0x5bc   :  { %v4296_v59 = vpop.f32.mrb[110].mxu1 }
 0x5bd   :  { %v4297_v57 = vadd.f32 %v7692_v42, %v4296_v59  ;;  %v4298_v62 = vpop.f32.mrb[111].mxu1  ;;  %v4404_v0 = vmax.f32 %v4294_v52, 0.0 }
 0x5bf   :  { %v4405_v60 = vmax.f32 %v4297_v57, 0.0 }
 0x5c1   :  { %v4444_v17 = vpack.c.bf16 %v4405_v60, %v4404_v0 }
 0x5c2   :  { %v4301_v46 = vpop.f32.mrb[112].mxu1 }
 0x5c3   :  { %v4302_v24 = vadd.f32 %v7692_v42, %v4301_v46  ;;  %v4303_v23 = vpop.f32.mrb[113].mxu1  ;;  %5805 = vmatprep.mubr.bf16.mxu0 %v4444_v17 }
 0x5c4   :  { %v4304_v31 = vpop.f32.mrb[114].mxu1 }
 0x5c5   :  { %v4305_v14 = vadd.f32 %v7692_v42, %v4304_v31  ;;  %v4306_v16 = vpop.f32.mrb[115].mxu1  ;;  %v4406_v45 = vmax.f32 %v4302_v24, 0.0 }
 0x5c7   :  { %v4407_v20 = vmax.f32 %v4305_v14, 0.0 }
 0x5c9   :  { %v4445_v1 = vpack.c.bf16 %v4407_v20, %v4406_v45 }
 0x5ca   :  { %v4309_v10 = vpop.f32.mrb[116].mxu1 }
 0x5cb   :  { %v4310_v47 = vadd.f32 %v7692_v42, %v4309_v10  ;;  %v4311_v30 = vpop.f32.mrb[117].mxu1  ;;  %5806 = vmatmul.mubr.bf16.gmra.mrb[60].mxu0 %v4445_v1 }
 0x5cc   :  { %v4312_v6 = vpop.f32.mrb[118].mxu1 }
 0x5cd   :  { %v4313_v9 = vadd.f32 %v7692_v42, %v4312_v6  ;;  %v4314_v28 = vpop.f32.mrb[119].mxu1  ;;  %v4408_v21 = vmax.f32 %v4310_v47, 0.0 }
 0x5cf   :  { %v4409_v50 = vmax.f32 %v4313_v9, 0.0 }
 0x5d1   :  { %v4446_v49 = vpack.c.bf16 %v4409_v50, %v4408_v21 }
 0x5d2   :  { %v4317_v51 = vpop.f32.mrb[120].mxu1 }
 0x5d3   :  { %v4318_v8 = vadd.f32 %v7692_v42, %v4317_v51  ;;  %v4319_v34 = vpop.f32.mrb[121].mxu1  ;;  %5809 = vmatprep.mubr.bf16.mxu0 %v4446_v49 }
 0x5d4   :  { %v4320_v54 = vpop.f32.mrb[122].mxu1 }
 0x5d5   :  { %v4321_v26 = vadd.f32 %v7692_v42, %v4320_v54  ;;  %v4322_v35 = vpop.f32.mrb[123].mxu1  ;;  %v4410_v44 = vmax.f32 %v4318_v8, 0.0 }
 0x5d7   :  { %v4411_v11 = vmax.f32 %v4321_v26, 0.0 }
 0x5d9   :  { %v4447_v36 = vpack.c.bf16 %v4411_v11, %v4410_v44 }
 0x5da   :  { %v4325_v19 = vpop.f32.mrb[124].mxu1 }
 0x5db   :  { %v4326_v13 = vadd.f32 %v7692_v42, %v4325_v19  ;;  %v4327_v7 = vpop.f32.mrb[125].mxu1  ;;  %5810 = vmatmul.mubr.bf16.gmra.mrb[64].mxu0 %v4447_v36 }
 0x5dc   :  { %v4328_v27 = vpop.f32.mrb[126].mxu1 }
 0x5dd   :  { %v4329_v37 = vadd.f32 %v7692_v42, %v4328_v27  ;;  %v4330_v2 = vpop.f32.mrb[127].mxu1  ;;  %v4412_v41 = vmax.f32 %v4326_v13, 0.0 }
 0x5de   :  { %v5759_v4 = vpop.f32.mrb[12].mxu0 }
 0x5df   :  { %v4413_v43 = vmax.f32 %v4329_v37, 0.0  ;;  %v4566_v12 = vadd.f32 %v5759_v4, %v7779_v22  ;;  %v4557_v53 = vpop.f32.mrb[13].mxu0  ;;  %v7807_v4 = vld [vmem:[%s7973_s10] sm:$0x1]  ;;  %s6262_s10 = smov [#allocation7]  }
 0x5e0   :  { %v4558_v39 = vadd.f32 %v7779_v22, %v4557_v53  ;;  %v5760_v5 = vpop.f32.mrb[14].mxu0  ;;  %s5191_s29 = sshll.u32 %s6262_s10, 4  ;;  %s5192_s29 = int_to_ptr.vmem [resolvable:$true] %s5191_s29 }
 0x5e1   :  { %v4448_v3 = vpack.c.bf16 %v4413_v43, %v4412_v41  ;;  %v4569_v32 = vadd.f32 %v5760_v5, %v7779_v22  ;;  %v4560_v61 = vpop.f32.mrb[15].mxu0  ;;  %v4814_v15 = vmax.f32 %v4566_v12, 0.0  ;;  %s6225_s30 = scalar_lea.vmem %s5192_s29, 64  ;;  %p6230_p3 = scmp.lt.s32.totalorder %s5192_s29, %s5192_s29 }
 0x5e2   :  { %v4561_v18 = vadd.f32 %v7779_v22, %v4560_v61  ;;  %v4333_v38 = vpop.f32.mrb[128].mxu1  ;;  %v4812_v55 = vmax.f32 %v4558_v39, 0.0  ;;  %p6226_p2 = scmp.ne.s32.totalorder %s5192_s29, %s6225_s30  ;;  %p6231_p4 = scmp.lt.s32.totalorder %s6225_s30, %s6225_s30 }
 0x5e3   :  { %v4815_v29 = vmax.f32 %v4569_v32, 0.0  ;;  %v4334_v40 = vadd.f32 %v7692_v42, %v4333_v38  ;;  %v4335_v58 = vpop.f32.mrb[129].mxu1  ;;  %5813 = vmatprep.mubr.bf16.mxu0 %v4448_v3 }
 0x5e4   :  { %v4813_v52 = vmax.f32 %v4561_v18, 0.0  ;;  %v4336_v25 = vpop.f32.mrb[130].mxu1  ;;  %p6232_p5 = por %p6231_p4, %p6230_p3 }
 0x5e5   :  { %v7787_v59 = vpack.c.bf16 %v4815_v29, %v4814_v15  ;;  %v4337_v57 = vadd.f32 %v7692_v42, %v4336_v25  ;;  %v4338_v62 = vpop.f32.mrb[131].mxu1  ;;  %v4414_v60 = vmax.f32 %v4334_v40, 0.0 }
 0x5e6   :  { %v7790_v0 = vpack.c.bf16 %v4813_v52, %v4812_v55  ;;  %p6233_p6 = pnand %p6232_p5, %p6226_p2 }
 0x5e7   :  { %v4415_v17 = vmax.f32 %v4337_v57, 0.0 }
 0x5e9   :  { %v4449_v46 = vpack.c.bf16 %v4415_v17, %v4414_v60 }
 0x5ea   :  { %v4341_v24 = vpop.f32.mrb[132].mxu1 }
 0x5eb   :  { %v4342_v23 = vadd.f32 %v7692_v42, %v4341_v24  ;;  %v4343_v31 = vpop.f32.mrb[133].mxu1  ;;  %5814 = vmatmul.mubr.bf16.gmra.mrb[68].mxu0 %v4449_v46 }
 0x5ec   :  { %v4344_v14 = vpop.f32.mrb[134].mxu1 }
 0x5ed   :  { %v4345_v16 = vadd.f32 %v7692_v42, %v4344_v14  ;;  %v4346_v45 = vpop.f32.mrb[135].mxu1  ;;  %v4416_v1 = vmax.f32 %v4342_v23, 0.0 }
 0x5ee   :  { %v5763_v20 = vpop.f32.mrb[16].mxu0 }
 0x5ef   :  { %v4417_v10 = vmax.f32 %v4345_v16, 0.0  ;;  %v4582_v47 = vadd.f32 %v5763_v20, %v7779_v22  ;;  %v4573_v30 = vpop.f32.mrb[17].mxu0 }
 0x5f0   :  { %v4574_v6 = vadd.f32 %v7779_v22, %v4573_v30  ;;  %v5764_v9 = vpop.f32.mrb[18].mxu0 }
 0x5f1   :  { %v4450_v28 = vpack.c.bf16 %v4417_v10, %v4416_v1  ;;  %v4585_v21 = vadd.f32 %v5764_v9, %v7779_v22  ;;  %v4576_v50 = vpop.f32.mrb[19].mxu0  ;;  %v4818_v8 = vmax.f32 %v4582_v47, 0.0 }
 0x5f2   :  { %v4577_v49 = vadd.f32 %v7779_v22, %v4576_v50  ;;  %v4349_v51 = vpop.f32.mrb[136].mxu1  ;;  %v4816_v35 = vmax.f32 %v4574_v6, 0.0 }
 0x5f3   :  { %v4819_v34 = vmax.f32 %v4585_v21, 0.0  ;;  %v4350_v54 = vadd.f32 %v7692_v42, %v4349_v51  ;;  %v4351_v26 = vpop.f32.mrb[137].mxu1  ;;  %5817 = vmatprep.mubr.bf16.mxu0 %v4450_v28 }
 0x5f4   :  { %v4817_v44 = vmax.f32 %v4577_v49, 0.0  ;;  %v4352_v11 = vpop.f32.mrb[138].mxu1 }
 0x5f5   :  { %v7799_v36 = vpack.c.bf16 %v4819_v34, %v4818_v8  ;;  %v4353_v19 = vadd.f32 %v7692_v42, %v4352_v11  ;;  %v4354_v13 = vpop.f32.mrb[139].mxu1  ;;  %v4418_v27 = vmax.f32 %v4350_v54, 0.0  ;;  %v4922_v8 = vsel %vm4917_vm3, %v7790_v0, 0 }
 0x5f6   :  { %v7802_v7 = vpack.c.bf16 %v4817_v44, %v4816_v35  ;;  %v4925_v11 = vsel %vm4917_vm3, %v7787_v59, 0 }
 0x5f7   :  { %v4419_v37 = vmax.f32 %v4353_v19, 0.0 }
 0x5f9   :  { %v4451_v2 = vpack.c.bf16 %v4419_v37, %v4418_v27 }
 0x5fb   :  { %5818 = vmatmul.mubr.bf16.gmra.mrb[72].mxu0 %v4451_v2 }
 0x5fc   :  { %5721 = vmatprep.mubr.msk.bf16.mxu0 %vm4917_vm3, %v7807_v4 }
 0x5fe   :  { %v5767_v41 = vpop.f32.mrb[20].mxu0 }
 0x5ff   :  { %v4598_v43 = vadd.f32 %v5767_v41, %v7779_v22  ;;  %v4589_v42 = vpop.f32.mrb[21].mxu0 }
 0x600   :  { %v4590_v12 = vadd.f32 %v7779_v22, %v4589_v42  ;;  %v5768_v53 = vpop.f32.mrb[22].mxu0 }
 0x601   :  { %v4601_v39 = vadd.f32 %v5768_v53, %v7779_v22  ;;  %v4592_v5 = vpop.f32.mrb[23].mxu0  ;;  %v4822_v32 = vmax.f32 %v4598_v43, 0.0 }
 0x602   :  { %v4593_v3 = vadd.f32 %v7779_v22, %v4592_v5  ;;  %v4820_v18 = vmax.f32 %v4590_v12, 0.0  ;;  %v4928_v12 = vsel %vm4917_vm3, %v7802_v7, 0 }
 0x603   :  { %v4823_v61 = vmax.f32 %v4601_v39, 0.0 }
 0x604   :  { %v4821_v38 = vmax.f32 %v4593_v3, 0.0 }
 0x605   :  { %v7815_v15 = vpack.c.bf16 %v4823_v61, %v4822_v32  ;;  %v4931_v32 = vsel %vm4917_vm3, %v7799_v36, 0 }
 0x606   :  { %v7817_v29 = vpack.c.bf16 %v4821_v38, %v4820_v18 }
 0x60e   :  { %v5771_v40 = vpop.f32.mrb[24].mxu0 }
 0x60f   :  { %v4614_v58 = vadd.f32 %v5771_v40, %v7779_v22  ;;  %v4605_v55 = vpop.f32.mrb[25].mxu0 }
 0x610   :  { %v4606_v52 = vadd.f32 %v7779_v22, %v4605_v55  ;;  %v5772_v25 = vpop.f32.mrb[26].mxu0 }
 0x611   :  { %v4617_v57 = vadd.f32 %v5772_v25, %v7779_v22  ;;  %v4608_v62 = vpop.f32.mrb[27].mxu0  ;;  %v4826_v17 = vmax.f32 %v4614_v58, 0.0 }
 0x612   :  { %v4609_v60 = vadd.f32 %v7779_v22, %v4608_v62  ;;  %v4824_v24 = vmax.f32 %v4606_v52, 0.0 }
 0x613   :  { %v4827_v46 = vmax.f32 %v4617_v57, 0.0  ;;  %v4934_v57 = vsel %vm4917_vm3, %v7817_v29, 0 }
 0x614   :  { %v4825_v23 = vmax.f32 %v4609_v60, 0.0 }
 0x615   :  { %v7823_v31 = vpack.c.bf16 %v4827_v46, %v4826_v17 }
 0x616   :  { %v7825_v14 = vpack.c.bf16 %v4825_v23, %v4824_v24  ;;  %v4937_v24 = vsel %vm4917_vm3, %v7815_v15, 0 }
 0x61e   :  { %v5775_v16 = vpop.f32.mrb[28].mxu0 }
 0x61f   :  { %v4630_v45 = vadd.f32 %v5775_v16, %v7779_v22  ;;  %v4621_v20 = vpop.f32.mrb[29].mxu0 }
 0x620   :  { %v4622_v1 = vadd.f32 %v7779_v22, %v4621_v20  ;;  %v5776_v10 = vpop.f32.mrb[30].mxu0 }
 0x621   :  { %v4633_v47 = vadd.f32 %v5776_v10, %v7779_v22  ;;  %v4624_v30 = vpop.f32.mrb[31].mxu0  ;;  %v4830_v9 = vmax.f32 %v4630_v45, 0.0 }
 0x622   :  { %v4625_v6 = vadd.f32 %v7779_v22, %v4624_v30  ;;  %v4828_v21 = vmax.f32 %v4622_v1, 0.0 }
 0x623   :  { %v4831_v28 = vmax.f32 %v4633_v47, 0.0 }
 0x624   :  { %v4829_v50 = vmax.f32 %v4625_v6, 0.0  ;;  %v4940_v6 = vsel %vm4917_vm3, %v7825_v14, 0 }
 0x625   :  { %v4886_v49 = vpack.c.bf16 %v4831_v28, %v4830_v9 }
 0x626   :  { %v4885_v51 = vpack.c.bf16 %v4829_v50, %v4828_v21 }
 0x628   :  { %5821 = vmatprep.subr.msk.bf16.mxu0 %vm4917_vm3, %v4885_v51 }
 0x629   :  { %5706 = vmatpush3.bf16.xpose.msra.mxu0 %v4922_v8 }
 0x62a   :  { %5822 = vmatprep.subr.msk.bf16.mxu0 %vm4917_vm3, %v4886_v49  ;;  %v4943_v49 = vsel %vm4917_vm3, %v7823_v31, 0 }
 0x62e   :  { %v5779_v34 = vpop.f32.mrb[32].mxu0 }
 0x62f   :  { %v4646_v54 = vadd.f32 %v5779_v34, %v7779_v22  ;;  %v4637_v26 = vpop.f32.mrb[33].mxu0 }
 0x630   :  { %v4638_v35 = vadd.f32 %v7779_v22, %v4637_v26  ;;  %v5780_v44 = vpop.f32.mrb[34].mxu0 }
 0x631   :  { %v4649_v19 = vadd.f32 %v5780_v44, %v7779_v22  ;;  %v4640_v13 = vpop.f32.mrb[35].mxu0  ;;  %5708 = vmatpush3.bf16.xpose.msra.mxu0 %v4925_v11  ;;  %v4834_v0 = vmax.f32 %v4646_v54, 0.0 }
 0x632   :  { %v4641_v27 = vadd.f32 %v7779_v22, %v4640_v13  ;;  %v4832_v2 = vmax.f32 %v4638_v35, 0.0 }
 0x633   :  { %v4835_v37 = vmax.f32 %v4649_v19, 0.0 }
 0x634   :  { %v4833_v41 = vmax.f32 %v4641_v27, 0.0 }
 0x635   :  { %v4888_v43 = vpack.c.bf16 %v4835_v37, %v4834_v0 }
 0x636   :  { %v4887_v42 = vpack.c.bf16 %v4833_v41, %v4832_v2 }
 0x638   :  { %5823 = vmatprep.subr.msk.bf16.mxu0 %vm4917_vm3, %v4887_v42 }
 0x639   :  { %5710 = vmatpush3.bf16.xpose.msra.mxu0 %v4928_v12 }
 0x63a   :  { %5824 = vmatprep.subr.msk.bf16.mxu0 %vm4917_vm3, %v4888_v43 }
 0x63e   :  { %v5783_v59 = vpop.f32.mrb[36].mxu0 }
 0x63f   :  { %v4662_v53 = vadd.f32 %v5783_v59, %v7779_v22  ;;  %v4653_v39 = vpop.f32.mrb[37].mxu0 }
 0x640   :  { %v4654_v5 = vadd.f32 %v7779_v22, %v4653_v39  ;;  %v5784_v3 = vpop.f32.mrb[38].mxu0 }
 0x641   :  { %v4665_v61 = vadd.f32 %v5784_v3, %v7779_v22  ;;  %v4656_v18 = vpop.f32.mrb[39].mxu0  ;;  %5712 = vmatpush3.bf16.xpose.msra.mxu0 %v4931_v32  ;;  %v4838_v7 = vmax.f32 %v4662_v53, 0.0 }
 0x642   :  { %v4657_v38 = vadd.f32 %v7779_v22, %v4656_v18  ;;  %v4836_v58 = vmax.f32 %v4654_v5, 0.0 }
 0x643   :  { %v4839_v40 = vmax.f32 %v4665_v61, 0.0 }
 0x644   :  { %v4837_v55 = vmax.f32 %v4657_v38, 0.0 }
 0x645   :  { %v4890_v52 = vpack.c.bf16 %v4839_v40, %v4838_v7 }
 0x646   :  { %v4889_v25 = vpack.c.bf16 %v4837_v55, %v4836_v58 }
 0x648   :  { %5825 = vmatprep.subr.msk.bf16.mxu0 %vm4917_vm3, %v4889_v25 }
 0x649   :  { %5714 = vmatpush3.bf16.xpose.msra.mxu0 %v4934_v57 }
 0x64a   :  { %5826 = vmatprep.subr.msk.bf16.mxu0 %vm4917_vm3, %v4890_v52 }
 0x64e   :  { %v5787_v36 = vpop.f32.mrb[40].mxu0 }
 0x64f   :  { %v4678_v62 = vadd.f32 %v5787_v36, %v7779_v22  ;;  %v4669_v60 = vpop.f32.mrb[41].mxu0 }
 0x650   :  { %v4670_v17 = vadd.f32 %v7779_v22, %v4669_v60  ;;  %v5788_v46 = vpop.f32.mrb[42].mxu0 }
 0x651   :  { %v4681_v23 = vadd.f32 %v5788_v46, %v7779_v22  ;;  %v4672_v16 = vpop.f32.mrb[43].mxu0  ;;  %5716 = vmatpush3.bf16.xpose.msra.mxu0 %v4937_v24  ;;  %v4842_v29 = vmax.f32 %v4678_v62, 0.0 }
 0x652   :  { %v4673_v45 = vadd.f32 %v7779_v22, %v4672_v16  ;;  %v4840_v1 = vmax.f32 %v4670_v17, 0.0 }
 0x653   :  { %v4843_v20 = vmax.f32 %v4681_v23, 0.0 }
 0x654   :  { %v4841_v10 = vmax.f32 %v4673_v45, 0.0 }
 0x655   :  { %v4892_v47 = vpack.c.bf16 %v4843_v20, %v4842_v29 }
 0x656   :  { %v4891_v30 = vpack.c.bf16 %v4841_v10, %v4840_v1 }
 0x658   :  { %5827 = vmatprep.subr.msk.bf16.mxu0 %vm4917_vm3, %v4891_v30 }
 0x659   :  { %5718 = vmatpush3.bf16.xpose.msra.mxu0 %v4940_v6 }
 0x65a   :  { %5828 = vmatprep.subr.msk.bf16.mxu0 %vm4917_vm3, %v4892_v47 }
 0x65e   :  { %v5791_v15 = vpop.f32.mrb[44].mxu0 }
 0x65f   :  { %v4694_v9 = vadd.f32 %v5791_v15, %v7779_v22  ;;  %v4685_v28 = vpop.f32.mrb[45].mxu0 }
 0x660   :  { %v4686_v21 = vadd.f32 %v7779_v22, %v4685_v28  ;;  %v5792_v50 = vpop.f32.mrb[46].mxu0 }
 0x661   :  { %v4697_v51 = vadd.f32 %v5792_v50, %v7779_v22  ;;  %v4688_v8 = vpop.f32.mrb[47].mxu0  ;;  %5720 = vmatpush3.bf16.xpose.msra.mxu0 %v4943_v49  ;;  %v4846_v14 = vmax.f32 %v4694_v9, 0.0 }
 0x662   :  { %v4689_v34 = vadd.f32 %v7779_v22, %v4688_v8  ;;  %v4844_v26 = vmax.f32 %v4686_v21, 0.0 }
 0x663   :  { %v4847_v54 = vmax.f32 %v4697_v51, 0.0 }
 0x664   :  { %v4845_v35 = vmax.f32 %v4689_v34, 0.0 }
 0x665   :  { %v7871_v44 = vpack.c.bf16 %v4847_v54, %v4846_v14 }
 0x666   :  { %v4893_v11 = vpack.c.bf16 %v4845_v35, %v4844_v26 }
 0x668   :  { %5722 = vmatmul.mubr.msk.bf16.vlgmr.msra.gmra.mrb[76].mxu0 %vm4917_vm3, %v7807_v4 }
 0x669   :  { %5739 = vmatprep.mubr.msk.bf16.mxu0 %vm4917_vm3, %v7807_v4 }
 0x66e   :  { %v5795_v31 = vpop.f32.mrb[48].mxu0 }
 0x66f   :  { %v4710_v19 = vadd.f32 %v5795_v31, %v7779_v22  ;;  %v4701_v13 = vpop.f32.mrb[49].mxu0  ;;  %v4970_v31 = vsel %vm4917_vm3, %v4893_v11, 0 }
 0x670   :  { %v4702_v27 = vadd.f32 %v7779_v22, %v4701_v13  ;;  %v5796_v0 = vpop.f32.mrb[50].mxu0 }
 0x671   :  { %v4713_v37 = vadd.f32 %v5796_v0, %v7779_v22  ;;  %v4704_v2 = vpop.f32.mrb[51].mxu0  ;;  %v4850_v43 = vmax.f32 %v4710_v19, 0.0 }
 0x672   :  { %v4705_v41 = vadd.f32 %v7779_v22, %v4704_v2  ;;  %v4848_v12 = vmax.f32 %v4702_v27, 0.0  ;;  %v4973_v2 = vsel %vm4917_vm3, %v7871_v44, 0 }
 0x673   :  { %v4851_v42 = vmax.f32 %v4713_v37, 0.0 }
 0x674   :  { %v4849_v59 = vmax.f32 %v4705_v41, 0.0 }
 0x675   :  { %v7881_v53 = vpack.c.bf16 %v4851_v42, %v4850_v43 }
 0x676   :  { %v7883_v39 = vpack.c.bf16 %v4849_v59, %v4848_v12 }
 0x67e   :  { %v5799_v5 = vpop.f32.mrb[52].mxu0 }
 0x67f   :  { %v4726_v3 = vadd.f32 %v5799_v5, %v7779_v22  ;;  %v4717_v32 = vpop.f32.mrb[53].mxu0 }
 0x680   :  { %v4718_v61 = vadd.f32 %v7779_v22, %v4717_v32  ;;  %v5800_v18 = vpop.f32.mrb[54].mxu0 }
 0x681   :  { %v4729_v38 = vadd.f32 %v5800_v18, %v7779_v22  ;;  %v4720_v7 = vpop.f32.mrb[55].mxu0  ;;  %v4854_v58 = vmax.f32 %v4726_v3, 0.0 }
 0x682   :  { %v4721_v40 = vadd.f32 %v7779_v22, %v4720_v7  ;;  %v4852_v52 = vmax.f32 %v4718_v61, 0.0  ;;  %v4976_v61 = vsel %vm4917_vm3, %v7883_v39, 0 }
 0x683   :  { %v4855_v55 = vmax.f32 %v4729_v38, 0.0 }
 0x684   :  { %v4853_v25 = vmax.f32 %v4721_v40, 0.0 }
 0x685   :  { %v7889_v57 = vpack.c.bf16 %v4855_v55, %v4854_v58  ;;  %v4979_v58 = vsel %vm4917_vm3, %v7881_v53, 0 }
 0x686   :  { %v7891_v36 = vpack.c.bf16 %v4853_v25, %v4852_v52 }
 0x68e   :  { %v5803_v62 = vpop.f32.mrb[56].mxu0 }
 0x68f   :  { %v4742_v60 = vadd.f32 %v5803_v62, %v7779_v22  ;;  %v4733_v17 = vpop.f32.mrb[57].mxu0 }
 0x690   :  { %v4734_v46 = vadd.f32 %v7779_v22, %v4733_v17  ;;  %v5804_v24 = vpop.f32.mrb[58].mxu0 }
 0x691   :  { %v4745_v23 = vadd.f32 %v5804_v24, %v7779_v22  ;;  %v4736_v16 = vpop.f32.mrb[59].mxu0  ;;  %v4858_v29 = vmax.f32 %v4742_v60, 0.0 }
 0x692   :  { %v4737_v45 = vadd.f32 %v7779_v22, %v4736_v16  ;;  %v4856_v1 = vmax.f32 %v4734_v46, 0.0 }
 0x693   :  { %v4859_v20 = vmax.f32 %v4745_v23, 0.0  ;;  %v4982_v23 = vsel %vm4917_vm3, %v7891_v36, 0 }
 0x694   :  { %v4857_v10 = vmax.f32 %v4737_v45, 0.0 }
 0x695   :  { %v7897_v47 = vpack.c.bf16 %v4859_v20, %v4858_v29 }
 0x696   :  { %v7899_v30 = vpack.c.bf16 %v4857_v10, %v4856_v1  ;;  %v4985_v1 = vsel %vm4917_vm3, %v7889_v57, 0 }
 0x697   :  { %v4991_v57 = vsel %vm4917_vm3, %v7897_v47, 0 }
 0x69e   :  { %v5807_v6 = vpop.f32.mrb[60].mxu0 }
 0x69f   :  { %v4758_v15 = vadd.f32 %v5807_v6, %v7779_v22  ;;  %v4749_v9 = vpop.f32.mrb[61].mxu0 }
 0x6a0   :  { %v4750_v28 = vadd.f32 %v7779_v22, %v4749_v9  ;;  %v5808_v21 = vpop.f32.mrb[62].mxu0 }
 0x6a1   :  { %v4761_v50 = vadd.f32 %v5808_v21, %v7779_v22  ;;  %v4752_v49 = vpop.f32.mrb[63].mxu0  ;;  %v4862_v8 = vmax.f32 %v4758_v15, 0.0 }
 0x6a2   :  { %v4753_v51 = vadd.f32 %v7779_v22, %v4752_v49  ;;  %v4860_v14 = vmax.f32 %v4750_v28, 0.0 }
 0x6a3   :  { %v4863_v34 = vmax.f32 %v4761_v50, 0.0 }
 0x6a4   :  { %v4861_v54 = vmax.f32 %v4753_v51, 0.0  ;;  %v4988_v51 = vsel %vm4917_vm3, %v7899_v30, 0 }
 0x6a5   :  { %v4902_v26 = vpack.c.bf16 %v4863_v34, %v4862_v8  ;;  %v4911_v34 = vpop.permute.xlu0 %4910 }
 0x6a6   :  { %v4901_v35 = vpack.c.bf16 %v4861_v54, %v4860_v14 }
 0x6a8   :  { %5829 = vmatprep.subr.msk.bf16.mxu0 %vm4917_vm3, %v4901_v35 }
 0x6a9   :  { %5724 = vmatpush3.bf16.xpose.msra.mxu0 %v4970_v31 }
 0x6aa   :  { %5830 = vmatprep.subr.msk.bf16.mxu0 %vm4917_vm3, %v4902_v26 }
 0x6ae   :  { %v5811_v19 = vpop.f32.mrb[64].mxu0 }
 0x6af   :  { %v4774_v13 = vadd.f32 %v5811_v19, %v7779_v22  ;;  %v4765_v27 = vpop.f32.mrb[65].mxu0 }
 0x6b0   :  { %v4766_v0 = vadd.f32 %v7779_v22, %v4765_v27  ;;  %v5812_v37 = vpop.f32.mrb[66].mxu0 }
 0x6b1   :  { %v4777_v41 = vadd.f32 %v5812_v37, %v7779_v22  ;;  %v4768_v43 = vpop.f32.mrb[67].mxu0  ;;  %5726 = vmatpush3.bf16.xpose.msra.mxu0 %v4973_v2  ;;  %v4866_v11 = vmax.f32 %v4774_v13, 0.0 }
 0x6b2   :  { %v4769_v42 = vadd.f32 %v7779_v22, %v4768_v43  ;;  %v4864_v59 = vmax.f32 %v4766_v0, 0.0 }
 0x6b3   :  { %v4867_v12 = vmax.f32 %v4777_v41, 0.0  ;;  %v3915_v41 = vmul.f32 7.8125e-05, %v7667_v63 }
 0x6b4   :  { %v4865_v5 = vmax.f32 %v4769_v42, 0.0  ;;  %v3916_v42 = vmul.f32 7.8125e-05, %v7669_v33 }
 0x6b5   :  { %v4904_v3 = vpack.c.bf16 %v4867_v12, %v4866_v11 }
 0x6b6   :  { %v4903_v32 = vpack.c.bf16 %v4865_v5, %v4864_v59 }
 0x6b8   :  { %5831 = vmatprep.subr.msk.bf16.mxu0 %vm4917_vm3, %v4903_v32 }
 0x6b9   :  { %5728 = vmatpush3.bf16.xpose.msra.mxu0 %v4976_v61 }
 0x6ba   :  { %5832 = vmatprep.subr.msk.bf16.mxu0 %vm4917_vm3, %v4904_v3 }
 0x6be   :  { %v5815_v44 = vpop.f32.mrb[68].mxu0 }
 0x6bf   :  { %v4790_v18 = vadd.f32 %v5815_v44, %v7779_v22  ;;  %v4781_v38 = vpop.f32.mrb[69].mxu0 }
 0x6c0   :  { %v4782_v7 = vadd.f32 %v7779_v22, %v4781_v38  ;;  %v5816_v40 = vpop.f32.mrb[70].mxu0 }
 0x6c1   :  { %v4793_v55 = vadd.f32 %v5816_v40, %v7779_v22  ;;  %v4784_v52 = vpop.f32.mrb[71].mxu0  ;;  %5730 = vmatpush3.bf16.xpose.msra.mxu0 %v4979_v58  ;;  %v4870_v39 = vmax.f32 %v4790_v18, 0.0 }
 0x6c2   :  { %v4785_v25 = vadd.f32 %v7779_v22, %v4784_v52  ;;  %v4868_v60 = vmax.f32 %v4782_v7, 0.0 }
 0x6c3   :  { %v4871_v62 = vmax.f32 %v4793_v55, 0.0 }
 0x6c4   :  { %v4869_v17 = vmax.f32 %v4785_v25, 0.0 }
 0x6c5   :  { %v4906_v46 = vpack.c.bf16 %v4871_v62, %v4870_v39 }
 0x6c6   :  { %v4905_v24 = vpack.c.bf16 %v4869_v17, %v4868_v60 }
 0x6c8   :  { %5833 = vmatprep.subr.msk.bf16.mxu0 %vm4917_vm3, %v4905_v24 }
 0x6c9   :  { %5732 = vmatpush3.bf16.xpose.msra.mxu0 %v4982_v23 }
 0x6ca   :  { %5834 = vmatprep.subr.msk.bf16.mxu0 %vm4917_vm3, %v4906_v46 }
 0x6ce   :  { %v5819_v53 = vpop.f32.mrb[72].mxu0 }
 0x6cf   :  { %v4806_v16 = vadd.f32 %v5819_v53, %v7779_v22  ;;  %v4797_v45 = vpop.f32.mrb[73].mxu0 }
 0x6d0   :  { %v4798_v29 = vadd.f32 %v7779_v22, %v4797_v45  ;;  %v5820_v20 = vpop.f32.mrb[74].mxu0  ;;  %v3917_v45 = vmul.f32 7.8125e-05, %v7733_v56 }
 0x6d1   :  { %v4809_v10 = vadd.f32 %v5820_v20, %v7779_v22  ;;  %v4800_v6 = vpop.f32.mrb[75].mxu0  ;;  %5734 = vmatpush3.bf16.xpose.msra.mxu0 %v4985_v1  ;;  %v4874_v36 = vmax.f32 %v4806_v16, 0.0 }
 0x6d2   :  { %v4801_v15 = vadd.f32 %v7779_v22, %v4800_v6  ;;  %v4872_v28 = vmax.f32 %v4798_v29, 0.0  ;;  %v8201_v22 = vld [vmem:[#allocation68_spill] sm:$0xff]  ;;  %v3918_v29 = vmul.f32 7.8125e-05, %v7735_v48  ;;  %v8202_v48 = vld [vmem:[#allocation69_spill] sm:$0xff] }
 0x6d3   :  { %v4875_v9 = vmax.f32 %v4809_v10, 0.0  ;;  %v3926_v8 = vsub.s32 0, %v8201_v22 }
 0x6d4   :  { %v4873_v21 = vmax.f32 %v4801_v15, 0.0 }
 0x6d5   :  { %v4908_v50 = vpack.c.bf16 %v4875_v9, %v4874_v36  ;;  %v4916_v14 = vrot.slane %v4911_v34, %v3926_v8 }
 0x6d6   :  { %v4907_v49 = vpack.c.bf16 %v4873_v21, %v4872_v28 }
 0x6d8   :  { %5835 = vmatprep.subr.msk.bf16.mxu0 %vm4917_vm3, %v4907_v49 }
 0x6d9   :  { %5736 = vmatpush3.bf16.xpose.msra.mxu0 %v4988_v51 }
 0x6da   :  { %5836 = vmatprep.subr.msk.bf16.mxu0 %vm4917_vm3, %v4908_v50 }
 0x6e1   :  { %5738 = vmatpush3.bf16.xpose.msra.mxu0 %v4991_v57 }
 0x6e8   :  { %5740 = vmatmul.mubr.msk.bf16.vlgmr.msra.gmra.mrb[80].mxu0 %vm4917_vm3, %v7807_v4  ;;  %v3922_v4 = vpop.permute.xlu0 %3921 }
 0x6e9   :  { %v3927_v43 = vrot.slane %v3922_v4, %v3926_v8 }
 0x6eb   :  { %v3928_v11 = vadd.f32 %v3927_v43, %v3915_v41  ;;  %v3929_v59 = vadd.f32 %v3927_v43, %v3916_v42  ;;  %v3930_v20 = vadd.f32 %v3927_v43, %v3917_v45  ;;  %v3931_v10 = vadd.f32 %v3927_v43, %v3918_v29 }
 0x73b   :  { %v5051_v54 = vpop.f32.mrb[76].mxu0 }
 0x73c   :  { %v5052_v26 = vadd.f32 %v5051_v54, %v4916_v14  ;;  %v5053_v35 = vpop.f32.mrb[77].mxu0  ;;  %v8203_v54 = vlaneseq }
 0x73d   :  { %v5054_v31 = vadd.f32 %v5053_v35, %v4916_v14  ;;  %v5055_v19 = vpop.f32.mrb[78].mxu0 }
 0x73e   :  { %v5521_v30 = vmul.f32 -1.442695, %v5052_v26  ;;  %v5056_v13 = vpop.f32.mrb[79].mxu0  ;;  %vm5182_vm6 = vcmp.lt.s32.totalorder %v8203_v54, 512 }
 0x73f   :  { %v5522_v27 = vmul.f32 -1.442695, %v5054_v31 }
 0x740   :  { %6084 = vpow2.f32 %v5521_v30 }
 0x741   :  { %6086 = vpow2.f32 %v5522_v27 }
 0x74a   :  { %v6085_v0 = vpop.eup %6084 }
 0x74b   :  { %v6087_v47 = vpop.eup %6086  ;;  %v5111_v37 = vadd.f32 1.0, %v6085_v0 }
 0x74c   :  { %v5112_v2 = vadd.f32 1.0, %v6087_v47 }
 0x74d   :  { %6088 = vrcp.f32 %v5111_v37 }
 0x74e   :  { %6090 = vrcp.f32 %v5112_v2 }
 0x757   :  { %v6089_v12 = vpop.eup %6088 }
 0x758   :  { %v6091_v5 = vpop.eup %6090  ;;  %v5123_v3 = vadd.f32 %v6089_v12, %v3928_v11 }
 0x759   :  { %v5124_v32 = vadd.f32 %v6091_v5, %v3929_v59 }
 0x75a   :  { %v5525_v61 = vmul.f32 -1.442695, %v5123_v3 }
 0x75b   :  { %v5526_v44 = vmul.f32 -1.442695, %v5124_v32 }
 0x75c   :  { %6092 = vpow2.f32 %v5525_v61 }
 0x75d   :  { %6094 = vpow2.f32 %v5526_v44 }
 0x766   :  { %v6093_v18 = vpop.eup %6092 }
 0x767   :  { %v6095_v38 = vpop.eup %6094  ;;  %v5139_v7 = vadd.f32 1.0, %v6093_v18 }
 0x768   :  { %v5140_v40 = vadd.f32 1.0, %v6095_v38 }
 0x769   :  { %6096 = vrcp.f32 %v5139_v7 }
 0x76a   :  { %6098 = vrcp.f32 %v5140_v40 }
 0x773   :  { %v6097_v63 = vpop.eup %6096 }
 0x774   :  { %v6099_v58 = vpop.eup %6098 }
 0x775   :  { %v5155_v55 = vcombine.low %v6097_v63, %v6099_v58 }
 0x777   :  { %v5163_v8 = vrot.slane %v5155_v55, %v8202_v48 }
 0x7bb   :  { %v5092_v33 = vpop.f32.mrb[80].mxu0 }
 0x7bc   :  { %v5093_v52 = vadd.f32 %v5092_v33, %v4916_v14  ;;  %v5094_v25 = vpop.f32.mrb[81].mxu0 }
 0x7bd   :  { %v5095_v39 = vadd.f32 %v5094_v25, %v4916_v14  ;;  %v5096_v62 = vpop.f32.mrb[82].mxu0 }
 0x7be   :  { %v5523_v60 = vmul.f32 -1.442695, %v5093_v52  ;;  %v5097_v17 = vpop.f32.mrb[83].mxu0 }
 0x7bf   :  { %v5524_v46 = vmul.f32 -1.442695, %v5095_v39 }
 0x7c0   :  { %6100 = vpow2.f32 %v5523_v60 }
 0x7c1   :  { %6102 = vpow2.f32 %v5524_v46 }
 0x7ca   :  { %v6101_v24 = vpop.eup %6100 }
 0x7cb   :  { %v6103_v23 = vpop.eup %6102  ;;  %v5113_v53 = vadd.f32 1.0, %v6101_v24 }
 0x7cc   :  { %v5114_v16 = vadd.f32 1.0, %v6103_v23 }
 0x7cd   :  { %6104 = vrcp.f32 %v5113_v53 }
 0x7ce   :  { %6106 = vrcp.f32 %v5114_v16 }
 0x7d7   :  { %v6105_v1 = vpop.eup %6104 }
 0x7d8   :  { %v6107_v6 = vpop.eup %6106  ;;  %v5125_v15 = vadd.f32 %v6105_v1, %v3930_v20 }
 0x7d9   :  { %v5126_v36 = vadd.f32 %v6107_v6, %v3931_v10 }
 0x7da   :  { %v5527_v9 = vmul.f32 -1.442695, %v5125_v15 }
 0x7db   :  { %v5528_v28 = vmul.f32 -1.442695, %v5126_v36 }
 0x7dc   :  { %6108 = vpow2.f32 %v5527_v9 }
 0x7dd   :  { %6110 = vpow2.f32 %v5528_v28 }
 0x7e6   :  { %v6109_v21 = vpop.eup %6108 }
 0x7e7   :  { %v6111_v50 = vpop.eup %6110  ;;  %v5141_v49 = vadd.f32 1.0, %v6109_v21 }
 0x7e8   :  { %v5142_v51 = vadd.f32 1.0, %v6111_v50 }
 0x7e9   :  { %6112 = vrcp.f32 %v5141_v49 }
 0x7ea   :  { %6114 = vrcp.f32 %v5142_v51 }
 0x7f3   :  { %v6113_v57 = vpop.eup %6112 }
 0x7f4   :  { %v6115_v56 = vpop.eup %6114 }
 0x7f5   :  { %v5156_v22 = vcombine.low %v6113_v57, %v6115_v56 }
 0x7f7   :  { %v5170_v34 = vrot.slane %v5156_v22, %v8202_v48 }
 0x7f9   :  { %v5171_v14 = vcombine.low %v5163_v8, %v5170_v34 }
 0x7fb   :  { %v5178_v26 = vrot.slane %v5171_v14, %v8202_v48 }
 0x7fd   :  { %5184 = vst.msk [vmem:[#allocation7] sm:$0xf] %vm5182_vm6, %v5178_v26 }
 0x7fe   :  { %6236 = shalt.err (!%p6233_p6)
}
 0x7ff   :  { %s6237_s15 = scalar_lea.hbm %s7975_s12, 64 }
 0x800   :  { %p6238_p7 = scmp.ne.s32.totalorder %s7975_s12, %s6237_s15  ;;  %p6241_p8 = scmp.lt.u32.totalorder %s6237_s15, %s7975_s12 }
 0x802   :  { %p6243_p9 = pnand %p6241_p8, %p6238_p7 }
 0x804   :  { %6246 = shalt.err (!%p6243_p9)
}
 0x805   :  { %5194 = dma.vmem_to_hbm [thread:$0]  %s5192_s29, 64, %s7975_s12, [#allocation4]  }
 0x806   :  { %6251 = dma.done.wait [#allocation4], 64  }
 0x807   :  { %6252 = vsyncadd [#allocation4], 4294967232 }
 0x808   :  { %5198 = vsyncpa [#allocation3], 1 }
 0x809   :  { %5199 = vsyncpa [#allocation6], 1 }
 0x80a   :  { %5200 = vsyncpa [#allocation4], 1 }

</bundles_post_ra>
